<compile_context>
chip_gen: v7x
topology: tpu7x:2x2x1
jax: 0.10.0
libtpu: 0.0.40
codegen_flags: <defaults>
</compile_context>

<pallas_src>
import math
import functools

import jax
import jax.numpy as jnp
from jax.experimental import pallas as pl
from jax.experimental.pallas import tpu as pltpu

NEG_INF = -1e30
BF16 = jnp.bfloat16
VMEM_LIMIT = 48 * 1024 * 1024   # explicit scoped-VMEM cap (above defaults, below physical)


# ----------------------------- in-kernel helpers -----------------------------

def _layernorm(x, g, b, eps):
    mean = jnp.mean(x, axis=-1, keepdims=True)
    c = x - mean
    var = jnp.mean(c * c, axis=-1, keepdims=True)
    return c * jax.lax.rsqrt(var + eps) * g + b


def _gelu_tanh(x):
    c = math.sqrt(2.0 / math.pi)
    return 0.5 * x * (1.0 + jnp.tanh(c * (x + 0.044715 * x * x * x)))


def _softmax_rows(s):
    s = s - jnp.max(s, axis=-1, keepdims=True)
    p = jnp.exp(s)
    return p * pl.reciprocal(jnp.sum(p, axis=-1, keepdims=True), approx=True)


def _dot(a, b):
    """bf16 MXU matmul with f32 accumulation."""
    return jnp.dot(a.astype(BF16), b.astype(BF16), preferred_element_type=jnp.float32)


def _qkt(q, k):
    """(rq, hd) x (rk, hd) -> (rq, rk), contracting last dims (no XLU transpose)."""
    return jax.lax.dot_general(q.astype(BF16), k.astype(BF16),
                               (((1,), (1,)), ((), ())),
                               preferred_element_type=jnp.float32)


def _rep(shape):
    """Grid-invariant (weight) block: full array, same block every grid step."""
    nd = len(shape)
    return pl.BlockSpec(shape, lambda b: (0,) * nd)


# ----------------------------- fused encoder layer -----------------------------

def _encoder_layer_kernel(src_ref, pos_ref, bias_ref,
                          wqk_ref, bqk_ref, wv_ref, bv_ref, wo_ref, bo_ref,
                          ln1_g_ref, ln1_b_ref,
                          w1_ref, b1_ref, w2_ref, b2_ref,
                          ln2_g_ref, ln2_b_ref,
                          o_ref, *, nhead, eps):
    x3 = src_ref[...]                            # (bb, L, D) f32
    pos3 = pos_ref[...]                          # (bb, L, D)
    bias3 = bias_ref[...]                        # (bb, 1, L) additive key-padding bias
    bb, L, D = x3.shape
    hd = D // nhead

    x = x3.reshape(bb * L, D)                    # leading-dim collapse (layout preserving)
    qk_in = (x3 + pos3).reshape(bb * L, D)

    # fused q|k projection (1/sqrt(hd) pre-folded into q columns); v projection on src
    qk = _dot(qk_in, wqk_ref[...]) + bqk_ref[...]
    v = _dot(x, wv_ref[...]) + bv_ref[...]
    q = qk[:, :D].astype(BF16)
    k = qk[:, D:].astype(BF16)
    vv = v.astype(BF16)

    # multi-head attention; per-head contexts stacked, ONE full-K output projection after
    ctx_rows = []
    for b in range(bb):
        rs = slice(b * L, (b + 1) * L)
        bias_b = jnp.broadcast_to(bias3[b], (L, L))          # hoisted out of head loop
        head_ctx = []
        for h in range(nhead):
            cs = slice(h * hd, (h + 1) * hd)
            p = _softmax_rows(_qkt(q[rs, cs], k[rs, cs]) + bias_b)
            head_ctx.append(_dot(p, vv[rs, cs]))             # (L, hd)
        ctx_rows.append(jnp.concatenate(head_ctx, axis=1))   # (L, D)
    ctx = jnp.concatenate(ctx_rows, axis=0)                  # (bb*L, D)

    attn = _dot(ctx, wo_ref[...]) + bo_ref[...]

    # residual + LN1, ReLU FFN, residual + LN2 — epilogues of the same kernel
    h1 = _layernorm(x + attn, ln1_g_ref[...], ln1_b_ref[...], eps)
    ff = jnp.maximum(_dot(h1, w1_ref[...]) + b1_ref[...], 0.0)
    ff = _dot(ff, w2_ref[...]) + b2_ref[...]
    o_ref[...] = _layernorm(h1 + ff, ln2_g_ref[...], ln2_b_ref[...], eps).reshape(bb, L, D)


def encoder_layer(src, pos, key_bias, p, nhead, batch_block=1):
    """One fused TransformerEncoderLayer.forward_post (eval mode).
    src/pos: (B, L, D) f32; key_bias: (B, 1, L) additive (0 or NEG_INF)."""
    B, L, D = src.shape
    F = p['w1'].shape[1]
    bb = batch_block
    assert B % bb == 0
    kernel = functools.partial(_encoder_layer_kernel, nhead=nhead, eps=1e-5)
    return pl.pallas_call(
        kernel,
        out_shape=jax.ShapeDtypeStruct((B, L, D), jnp.float32),
        grid=(B // bb,),
        in_specs=[
            pl.BlockSpec((bb, L, D), lambda b: (b, 0, 0)),    # src
            pl.BlockSpec((bb, L, D), lambda b: (b, 0, 0)),    # pos
            pl.BlockSpec((bb, 1, L), lambda b: (b, 0, 0)),    # key bias
            _rep((D, 2 * D)), _rep((1, 2 * D)),               # wqk, bqk
            _rep((D, D)), _rep((1, D)),                       # wv, bv
            _rep((D, D)), _rep((1, D)),                       # wo, bo
            _rep((1, D)), _rep((1, D)),                       # ln1
            _rep((D, F)), _rep((1, F)),                       # w1, b1
            _rep((F, D)), _rep((1, D)),                       # w2, b2
            _rep((1, D)), _rep((1, D)),                       # ln2
        ],
        out_specs=pl.BlockSpec((bb, L, D), lambda b: (b, 0, 0)),
        compiler_params=pltpu.CompilerParams(
            dimension_semantics=("parallel",),
            vmem_limit_bytes=VMEM_LIMIT),
    )(src, pos, key_bias,
      p['wqk'], p['bqk'].reshape(1, -1),
      p['wv'], p['bv'].reshape(1, -1),
      p['wo'], p['bo'].reshape(1, -1),
      p['ln1_g'].reshape(1, -1), p['ln1_b'].reshape(1, -1),
      p['w1'], p['b1'].reshape(1, -1),
      p['w2'], p['b2'].reshape(1, -1),
      p['ln2_g'].reshape(1, -1), p['ln2_b'].reshape(1, -1))


# ----------------------------- fused cross (BertConnection) layer -----------------------------

def _cross_layer_kernel(v_ref, t_ref, vbias_ref, tbias_ref,
                        wqkv1_ref, bqkv1_ref, wqkv2_ref, bqkv2_ref,
                        d1w_ref, d1b_ref, d2w_ref, d2b_ref,
                        ln1_g_ref, ln1_b_ref, ln2_g_ref, ln2_b_ref,
                        viw_ref, vib_ref, vow_ref, vob_ref, vlng_ref, vlnb_ref,
                        tiw_ref, tib_ref, tow_ref, tob_ref, tlng_ref, tlnb_ref,
                        ov_ref, ot_ref, *, nhead, eps):
    ve3 = v_ref[...]                 # (bb, Lv, D)
    te3 = t_ref[...]                 # (bb, Lt, D)
    vbias3 = vbias_ref[...]          # (bb, 1, Lv) additive mask over vision keys
    tbias3 = tbias_ref[...]          # (bb, 1, Lt) additive mask over text keys
    bb, Lv, D = ve3.shape
    Lt = te3.shape[1]
    hd = D // nhead

    ve = ve3.reshape(bb * Lv, D)
    te = te3.reshape(bb * Lt, D)

    # fused per-stream QKV projections (q columns pre-scaled by 1/sqrt(hd))
    qkv1 = _dot(ve, wqkv1_ref[...]) + bqkv1_ref[...]
    qkv2 = _dot(te, wqkv2_ref[...]) + bqkv2_ref[...]
    q1 = qkv1[:, :D].astype(BF16)
    k1 = qkv1[:, D:2 * D].astype(BF16)
    v1 = qkv1[:, 2 * D:].astype(BF16)
    q2 = qkv2[:, :D].astype(BF16)
    k2 = qkv2[:, D:2 * D].astype(BF16)
    v2 = qkv2[:, 2 * D:].astype(BF16)

    ctx_t_rows = []   # text queries over vision keys/values -> dense2 path (Lt rows)
    ctx_v_rows = []   # vision queries over text keys/values -> dense1 path (Lv rows)
    for b in range(bb):
        rv = slice(b * Lv, (b + 1) * Lv)
        rt = slice(b * Lt, (b + 1) * Lt)
        vbias_b = jnp.broadcast_to(vbias3[b], (Lt, Lv))      # hoisted out of head loop
        tbias_b = jnp.broadcast_to(tbias3[b], (Lv, Lt))
        hc_t, hc_v = [], []
        for h in range(nhead):
            cs = slice(h * hd, (h + 1) * hd)
            p1 = _softmax_rows(_qkt(q2[rt, cs], k1[rv, cs]) + vbias_b)   # (Lt, Lv)
            hc_t.append(_dot(p1, v1[rv, cs]))                            # (Lt, hd)
            p2 = _softmax_rows(_qkt(q1[rv, cs], k2[rt, cs]) + tbias_b)   # (Lv, Lt)
            hc_v.append(_dot(p2, v2[rt, cs]))                            # (Lv, hd)
        ctx_t_rows.append(jnp.concatenate(hc_t, axis=1))
        ctx_v_rows.append(jnp.concatenate(hc_v, axis=1))
    ctx_t = jnp.concatenate(ctx_t_rows, axis=0)              # (bb*Lt, D)
    ctx_v = jnp.concatenate(ctx_v_rows, axis=0)              # (bb*Lv, D)

    # BertBiOutput: ONE full-K dense per stream + residual + LN
    att_v = _layernorm(_dot(ctx_v, d1w_ref[...]) + d1b_ref[...] + ve,
                       ln1_g_ref[...], ln1_b_ref[...], eps)
    att_t = _layernorm(_dot(ctx_t, d2w_ref[...]) + d2b_ref[...] + te,
                       ln2_g_ref[...], ln2_b_ref[...], eps)

    # per-stream GELU intermediate + output + residual LN (epilogue)
    hv = _gelu_tanh(_dot(att_v, viw_ref[...]) + vib_ref[...])
    hv = _dot(hv, vow_ref[...]) + vob_ref[...]
    ov_ref[...] = _layernorm(hv + att_v, vlng_ref[...], vlnb_ref[...], eps).reshape(bb, Lv, D)

    ht = _gelu_tanh(_dot(att_t, tiw_ref[...]) + tib_ref[...])
    ht = _dot(ht, tow_ref[...]) + tob_ref[...]
    ot_ref[...] = _layernorm(ht + att_t, tlng_ref[...], tlnb_ref[...], eps).reshape(bb, Lt, D)


def cross_layer(v_emb, t_emb, vbias, tbias, p, nhead, batch_block=1):
    """One fused ViLBERT BertConnectionLayer (bi-attention + BiOutput + GELU FFNs)."""
    B, Lv, D = v_emb.shape
    Lt = t_emb.shape[1]
    F = p['v_i_w'].shape[1]
    bb = batch_block
    assert B % bb == 0
    kernel = functools.partial(_cross_layer_kernel, nhead=nhead, eps=1e-12)
    return pl.pallas_call(
        kernel,
        out_shape=(jax.ShapeDtypeStruct((B, Lv, D), jnp.float32),
                   jax.ShapeDtypeStruct((B, Lt, D), jnp.float32)),
        grid=(B // bb,),
        in_specs=[
            pl.BlockSpec((bb, Lv, D), lambda b: (b, 0, 0)),   # v_emb
            pl.BlockSpec((bb, Lt, D), lambda b: (b, 0, 0)),   # t_emb
            pl.BlockSpec((bb, 1, Lv), lambda b: (b, 0, 0)),   # vid key bias
            pl.BlockSpec((bb, 1, Lt), lambda b: (b, 0, 0)),   # txt key bias
            _rep((D, 3 * D)), _rep((1, 3 * D)),               # qkv1
            _rep((D, 3 * D)), _rep((1, 3 * D)),               # qkv2
            _rep((D, D)), _rep((1, D)),                       # dense1
            _rep((D, D)), _rep((1, D)),                       # dense2
            _rep((1, D)), _rep((1, D)),                       # ln1
            _rep((1, D)), _rep((1, D)),                       # ln2
            _rep((D, F)), _rep((1, F)),                       # v intermediate
            _rep((F, D)), _rep((1, D)),                       # v output
            _rep((1, D)), _rep((1, D)),                       # v ln
            _rep((D, F)), _rep((1, F)),                       # t intermediate
            _rep((F, D)), _rep((1, D)),                       # t output
            _rep((1, D)), _rep((1, D)),                       # t ln
        ],
        out_specs=(pl.BlockSpec((bb, Lv, D), lambda b: (b, 0, 0)),
                   pl.BlockSpec((bb, Lt, D), lambda b: (b, 0, 0))),
        compiler_params=pltpu.CompilerParams(
            dimension_semantics=("parallel",),
            vmem_limit_bytes=VMEM_LIMIT),
    )(v_emb, t_emb, vbias, tbias,
      p['wqkv1'], p['bqkv1'].reshape(1, -1),
      p['wqkv2'], p['bqkv2'].reshape(1, -1),
      p['dense1_w'], p['dense1_b'].reshape(1, -1),
      p['dense2_w'], p['dense2_b'].reshape(1, -1),
      p['ln1_g'].reshape(1, -1), p['ln1_b'].reshape(1, -1),
      p['ln2_g'].reshape(1, -1), p['ln2_b'].reshape(1, -1),
      p['v_i_w'], p['v_i_b'].reshape(1, -1),
      p['v_o_w'], p['v_o_b'].reshape(1, -1),
      p['v_ln_g'].reshape(1, -1), p['v_ln_b'].reshape(1, -1),
      p['t_i_w'], p['t_i_b'].reshape(1, -1),
      p['t_o_w'], p['t_o_b'].reshape(1, -1),
      p['t_ln_g'].reshape(1, -1), p['t_ln_b'].reshape(1, -1))


# ----------------------------- full forward -----------------------------

def cross_self_attention_fixcross_forward(params, src_vid, mask_vid, src_txt, mask_txt,
                                          vid_pos, txt_pos, nhead, batch_block=1):
    """forward_self_first path (cross_first=False, cross_text_use_ori=False)."""
    B, Lv, D = src_vid.shape

    # --- self transformer encoder over the concatenated streams ---
    mask = jnp.concatenate([mask_vid, mask_txt], axis=1)                  # > 0 means valid
    key_bias = jnp.where(mask > 0, 0.0, NEG_INF).astype(jnp.float32)[:, None, :]  # (B,1,L)
    pos = jnp.concatenate([vid_pos, txt_pos], axis=1)
    src = jnp.concatenate([src_vid, src_txt], axis=1)
    for lp in params['encoder_layers']:
        src = encoder_layer(src, pos, key_bias, lp, nhead, batch_block)
    enc_vid, enc_txt = src[:, :Lv], src[:, Lv:]

    # --- cross encoder (BERT-style -10000 extended masks, shape (B,1,Lk)) ---
    vbias = ((1.0 - mask_vid.astype(jnp.float32)) * -10000.0)[:, None, :]
    tbias = ((1.0 - mask_txt.astype(jnp.float32)) * -10000.0)[:, None, :]
    v_emb, t_emb = enc_vid, enc_txt
    for lp in params['cross_layers']:
        v_emb, t_emb = cross_layer(v_emb, t_emb, vbias, tbias, lp, nhead, batch_block)
        # CrossEncoder also adds (co_attention_probs * 0.0).sum() == 0.0 -> skipped
    return v_emb, t_emb


# ----------------------------- deterministic params -----------------------------

def init_params(key, d_model, dim_ff, num_enc, num_cross, nhead):
    keys = iter(jax.random.split(key, 256))
    hd = d_model // nhead
    scale = 1.0 / math.sqrt(hd)   # folded into the q-projection weights (one-time)

    def xavier(shape):
        fan_in, fan_out = shape
        limit = math.sqrt(6.0 / (fan_in + fan_out))
        return jax.random.uniform(next(keys), shape, jnp.float32, -limit, limit)

    ones = lambda n: jnp.ones((n,), jnp.float32)
    zeros = lambda n: jnp.zeros((n,), jnp.float32)

    enc_layers = []
    for _ in range(num_enc):
        wq = xavier((d_model, d_model)) * scale          # fold 1/sqrt(hd)
        wk = xavier((d_model, d_model))
        wv = xavier((d_model, d_model))
        wo = xavier((d_model, d_model))
        w1 = xavier((d_model, dim_ff))
        w2 = xavier((dim_ff, d_model))
        enc_layers.append(dict(
            # matmul weights stored bf16 once; biases/LN stay f32 (bq is zero -> scale-fold noop)
            wqk=jnp.concatenate([wq, wk], axis=1).astype(BF16), bqk=zeros(2 * d_model),
            wv=wv.astype(BF16), bv=zeros(d_model), wo=wo.astype(BF16), bo=zeros(d_model),
            w1=w1.astype(BF16), b1=zeros(dim_ff), w2=w2.astype(BF16), b2=zeros(d_model),
            ln1_g=ones(d_model), ln1_b=zeros(d_model),
            ln2_g=ones(d_model), ln2_b=zeros(d_model)))

    cross_layers = []
    for _ in range(num_cross):
        p = {}
        p['wqkv1'] = jnp.concatenate(
            [xavier((d_model, d_model)) * scale,           # fold 1/sqrt(hd) into q columns
             xavier((d_model, d_model)), xavier((d_model, d_model))], axis=1).astype(BF16)
        p['bqkv1'] = zeros(3 * d_model)
        p['wqkv2'] = jnp.concatenate(
            [xavier((d_model, d_model)) * scale,
             xavier((d_model, d_model)), xavier((d_model, d_model))], axis=1).astype(BF16)
        p['bqkv2'] = zeros(3 * d_model)
        p['dense1_w'] = xavier((d_model, d_model)).astype(BF16); p['dense1_b'] = zeros(d_model)
        p['dense2_w'] = xavier((d_model, d_model)).astype(BF16); p['dense2_b'] = zeros(d_model)
        p['v_i_w'] = xavier((d_model, dim_ff)).astype(BF16); p['v_i_b'] = zeros(dim_ff)
        p['v_o_w'] = xavier((dim_ff, d_model)).astype(BF16); p['v_o_b'] = zeros(d_model)
        p['t_i_w'] = xavier((d_model, dim_ff)).astype(BF16); p['t_i_b'] = zeros(dim_ff)
        p['t_o_w'] = xavier((dim_ff, d_model)).astype(BF16); p['t_o_b'] = zeros(d_model)
        for ln in ['ln1', 'ln2', 'v_ln', 't_ln']:
            p[ln + '_g'] = ones(d_model)
            p[ln + '_b'] = zeros(d_model)
        cross_layers.append(p)

    return dict(encoder_layers=enc_layers, cross_layers=cross_layers)


# ----------------------------- main -----------------------------

if __name__ == "__main__":
    B, Lv, Lt, D, H, FF = 2, 8, 6, 32, 4, 64
    NUM_ENC, NUM_CROSS = 2, 2

    key = jax.random.PRNGKey(0)
    k_params, k_vid, k_txt, k_vp, k_tp = jax.random.split(key, 5)
    params = init_params(k_params, D, FF, NUM_ENC, NUM_CROSS, H)

    src_vid = jax.random.normal(k_vid, (B, Lv, D), jnp.float32)
    src_txt = jax.random.normal(k_txt, (B, Lt, D), jnp.float32)
    vid_pos = jax.random.normal(k_vp, (B, Lv, D), jnp.float32)
    txt_pos = jax.random.normal(k_tp, (B, Lt, D), jnp.float32)
    mask_vid = jnp.ones((B, Lv), jnp.float32)
    mask_txt = jnp.ones((B, Lt), jnp.float32).at[1, 4:].set(0.0)  # some txt padding

    # v7x-friendly config: 2-wide "parallel" batch grid (one step per TensorCore)
    fwd_p = jax.jit(functools.partial(cross_self_attention_fixcross_forward,
                                      nhead=H, batch_block=1))
    vid_out, txt_out = fwd_p(params, src_vid, mask_vid, src_txt, mask_txt, vid_pos, txt_pos)
    jax.block_until_ready((vid_out, txt_out))

    # single-TC (v5e/v6e) config: whole batch in one grid step, (B,L)->(B*L) collapsed
    fwd_1 = jax.jit(functools.partial(cross_self_attention_fixcross_forward,
                                      nhead=H, batch_block=B))
    vid_out1, txt_out1 = fwd_1(params, src_vid, mask_vid, src_txt, mask_txt, vid_pos, txt_pos)
    jax.block_until_ready((vid_out1, txt_out1))

    assert vid_out.shape == (B, Lv, D) and txt_out.shape == (B, Lt, D)
    assert bool(jnp.all(jnp.isfinite(vid_out))) and bool(jnp.all(jnp.isfinite(txt_out)))
    assert bool(jnp.allclose(vid_out, vid_out1, atol=2e-3, rtol=2e-3))
    assert bool(jnp.allclose(txt_out, txt_out1, atol=2e-3, rtol=2e-3))
    print("KERNEL_OK")
</pallas_src>

<mosaic_0001>
module attributes {stable_mosaic.version = 11 : i64} {
  func.func @_encoder_layer_kernel(%arg0: i32, %arg1: memref<1x14x32xf32, #tpu.memory_space<vmem>>, %arg2: memref<1x14x32xf32, #tpu.memory_space<vmem>>, %arg3: memref<1x1x14xf32, #tpu.memory_space<vmem>>, %arg4: memref<32x64xbf16, #tpu.memory_space<vmem>>, %arg5: memref<1x64xf32, #tpu.memory_space<vmem>>, %arg6: memref<32x32xbf16, #tpu.memory_space<vmem>>, %arg7: memref<1x32xf32, #tpu.memory_space<vmem>>, %arg8: memref<32x32xbf16, #tpu.memory_space<vmem>>, %arg9: memref<1x32xf32, #tpu.memory_space<vmem>>, %arg10: memref<1x32xf32, #tpu.memory_space<vmem>>, %arg11: memref<1x32xf32, #tpu.memory_space<vmem>>, %arg12: memref<32x64xbf16, #tpu.memory_space<vmem>>, %arg13: memref<1x64xf32, #tpu.memory_space<vmem>>, %arg14: memref<64x32xbf16, #tpu.memory_space<vmem>>, %arg15: memref<1x32xf32, #tpu.memory_space<vmem>>, %arg16: memref<1x32xf32, #tpu.memory_space<vmem>>, %arg17: memref<1x32xf32, #tpu.memory_space<vmem>>, %arg18: memref<1x14x32xf32, #tpu.memory_space<vmem>>) attributes {dimension_semantics = [#tpu.dimension_semantics<parallel>], iteration_bounds = array<i64: 2>, scalar_prefetch = 0 : i64, scratch_operands = 0 : i64, tpu.core_type = #tpu.core_type<tc>, window_params = [{transform_indices = @transform_0, window_bounds = array<i64: 1, 14, 32>}, {transform_indices = @transform_1, window_bounds = array<i64: 1, 14, 32>}, {transform_indices = @transform_2, window_bounds = array<i64: 1, 1, 14>}, {pipeline_mode = #tpu.pipeline_mode<synchronous>, transform_indices = @transform_3, window_bounds = array<i64: 32, 64>}, {pipeline_mode = #tpu.pipeline_mode<synchronous>, transform_indices = @transform_4, window_bounds = array<i64: 1, 64>}, {pipeline_mode = #tpu.pipeline_mode<synchronous>, transform_indices = @transform_5, window_bounds = array<i64: 32, 32>}, {pipeline_mode = #tpu.pipeline_mode<synchronous>, transform_indices = @transform_6, window_bounds = array<i64: 1, 32>}, {pipeline_mode = #tpu.pipeline_mode<synchronous>, transform_indices = @transform_7, window_bounds = array<i64: 32, 32>}, {pipeline_mode = #tpu.pipeline_mode<synchronous>, transform_indices = @transform_8, window_bounds = array<i64: 1, 32>}, {pipeline_mode = #tpu.pipeline_mode<synchronous>, transform_indices = @transform_9, window_bounds = array<i64: 1, 32>}, {pipeline_mode = #tpu.pipeline_mode<synchronous>, transform_indices = @transform_10, window_bounds = array<i64: 1, 32>}, {pipeline_mode = #tpu.pipeline_mode<synchronous>, transform_indices = @transform_11, window_bounds = array<i64: 32, 64>}, {pipeline_mode = #tpu.pipeline_mode<synchronous>, transform_indices = @transform_12, window_bounds = array<i64: 1, 64>}, {pipeline_mode = #tpu.pipeline_mode<synchronous>, transform_indices = @transform_13, window_bounds = array<i64: 64, 32>}, {pipeline_mode = #tpu.pipeline_mode<synchronous>, transform_indices = @transform_14, window_bounds = array<i64: 1, 32>}, {pipeline_mode = #tpu.pipeline_mode<synchronous>, transform_indices = @transform_15, window_bounds = array<i64: 1, 32>}, {pipeline_mode = #tpu.pipeline_mode<synchronous>, transform_indices = @transform_16, window_bounds = array<i64: 1, 32>}, {transform_indices = @transform_17, window_bounds = array<i64: 1, 14, 32>}]} {
    %c0 = arith.constant 0 : index
    %c0_0 = arith.constant 0 : index
    %c0_1 = arith.constant 0 : index
    %0 = vector.load %arg1[%c0, %c0_0, %c0_1] : memref<1x14x32xf32, #tpu.memory_space<vmem>>, vector<1x14x32xf32>
    %c0_2 = arith.constant 0 : index
    %c0_3 = arith.constant 0 : index
    %c0_4 = arith.constant 0 : index
    %1 = vector.load %arg2[%c0_2, %c0_3, %c0_4] : memref<1x14x32xf32, #tpu.memory_space<vmem>>, vector<1x14x32xf32>
    %c0_5 = arith.constant 0 : index
    %c0_6 = arith.constant 0 : index
    %c0_7 = arith.constant 0 : index
    %2 = vector.load %arg3[%c0_5, %c0_6, %c0_7] : memref<1x1x14xf32, #tpu.memory_space<vmem>>, vector<1x1x14xf32>
    %3 = vector.shape_cast %0 : vector<1x14x32xf32> to vector<14x32xf32>
    %4 = arith.addf %0, %1 : vector<1x14x32xf32>
    %5 = vector.shape_cast %4 : vector<1x14x32xf32> to vector<14x32xf32>
    %c0_8 = arith.constant 0 : index
    %c0_9 = arith.constant 0 : index
    %6 = vector.load %arg4[%c0_8, %c0_9] : memref<32x64xbf16, #tpu.memory_space<vmem>>, vector<32x64xbf16>
    %7 = arith.truncf %5 : vector<14x32xf32> to vector<14x32xbf16>
    %cst = arith.constant dense<0.000000e+00> : vector<14x64xf32>
    %8 = tpu.matmul %7, %6, %cst {dimension_numbers = #tpu.dot_dimension_numbers<[1], [0], [0], [1], [0, 0, 1, 1], [], []>} : vector<14x32xbf16>, vector<32x64xbf16>, vector<14x64xf32> -> vector<14x64xf32>
    %c0_10 = arith.constant 0 : index
    %c0_11 = arith.constant 0 : index
    %9 = vector.load %arg5[%c0_10, %c0_11] : memref<1x64xf32, #tpu.memory_space<vmem>>, vector<1x64xf32>
    %10 = vector.broadcast %9 : vector<1x64xf32> to vector<14x64xf32>
    %11 = arith.addf %8, %10 : vector<14x64xf32>
    %c0_12 = arith.constant 0 : index
    %c0_13 = arith.constant 0 : index
    %12 = vector.load %arg6[%c0_12, %c0_13] : memref<32x32xbf16, #tpu.memory_space<vmem>>, vector<32x32xbf16>
    %13 = arith.truncf %3 : vector<14x32xf32> to vector<14x32xbf16>
    %cst_14 = arith.constant dense<0.000000e+00> : vector<14x32xf32>
    %14 = tpu.matmul %13, %12, %cst_14 {dimension_numbers = #tpu.dot_dimension_numbers<[1], [0], [0], [1], [0, 0, 1, 1], [], []>} : vector<14x32xbf16>, vector<32x32xbf16>, vector<14x32xf32> -> vector<14x32xf32>
    %c0_15 = arith.constant 0 : index
    %c0_16 = arith.constant 0 : index
    %15 = vector.load %arg7[%c0_15, %c0_16] : memref<1x32xf32, #tpu.memory_space<vmem>>, vector<1x32xf32>
    %16 = vector.broadcast %15 : vector<1x32xf32> to vector<14x32xf32>
    %17 = arith.addf %14, %16 : vector<14x32xf32>
    %18 = vector.extract_strided_slice %11 {offsets = [0, 0], sizes = [14, 32], strides = [1, 1]} : vector<14x64xf32> to vector<14x32xf32>
    %19 = arith.truncf %18 : vector<14x32xf32> to vector<14x32xbf16>
    %20 = vector.extract_strided_slice %11 {offsets = [0, 32], sizes = [14, 32], strides = [1, 1]} : vector<14x64xf32> to vector<14x32xf32>
    %21 = arith.truncf %20 : vector<14x32xf32> to vector<14x32xbf16>
    %22 = arith.truncf %17 : vector<14x32xf32> to vector<14x32xbf16>
    %23 = vector.shape_cast %2 : vector<1x1x14xf32> to vector<1x14xf32>
    %24 = vector.shape_cast %23 : vector<1x14xf32> to vector<1x14xf32>
    %25 = vector.broadcast %24 : vector<1x14xf32> to vector<14x14xf32>
    %26 = vector.extract_strided_slice %19 {offsets = [0, 0], sizes = [14, 8], strides = [1, 1]} : vector<14x32xbf16> to vector<14x8xbf16>
    %27 = vector.extract_strided_slice %21 {offsets = [0, 0], sizes = [14, 8], strides = [1, 1]} : vector<14x32xbf16> to vector<14x8xbf16>
    %cst_17 = arith.constant dense<0.000000e+00> : vector<14x14xf32>
    %28 = tpu.matmul %26, %27, %cst_17 {dimension_numbers = #tpu.dot_dimension_numbers<[1], [1], [0], [0], [0, 0, 1, 0], [], []>} : vector<14x8xbf16>, vector<14x8xbf16>, vector<14x14xf32> -> vector<14x14xf32>
    %29 = arith.addf %28, %25 : vector<14x14xf32>
    %cst_18 = arith.constant dense<0xFF800000> : vector<14xf32>
    %30 = vector.multi_reduction <maximumf>, %29, %cst_18 [1] : vector<14x14xf32> to vector<14xf32>
    %31 = vector.shape_cast %30 : vector<14xf32> to vector<14x1xf32>
    %32 = vector.broadcast %31 : vector<14x1xf32> to vector<14x14xf32>
    %33 = arith.subf %29, %32 : vector<14x14xf32>
    %34 = math.exp %33 : vector<14x14xf32>
    %cst_19 = arith.constant dense<0.000000e+00> : vector<14xf32>
    %35 = vector.multi_reduction <add>, %34, %cst_19 [1] : vector<14x14xf32> to vector<14xf32>
    %36 = vector.shape_cast %35 : vector<14xf32> to vector<14x1xf32>
    %37 = tpu.reciprocal %36 {approx = true} : vector<14x1xf32> -> vector<14x1xf32>
    %38 = vector.broadcast %37 : vector<14x1xf32> to vector<14x14xf32>
    %39 = arith.mulf %34, %38 : vector<14x14xf32>
    %40 = vector.extract_strided_slice %22 {offsets = [0, 0], sizes = [14, 8], strides = [1, 1]} : vector<14x32xbf16> to vector<14x8xbf16>
    %41 = arith.truncf %39 : vector<14x14xf32> to vector<14x14xbf16>
    %cst_20 = arith.constant dense<0.000000e+00> : vector<14x8xf32>
    %42 = tpu.matmul %41, %40, %cst_20 {dimension_numbers = #tpu.dot_dimension_numbers<[1], [0], [0], [1], [0, 0, 1, 1], [], []>} : vector<14x14xbf16>, vector<14x8xbf16>, vector<14x8xf32> -> vector<14x8xf32>
    %43 = vector.extract_strided_slice %19 {offsets = [0, 8], sizes = [14, 8], strides = [1, 1]} : vector<14x32xbf16> to vector<14x8xbf16>
    %44 = vector.extract_strided_slice %21 {offsets = [0, 8], sizes = [14, 8], strides = [1, 1]} : vector<14x32xbf16> to vector<14x8xbf16>
    %cst_21 = arith.constant dense<0.000000e+00> : vector<14x14xf32>
    %45 = tpu.matmul %43, %44, %cst_21 {dimension_numbers = #tpu.dot_dimension_numbers<[1], [1], [0], [0], [0, 0, 1, 0], [], []>} : vector<14x8xbf16>, vector<14x8xbf16>, vector<14x14xf32> -> vector<14x14xf32>
    %46 = arith.addf %45, %25 : vector<14x14xf32>
    %cst_22 = arith.constant dense<0xFF800000> : vector<14xf32>
    %47 = vector.multi_reduction <maximumf>, %46, %cst_22 [1] : vector<14x14xf32> to vector<14xf32>
    %48 = vector.shape_cast %47 : vector<14xf32> to vector<14x1xf32>
    %49 = vector.broadcast %48 : vector<14x1xf32> to vector<14x14xf32>
    %50 = arith.subf %46, %49 : vector<14x14xf32>
    %51 = math.exp %50 : vector<14x14xf32>
    %cst_23 = arith.constant dense<0.000000e+00> : vector<14xf32>
    %52 = vector.multi_reduction <add>, %51, %cst_23 [1] : vector<14x14xf32> to vector<14xf32>
    %53 = vector.shape_cast %52 : vector<14xf32> to vector<14x1xf32>
    %54 = tpu.reciprocal %53 {approx = true} : vector<14x1xf32> -> vector<14x1xf32>
    %55 = vector.broadcast %54 : vector<14x1xf32> to vector<14x14xf32>
    %56 = arith.mulf %51, %55 : vector<14x14xf32>
    %57 = vector.extract_strided_slice %22 {offsets = [0, 8], sizes = [14, 8], strides = [1, 1]} : vector<14x32xbf16> to vector<14x8xbf16>
    %58 = arith.truncf %56 : vector<14x14xf32> to vector<14x14xbf16>
    %cst_24 = arith.constant dense<0.000000e+00> : vector<14x8xf32>
    %59 = tpu.matmul %58, %57, %cst_24 {dimension_numbers = #tpu.dot_dimension_numbers<[1], [0], [0], [1], [0, 0, 1, 1], [], []>} : vector<14x14xbf16>, vector<14x8xbf16>, vector<14x8xf32> -> vector<14x8xf32>
    %60 = vector.extract_strided_slice %19 {offsets = [0, 16], sizes = [14, 8], strides = [1, 1]} : vector<14x32xbf16> to vector<14x8xbf16>
    %61 = vector.extract_strided_slice %21 {offsets = [0, 16], sizes = [14, 8], strides = [1, 1]} : vector<14x32xbf16> to vector<14x8xbf16>
    %cst_25 = arith.constant dense<0.000000e+00> : vector<14x14xf32>
    %62 = tpu.matmul %60, %61, %cst_25 {dimension_numbers = #tpu.dot_dimension_numbers<[1], [1], [0], [0], [0, 0, 1, 0], [], []>} : vector<14x8xbf16>, vector<14x8xbf16>, vector<14x14xf32> -> vector<14x14xf32>
    %63 = arith.addf %62, %25 : vector<14x14xf32>
    %cst_26 = arith.constant dense<0xFF800000> : vector<14xf32>
    %64 = vector.multi_reduction <maximumf>, %63, %cst_26 [1] : vector<14x14xf32> to vector<14xf32>
    %65 = vector.shape_cast %64 : vector<14xf32> to vector<14x1xf32>
    %66 = vector.broadcast %65 : vector<14x1xf32> to vector<14x14xf32>
    %67 = arith.subf %63, %66 : vector<14x14xf32>
    %68 = math.exp %67 : vector<14x14xf32>
    %cst_27 = arith.constant dense<0.000000e+00> : vector<14xf32>
    %69 = vector.multi_reduction <add>, %68, %cst_27 [1] : vector<14x14xf32> to vector<14xf32>
    %70 = vector.shape_cast %69 : vector<14xf32> to vector<14x1xf32>
    %71 = tpu.reciprocal %70 {approx = true} : vector<14x1xf32> -> vector<14x1xf32>
    %72 = vector.broadcast %71 : vector<14x1xf32> to vector<14x14xf32>
    %73 = arith.mulf %68, %72 : vector<14x14xf32>
    %74 = vector.extract_strided_slice %22 {offsets = [0, 16], sizes = [14, 8], strides = [1, 1]} : vector<14x32xbf16> to vector<14x8xbf16>
    %75 = arith.truncf %73 : vector<14x14xf32> to vector<14x14xbf16>
    %cst_28 = arith.constant dense<0.000000e+00> : vector<14x8xf32>
    %76 = tpu.matmul %75, %74, %cst_28 {dimension_numbers = #tpu.dot_dimension_numbers<[1], [0], [0], [1], [0, 0, 1, 1], [], []>} : vector<14x14xbf16>, vector<14x8xbf16>, vector<14x8xf32> -> vector<14x8xf32>
    %77 = vector.extract_strided_slice %19 {offsets = [0, 24], sizes = [14, 8], strides = [1, 1]} : vector<14x32xbf16> to vector<14x8xbf16>
    %78 = vector.extract_strided_slice %21 {offsets = [0, 24], sizes = [14, 8], strides = [1, 1]} : vector<14x32xbf16> to vector<14x8xbf16>
    %cst_29 = arith.constant dense<0.000000e+00> : vector<14x14xf32>
    %79 = tpu.matmul %77, %78, %cst_29 {dimension_numbers = #tpu.dot_dimension_numbers<[1], [1], [0], [0], [0, 0, 1, 0], [], []>} : vector<14x8xbf16>, vector<14x8xbf16>, vector<14x14xf32> -> vector<14x14xf32>
    %80 = arith.addf %79, %25 : vector<14x14xf32>
    %cst_30 = arith.constant dense<0xFF800000> : vector<14xf32>
    %81 = vector.multi_reduction <maximumf>, %80, %cst_30 [1] : vector<14x14xf32> to vector<14xf32>
    %82 = vector.shape_cast %81 : vector<14xf32> to vector<14x1xf32>
    %83 = vector.broadcast %82 : vector<14x1xf32> to vector<14x14xf32>
    %84 = arith.subf %80, %83 : vector<14x14xf32>
    %85 = math.exp %84 : vector<14x14xf32>
    %cst_31 = arith.constant dense<0.000000e+00> : vector<14xf32>
    %86 = vector.multi_reduction <add>, %85, %cst_31 [1] : vector<14x14xf32> to vector<14xf32>
    %87 = vector.shape_cast %86 : vector<14xf32> to vector<14x1xf32>
    %88 = tpu.reciprocal %87 {approx = true} : vector<14x1xf32> -> vector<14x1xf32>
    %89 = vector.broadcast %88 : vector<14x1xf32> to vector<14x14xf32>
    %90 = arith.mulf %85, %89 : vector<14x14xf32>
    %91 = vector.extract_strided_slice %22 {offsets = [0, 24], sizes = [14, 8], strides = [1, 1]} : vector<14x32xbf16> to vector<14x8xbf16>
    %92 = arith.truncf %90 : vector<14x14xf32> to vector<14x14xbf16>
    %cst_32 = arith.constant dense<0.000000e+00> : vector<14x8xf32>
    %93 = tpu.matmul %92, %91, %cst_32 {dimension_numbers = #tpu.dot_dimension_numbers<[1], [0], [0], [1], [0, 0, 1, 1], [], []>} : vector<14x14xbf16>, vector<14x8xbf16>, vector<14x8xf32> -> vector<14x8xf32>
    %94 = tpu.concatenate %42, %59, %76, %93 in 1 : vector<14x8xf32>, vector<14x8xf32>, vector<14x8xf32>, vector<14x8xf32> -> vector<14x32xf32>
    %c0_33 = arith.constant 0 : index
    %c0_34 = arith.constant 0 : index
    %95 = vector.load %arg8[%c0_33, %c0_34] : memref<32x32xbf16, #tpu.memory_space<vmem>>, vector<32x32xbf16>
    %96 = arith.truncf %94 : vector<14x32xf32> to vector<14x32xbf16>
    %cst_35 = arith.constant dense<0.000000e+00> : vector<14x32xf32>
    %97 = tpu.matmul %96, %95, %cst_35 {dimension_numbers = #tpu.dot_dimension_numbers<[1], [0], [0], [1], [0, 0, 1, 1], [], []>} : vector<14x32xbf16>, vector<32x32xbf16>, vector<14x32xf32> -> vector<14x32xf32>
    %c0_36 = arith.constant 0 : index
    %c0_37 = arith.constant 0 : index
    %98 = vector.load %arg9[%c0_36, %c0_37] : memref<1x32xf32, #tpu.memory_space<vmem>>, vector<1x32xf32>
    %99 = vector.broadcast %98 : vector<1x32xf32> to vector<14x32xf32>
    %100 = arith.addf %97, %99 : vector<14x32xf32>
    %101 = arith.addf %3, %100 : vector<14x32xf32>
    %c0_38 = arith.constant 0 : index
    %c0_39 = arith.constant 0 : index
    %102 = vector.load %arg10[%c0_38, %c0_39] : memref<1x32xf32, #tpu.memory_space<vmem>>, vector<1x32xf32>
    %c0_40 = arith.constant 0 : index
    %c0_41 = arith.constant 0 : index
    %103 = vector.load %arg11[%c0_40, %c0_41] : memref<1x32xf32, #tpu.memory_space<vmem>>, vector<1x32xf32>
    %cst_42 = arith.constant dense<0.000000e+00> : vector<14xf32>
    %104 = vector.multi_reduction <add>, %101, %cst_42 [1] : vector<14x32xf32> to vector<14xf32>
    %105 = vector.shape_cast %104 : vector<14xf32> to vector<14x1xf32>
    %cst_43 = arith.constant 3.200000e+01 : f32
    %106 = vector.broadcast %cst_43 : f32 to vector<14x1xf32>
    %107 = arith.divf %105, %106 : vector<14x1xf32>
    %108 = vector.broadcast %107 : vector<14x1xf32> to vector<14x32xf32>
    %109 = arith.subf %101, %108 : vector<14x32xf32>
    %110 = arith.mulf %109, %109 : vector<14x32xf32>
    %cst_44 = arith.constant dense<0.000000e+00> : vector<14xf32>
    %111 = vector.multi_reduction <add>, %110, %cst_44 [1] : vector<14x32xf32> to vector<14xf32>
    %112 = vector.shape_cast %111 : vector<14xf32> to vector<14x1xf32>
    %cst_45 = arith.constant 3.200000e+01 : f32
    %113 = vector.broadcast %cst_45 : f32 to vector<14x1xf32>
    %114 = arith.divf %112, %113 : vector<14x1xf32>
    %cst_46 = arith.constant 9.99999974E-6 : f32
    %115 = vector.broadcast %cst_46 : f32 to vector<14x1xf32>
    %116 = arith.addf %114, %115 : vector<14x1xf32>
    %117 = math.rsqrt %116 : vector<14x1xf32>
    %118 = vector.broadcast %117 : vector<14x1xf32> to vector<14x32xf32>
    %119 = arith.mulf %109, %118 : vector<14x32xf32>
    %120 = vector.broadcast %102 : vector<1x32xf32> to vector<14x32xf32>
    %121 = arith.mulf %119, %120 : vector<14x32xf32>
    %122 = vector.broadcast %103 : vector<1x32xf32> to vector<14x32xf32>
    %123 = arith.addf %121, %122 : vector<14x32xf32>
    %c0_47 = arith.constant 0 : index
    %c0_48 = arith.constant 0 : index
    %124 = vector.load %arg12[%c0_47, %c0_48] : memref<32x64xbf16, #tpu.memory_space<vmem>>, vector<32x64xbf16>
    %125 = arith.truncf %123 : vector<14x32xf32> to vector<14x32xbf16>
    %cst_49 = arith.constant dense<0.000000e+00> : vector<14x64xf32>
    %126 = tpu.matmul %125, %124, %cst_49 {dimension_numbers = #tpu.dot_dimension_numbers<[1], [0], [0], [1], [0, 0, 1, 1], [], []>} : vector<14x32xbf16>, vector<32x64xbf16>, vector<14x64xf32> -> vector<14x64xf32>
    %c0_50 = arith.constant 0 : index
    %c0_51 = arith.constant 0 : index
    %127 = vector.load %arg13[%c0_50, %c0_51] : memref<1x64xf32, #tpu.memory_space<vmem>>, vector<1x64xf32>
    %128 = vector.broadcast %127 : vector<1x64xf32> to vector<14x64xf32>
    %129 = arith.addf %126, %128 : vector<14x64xf32>
    %cst_52 = arith.constant 0.000000e+00 : f32
    %130 = vector.broadcast %cst_52 : f32 to vector<14x64xf32>
    %131 = arith.maximumf %129, %130 : vector<14x64xf32>
    %c0_53 = arith.constant 0 : index
    %c0_54 = arith.constant 0 : index
    %132 = vector.load %arg14[%c0_53, %c0_54] : memref<64x32xbf16, #tpu.memory_space<vmem>>, vector<64x32xbf16>
    %133 = arith.truncf %131 : vector<14x64xf32> to vector<14x64xbf16>
    %cst_55 = arith.constant dense<0.000000e+00> : vector<14x32xf32>
    %134 = tpu.matmul %133, %132, %cst_55 {dimension_numbers = #tpu.dot_dimension_numbers<[1], [0], [0], [1], [0, 0, 1, 1], [], []>} : vector<14x64xbf16>, vector<64x32xbf16>, vector<14x32xf32> -> vector<14x32xf32>
    %c0_56 = arith.constant 0 : index
    %c0_57 = arith.constant 0 : index
    %135 = vector.load %arg15[%c0_56, %c0_57] : memref<1x32xf32, #tpu.memory_space<vmem>>, vector<1x32xf32>
    %136 = vector.broadcast %135 : vector<1x32xf32> to vector<14x32xf32>
    %137 = arith.addf %134, %136 : vector<14x32xf32>
    %138 = arith.addf %123, %137 : vector<14x32xf32>
    %c0_58 = arith.constant 0 : index
    %c0_59 = arith.constant 0 : index
    %139 = vector.load %arg16[%c0_58, %c0_59] : memref<1x32xf32, #tpu.memory_space<vmem>>, vector<1x32xf32>
    %c0_60 = arith.constant 0 : index
    %c0_61 = arith.constant 0 : index
    %140 = vector.load %arg17[%c0_60, %c0_61] : memref<1x32xf32, #tpu.memory_space<vmem>>, vector<1x32xf32>
    %cst_62 = arith.constant dense<0.000000e+00> : vector<14xf32>
    %141 = vector.multi_reduction <add>, %138, %cst_62 [1] : vector<14x32xf32> to vector<14xf32>
    %142 = vector.shape_cast %141 : vector<14xf32> to vector<14x1xf32>
    %cst_63 = arith.constant 3.200000e+01 : f32
    %143 = vector.broadcast %cst_63 : f32 to vector<14x1xf32>
    %144 = arith.divf %142, %143 : vector<14x1xf32>
    %145 = vector.broadcast %144 : vector<14x1xf32> to vector<14x32xf32>
    %146 = arith.subf %138, %145 : vector<14x32xf32>
    %147 = arith.mulf %146, %146 : vector<14x32xf32>
    %cst_64 = arith.constant dense<0.000000e+00> : vector<14xf32>
    %148 = vector.multi_reduction <add>, %147, %cst_64 [1] : vector<14x32xf32> to vector<14xf32>
    %149 = vector.shape_cast %148 : vector<14xf32> to vector<14x1xf32>
    %cst_65 = arith.constant 3.200000e+01 : f32
    %150 = vector.broadcast %cst_65 : f32 to vector<14x1xf32>
    %151 = arith.divf %149, %150 : vector<14x1xf32>
    %cst_66 = arith.constant 9.99999974E-6 : f32
    %152 = vector.broadcast %cst_66 : f32 to vector<14x1xf32>
    %153 = arith.addf %151, %152 : vector<14x1xf32>
    %154 = math.rsqrt %153 : vector<14x1xf32>
    %155 = vector.broadcast %154 : vector<14x1xf32> to vector<14x32xf32>
    %156 = arith.mulf %146, %155 : vector<14x32xf32>
    %157 = vector.broadcast %139 : vector<1x32xf32> to vector<14x32xf32>
    %158 = arith.mulf %156, %157 : vector<14x32xf32>
    %159 = vector.broadcast %140 : vector<1x32xf32> to vector<14x32xf32>
    %160 = arith.addf %158, %159 : vector<14x32xf32>
    %161 = vector.shape_cast %160 : vector<14x32xf32> to vector<1x14x32xf32>
    %c0_67 = arith.constant 0 : index
    %c0_68 = arith.constant 0 : index
    %c0_69 = arith.constant 0 : index
    %162 = vector.load %arg18[%c0_67, %c0_68, %c0_69] : memref<1x14x32xf32, #tpu.memory_space<vmem>>, vector<1x14x32xf32>
    tpu.vector_store %arg18[%c0_67, %c0_68, %c0_69], %161 {strides = array<i32>} : memref<1x14x32xf32, #tpu.memory_space<vmem>>, vector<1x14x32xf32>,
    return
  }
  func.func @transform_0(%arg0: i32) -> (i32, i32, i32) {
    %c0_i32 = arith.constant 0 : i32
    %c0_i32_0 = arith.constant 0 : i32
    %c0_i32_1 = arith.constant 0 : i32
    return %arg0, %c0_i32, %c0_i32_0 : i32, i32, i32
  }
  func.func @transform_1(%arg0: i32) -> (i32, i32, i32) {
    %c0_i32 = arith.constant 0 : i32
    %c0_i32_0 = arith.constant 0 : i32
    %c0_i32_1 = arith.constant 0 : i32
    return %arg0, %c0_i32, %c0_i32_0 : i32, i32, i32
  }
  func.func @transform_2(%arg0: i32) -> (i32, i32, i32) {
    %c0_i32 = arith.constant 0 : i32
    %c0_i32_0 = arith.constant 0 : i32
    %c0_i32_1 = arith.constant 0 : i32
    return %arg0, %c0_i32, %c0_i32_0 : i32, i32, i32
  }
  func.func @transform_3(%arg0: i32) -> (i32, i32) {
    %c0_i32 = arith.constant 0 : i32
    %c0_i32_0 = arith.constant 0 : i32
    %c0_i32_1 = arith.constant 0 : i32
    return %c0_i32, %c0_i32_0 : i32, i32
  }
  func.func @transform_4(%arg0: i32) -> (i32, i32) {
    %c0_i32 = arith.constant 0 : i32
    %c0_i32_0 = arith.constant 0 : i32
    %c0_i32_1 = arith.constant 0 : i32
    return %c0_i32, %c0_i32_0 : i32, i32
  }
  func.func @transform_5(%arg0: i32) -> (i32, i32) {
    %c0_i32 = arith.constant 0 : i32
    %c0_i32_0 = arith.constant 0 : i32
    %c0_i32_1 = arith.constant 0 : i32
    return %c0_i32, %c0_i32_0 : i32, i32
  }
  func.func @transform_6(%arg0: i32) -> (i32, i32) {
    %c0_i32 = arith.constant 0 : i32
    %c0_i32_0 = arith.constant 0 : i32
    %c0_i32_1 = arith.constant 0 : i32
    return %c0_i32, %c0_i32_0 : i32, i32
  }
  func.func @transform_7(%arg0: i32) -> (i32, i32) {
    %c0_i32 = arith.constant 0 : i32
    %c0_i32_0 = arith.constant 0 : i32
    %c0_i32_1 = arith.constant 0 : i32
    return %c0_i32, %c0_i32_0 : i32, i32
  }
  func.func @transform_8(%arg0: i32) -> (i32, i32) {
    %c0_i32 = arith.constant 0 : i32
    %c0_i32_0 = arith.constant 0 : i32
    %c0_i32_1 = arith.constant 0 : i32
    return %c0_i32, %c0_i32_0 : i32, i32
  }
  func.func @transform_9(%arg0: i32) -> (i32, i32) {
    %c0_i32 = arith.constant 0 : i32
    %c0_i32_0 = arith.constant 0 : i32
    %c0_i32_1 = arith.constant 0 : i32
    return %c0_i32, %c0_i32_0 : i32, i32
  }
  func.func @transform_10(%arg0: i32) -> (i32, i32) {
    %c0_i32 = arith.constant 0 : i32
    %c0_i32_0 = arith.constant 0 : i32
    %c0_i32_1 = arith.constant 0 : i32
    return %c0_i32, %c0_i32_0 : i32, i32
  }
  func.func @transform_11(%arg0: i32) -> (i32, i32) {
    %c0_i32 = arith.constant 0 : i32
    %c0_i32_0 = arith.constant 0 : i32
    %c0_i32_1 = arith.constant 0 : i32
    return %c0_i32, %c0_i32_0 : i32, i32
  }
  func.func @transform_12(%arg0: i32) -> (i32, i32) {
    %c0_i32 = arith.constant 0 : i32
    %c0_i32_0 = arith.constant 0 : i32
    %c0_i32_1 = arith.constant 0 : i32
    return %c0_i32, %c0_i32_0 : i32, i32
  }
  func.func @transform_13(%arg0: i32) -> (i32, i32) {
    %c0_i32 = arith.constant 0 : i32
    %c0_i32_0 = arith.constant 0 : i32
    %c0_i32_1 = arith.constant 0 : i32
    return %c0_i32, %c0_i32_0 : i32, i32
  }
  func.func @transform_14(%arg0: i32) -> (i32, i32) {
    %c0_i32 = arith.constant 0 : i32
    %c0_i32_0 = arith.constant 0 : i32
    %c0_i32_1 = arith.constant 0 : i32
    return %c0_i32, %c0_i32_0 : i32, i32
  }
  func.func @transform_15(%arg0: i32) -> (i32, i32) {
    %c0_i32 = arith.constant 0 : i32
    %c0_i32_0 = arith.constant 0 : i32
    %c0_i32_1 = arith.constant 0 : i32
    return %c0_i32, %c0_i32_0 : i32, i32
  }
  func.func @transform_16(%arg0: i32) -> (i32, i32) {
    %c0_i32 = arith.constant 0 : i32
    %c0_i32_0 = arith.constant 0 : i32
    %c0_i32_1 = arith.constant 0 : i32
    return %c0_i32, %c0_i32_0 : i32, i32
  }
  func.func @transform_17(%arg0: i32) -> (i32, i32, i32) {
    %c0_i32 = arith.constant 0 : i32
    %c0_i32_0 = arith.constant 0 : i32
    %c0_i32_1 = arith.constant 0 : i32
    return %arg0, %c0_i32, %c0_i32_0 : i32, i32, i32
  }
}

module attributes {stable_mosaic.version = 11 : i64} {
  func.func @_cross_layer_kernel(%arg0: i32, %arg1: memref<1x8x32xf32, #tpu.memory_space<vmem>>, %arg2: memref<1x6x32xf32, #tpu.memory_space<vmem>>, %arg3: memref<1x1x8xf32, #tpu.memory_space<vmem>>, %arg4: memref<1x1x6xf32, #tpu.memory_space<vmem>>, %arg5: memref<32x96xbf16, #tpu.memory_space<vmem>>, %arg6: memref<1x96xf32, #tpu.memory_space<vmem>>, %arg7: memref<32x96xbf16, #tpu.memory_space<vmem>>, %arg8: memref<1x96xf32, #tpu.memory_space<vmem>>, %arg9: memref<32x32xbf16, #tpu.memory_space<vmem>>, %arg10: memref<1x32xf32, #tpu.memory_space<vmem>>, %arg11: memref<32x32xbf16, #tpu.memory_space<vmem>>, %arg12: memref<1x32xf32, #tpu.memory_space<vmem>>, %arg13: memref<1x32xf32, #tpu.memory_space<vmem>>, %arg14: memref<1x32xf32, #tpu.memory_space<vmem>>, %arg15: memref<1x32xf32, #tpu.memory_space<vmem>>, %arg16: memref<1x32xf32, #tpu.memory_space<vmem>>, %arg17: memref<32x64xbf16, #tpu.memory_space<vmem>>, %arg18: memref<1x64xf32, #tpu.memory_space<vmem>>, %arg19: memref<64x32xbf16, #tpu.memory_space<vmem>>, %arg20: memref<1x32xf32, #tpu.memory_space<vmem>>, %arg21: memref<1x32xf32, #tpu.memory_space<vmem>>, %arg22: memref<1x32xf32, #tpu.memory_space<vmem>>, %arg23: memref<32x64xbf16, #tpu.memory_space<vmem>>, %arg24: memref<1x64xf32, #tpu.memory_space<vmem>>, %arg25: memref<64x32xbf16, #tpu.memory_space<vmem>>, %arg26: memref<1x32xf32, #tpu.memory_space<vmem>>, %arg27: memref<1x32xf32, #tpu.memory_space<vmem>>, %arg28: memref<1x32xf32, #tpu.memory_space<vmem>>, %arg29: memref<1x8x32xf32, #tpu.memory_space<vmem>>, %arg30: memref<1x6x32xf32, #tpu.memory_space<vmem>>) attributes {dimension_semantics = [#tpu.dimension_semantics<parallel>], iteration_bounds = array<i64: 2>, scalar_prefetch = 0 : i64, scratch_operands = 0 : i64, tpu.core_type = #tpu.core_type<tc>, window_params = [{transform_indices = @transform_0, window_bounds = array<i64: 1, 8, 32>}, {transform_indices = @transform_1, window_bounds = array<i64: 1, 6, 32>}, {transform_indices = @transform_2, window_bounds = array<i64: 1, 1, 8>}, {transform_indices = @transform_3, window_bounds = array<i64: 1, 1, 6>}, {pipeline_mode = #tpu.pipeline_mode<synchronous>, transform_indices = @transform_4, window_bounds = array<i64: 32, 96>}, {pipeline_mode = #tpu.pipeline_mode<synchronous>, transform_indices = @transform_5, window_bounds = array<i64: 1, 96>}, {pipeline_mode = #tpu.pipeline_mode<synchronous>, transform_indices = @transform_6, window_bounds = array<i64: 32, 96>}, {pipeline_mode = #tpu.pipeline_mode<synchronous>, transform_indices = @transform_7, window_bounds = array<i64: 1, 96>}, {pipeline_mode = #tpu.pipeline_mode<synchronous>, transform_indices = @transform_8, window_bounds = array<i64: 32, 32>}, {pipeline_mode = #tpu.pipeline_mode<synchronous>, transform_indices = @transform_9, window_bounds = array<i64: 1, 32>}, {pipeline_mode = #tpu.pipeline_mode<synchronous>, transform_indices = @transform_10, window_bounds = array<i64: 32, 32>}, {pipeline_mode = #tpu.pipeline_mode<synchronous>, transform_indices = @transform_11, window_bounds = array<i64: 1, 32>}, {pipeline_mode = #tpu.pipeline_mode<synchronous>, transform_indices = @transform_12, window_bounds = array<i64: 1, 32>}, {pipeline_mode = #tpu.pipeline_mode<synchronous>, transform_indices = @transform_13, window_bounds = array<i64: 1, 32>}, {pipeline_mode = #tpu.pipeline_mode<synchronous>, transform_indices = @transform_14, window_bounds = array<i64: 1, 32>}, {pipeline_mode = #tpu.pipeline_mode<synchronous>, transform_indices = @transform_15, window_bounds = array<i64: 1, 32>}, {pipeline_mode = #tpu.pipeline_mode<synchronous>, transform_indices = @transform_16, window_bounds = array<i64: 32, 64>}, {pipeline_mode = #tpu.pipeline_mode<synchronous>, transform_indices = @transform_17, window_bounds = array<i64: 1, 64>}, {pipeline_mode = #tpu.pipeline_mode<synchronous>, transform_indices = @transform_18, window_bounds = array<i64: 64, 32>}, {pipeline_mode = #tpu.pipeline_mode<synchronous>, transform_indices = @transform_19, window_bounds = array<i64: 1, 32>}, {pipeline_mode = #tpu.pipeline_mode<synchronous>, transform_indices = @transform_20, window_bounds = array<i64: 1, 32>}, {pipeline_mode = #tpu.pipeline_mode<synchronous>, transform_indices = @transform_21, window_bounds = array<i64: 1, 32>}, {pipeline_mode = #tpu.pipeline_mode<synchronous>, transform_indices = @transform_22, window_bounds = array<i64: 32, 64>}, {pipeline_mode = #tpu.pipeline_mode<synchronous>, transform_indices = @transform_23, window_bounds = array<i64: 1, 64>}, {pipeline_mode = #tpu.pipeline_mode<synchronous>, transform_indices = @transform_24, window_bounds = array<i64: 64, 32>}, {pipeline_mode = #tpu.pipeline_mode<synchronous>, transform_indices = @transform_25, window_bounds = array<i64: 1, 32>}, {pipeline_mode = #tpu.pipeline_mode<synchronous>, transform_indices = @transform_26, window_bounds = array<i64: 1, 32>}, {pipeline_mode = #tpu.pipeline_mode<synchronous>, transform_indices = @transform_27, window_bounds = array<i64: 1, 32>}, {transform_indices = @transform_28, window_bounds = array<i64: 1, 8, 32>}, {transform_indices = @transform_29, window_bounds = array<i64: 1, 6, 32>}]} {
    %c0 = arith.constant 0 : index
    %c0_0 = arith.constant 0 : index
    %c0_1 = arith.constant 0 : index
    %0 = vector.load %arg1[%c0, %c0_0, %c0_1] : memref<1x8x32xf32, #tpu.memory_space<vmem>>, vector<1x8x32xf32>
    %c0_2 = arith.constant 0 : index
    %c0_3 = arith.constant 0 : index
    %c0_4 = arith.constant 0 : index
    %1 = vector.load %arg2[%c0_2, %c0_3, %c0_4] : memref<1x6x32xf32, #tpu.memory_space<vmem>>, vector<1x6x32xf32>
    %c0_5 = arith.constant 0 : index
    %c0_6 = arith.constant 0 : index
    %c0_7 = arith.constant 0 : index
    %2 = vector.load %arg3[%c0_5, %c0_6, %c0_7] : memref<1x1x8xf32, #tpu.memory_space<vmem>>, vector<1x1x8xf32>
    %c0_8 = arith.constant 0 : index
    %c0_9 = arith.constant 0 : index
    %c0_10 = arith.constant 0 : index
    %3 = vector.load %arg4[%c0_8, %c0_9, %c0_10] : memref<1x1x6xf32, #tpu.memory_space<vmem>>, vector<1x1x6xf32>
    %4 = vector.shape_cast %0 : vector<1x8x32xf32> to vector<8x32xf32>
    %5 = vector.shape_cast %1 : vector<1x6x32xf32> to vector<6x32xf32>
    %c0_11 = arith.constant 0 : index
    %c0_12 = arith.constant 0 : index
    %6 = vector.load %arg5[%c0_11, %c0_12] : memref<32x96xbf16, #tpu.memory_space<vmem>>, vector<32x96xbf16>
    %7 = arith.truncf %4 : vector<8x32xf32> to vector<8x32xbf16>
    %cst = arith.constant dense<0.000000e+00> : vector<8x96xf32>
    %8 = tpu.matmul %7, %6, %cst {dimension_numbers = #tpu.dot_dimension_numbers<[1], [0], [0], [1], [0, 0, 1, 1], [], []>} : vector<8x32xbf16>, vector<32x96xbf16>, vector<8x96xf32> -> vector<8x96xf32>
    %c0_13 = arith.constant 0 : index
    %c0_14 = arith.constant 0 : index
    %9 = vector.load %arg6[%c0_13, %c0_14] : memref<1x96xf32, #tpu.memory_space<vmem>>, vector<1x96xf32>
    %10 = vector.broadcast %9 : vector<1x96xf32> to vector<8x96xf32>
    %11 = arith.addf %8, %10 : vector<8x96xf32>
    %c0_15 = arith.constant 0 : index
    %c0_16 = arith.constant 0 : index
    %12 = vector.load %arg7[%c0_15, %c0_16] : memref<32x96xbf16, #tpu.memory_space<vmem>>, vector<32x96xbf16>
    %13 = arith.truncf %5 : vector<6x32xf32> to vector<6x32xbf16>
    %cst_17 = arith.constant dense<0.000000e+00> : vector<6x96xf32>
    %14 = tpu.matmul %13, %12, %cst_17 {dimension_numbers = #tpu.dot_dimension_numbers<[1], [0], [0], [1], [0, 0, 1, 1], [], []>} : vector<6x32xbf16>, vector<32x96xbf16>, vector<6x96xf32> -> vector<6x96xf32>
    %c0_18 = arith.constant 0 : index
    %c0_19 = arith.constant 0 : index
    %15 = vector.load %arg8[%c0_18, %c0_19] : memref<1x96xf32, #tpu.memory_space<vmem>>, vector<1x96xf32>
    %16 = vector.broadcast %15 : vector<1x96xf32> to vector<6x96xf32>
    %17 = arith.addf %14, %16 : vector<6x96xf32>
    %18 = vector.extract_strided_slice %11 {offsets = [0, 0], sizes = [8, 32], strides = [1, 1]} : vector<8x96xf32> to vector<8x32xf32>
    %19 = arith.truncf %18 : vector<8x32xf32> to vector<8x32xbf16>
    %20 = vector.extract_strided_slice %11 {offsets = [0, 32], sizes = [8, 32], strides = [1, 1]} : vector<8x96xf32> to vector<8x32xf32>
    %21 = arith.truncf %20 : vector<8x32xf32> to vector<8x32xbf16>
    %22 = vector.extract_strided_slice %11 {offsets = [0, 64], sizes = [8, 32], strides = [1, 1]} : vector<8x96xf32> to vector<8x32xf32>
    %23 = arith.truncf %22 : vector<8x32xf32> to vector<8x32xbf16>
    %24 = vector.extract_strided_slice %17 {offsets = [0, 0], sizes = [6, 32], strides = [1, 1]} : vector<6x96xf32> to vector<6x32xf32>
    %25 = arith.truncf %24 : vector<6x32xf32> to vector<6x32xbf16>
    %26 = vector.extract_strided_slice %17 {offsets = [0, 32], sizes = [6, 32], strides = [1, 1]} : vector<6x96xf32> to vector<6x32xf32>
    %27 = arith.truncf %26 : vector<6x32xf32> to vector<6x32xbf16>
    %28 = vector.extract_strided_slice %17 {offsets = [0, 64], sizes = [6, 32], strides = [1, 1]} : vector<6x96xf32> to vector<6x32xf32>
    %29 = arith.truncf %28 : vector<6x32xf32> to vector<6x32xbf16>
    %30 = vector.shape_cast %2 : vector<1x1x8xf32> to vector<1x8xf32>
    %31 = vector.shape_cast %30 : vector<1x8xf32> to vector<1x8xf32>
    %32 = vector.broadcast %31 : vector<1x8xf32> to vector<6x8xf32>
    %33 = vector.shape_cast %3 : vector<1x1x6xf32> to vector<1x6xf32>
    %34 = vector.shape_cast %33 : vector<1x6xf32> to vector<1x6xf32>
    %35 = vector.broadcast %34 : vector<1x6xf32> to vector<8x6xf32>
    %36 = vector.extract_strided_slice %25 {offsets = [0, 0], sizes = [6, 8], strides = [1, 1]} : vector<6x32xbf16> to vector<6x8xbf16>
    %37 = vector.extract_strided_slice %21 {offsets = [0, 0], sizes = [8, 8], strides = [1, 1]} : vector<8x32xbf16> to vector<8x8xbf16>
    %cst_20 = arith.constant dense<0.000000e+00> : vector<6x8xf32>
    %38 = tpu.matmul %36, %37, %cst_20 {dimension_numbers = #tpu.dot_dimension_numbers<[1], [1], [0], [0], [0, 0, 1, 0], [], []>} : vector<6x8xbf16>, vector<8x8xbf16>, vector<6x8xf32> -> vector<6x8xf32>
    %39 = arith.addf %38, %32 : vector<6x8xf32>
    %cst_21 = arith.constant dense<0xFF800000> : vector<6xf32>
    %40 = vector.multi_reduction <maximumf>, %39, %cst_21 [1] : vector<6x8xf32> to vector<6xf32>
    %41 = vector.shape_cast %40 : vector<6xf32> to vector<6x1xf32>
    %42 = vector.broadcast %41 : vector<6x1xf32> to vector<6x8xf32>
    %43 = arith.subf %39, %42 : vector<6x8xf32>
    %44 = math.exp %43 : vector<6x8xf32>
    %cst_22 = arith.constant dense<0.000000e+00> : vector<6xf32>
    %45 = vector.multi_reduction <add>, %44, %cst_22 [1] : vector<6x8xf32> to vector<6xf32>
    %46 = vector.shape_cast %45 : vector<6xf32> to vector<6x1xf32>
    %47 = tpu.reciprocal %46 {approx = true} : vector<6x1xf32> -> vector<6x1xf32>
    %48 = vector.broadcast %47 : vector<6x1xf32> to vector<6x8xf32>
    %49 = arith.mulf %44, %48 : vector<6x8xf32>
    %50 = vector.extract_strided_slice %23 {offsets = [0, 0], sizes = [8, 8], strides = [1, 1]} : vector<8x32xbf16> to vector<8x8xbf16>
    %51 = arith.truncf %49 : vector<6x8xf32> to vector<6x8xbf16>
    %cst_23 = arith.constant dense<0.000000e+00> : vector<6x8xf32>
    %52 = tpu.matmul %51, %50, %cst_23 {dimension_numbers = #tpu.dot_dimension_numbers<[1], [0], [0], [1], [0, 0, 1, 1], [], []>} : vector<6x8xbf16>, vector<8x8xbf16>, vector<6x8xf32> -> vector<6x8xf32>
    %53 = vector.extract_strided_slice %19 {offsets = [0, 0], sizes = [8, 8], strides = [1, 1]} : vector<8x32xbf16> to vector<8x8xbf16>
    %54 = vector.extract_strided_slice %27 {offsets = [0, 0], sizes = [6, 8], strides = [1, 1]} : vector<6x32xbf16> to vector<6x8xbf16>
    %cst_24 = arith.constant dense<0.000000e+00> : vector<8x6xf32>
    %55 = tpu.matmul %53, %54, %cst_24 {dimension_numbers = #tpu.dot_dimension_numbers<[1], [1], [0], [0], [0, 0, 1, 0], [], []>} : vector<8x8xbf16>, vector<6x8xbf16>, vector<8x6xf32> -> vector<8x6xf32>
    %56 = arith.addf %55, %35 : vector<8x6xf32>
    %cst_25 = arith.constant dense<0xFF800000> : vector<8xf32>
    %57 = vector.multi_reduction <maximumf>, %56, %cst_25 [1] : vector<8x6xf32> to vector<8xf32>
    %58 = vector.shape_cast %57 : vector<8xf32> to vector<8x1xf32>
    %59 = vector.broadcast %58 : vector<8x1xf32> to vector<8x6xf32>
    %60 = arith.subf %56, %59 : vector<8x6xf32>
    %61 = math.exp %60 : vector<8x6xf32>
    %cst_26 = arith.constant dense<0.000000e+00> : vector<8xf32>
    %62 = vector.multi_reduction <add>, %61, %cst_26 [1] : vector<8x6xf32> to vector<8xf32>
    %63 = vector.shape_cast %62 : vector<8xf32> to vector<8x1xf32>
    %64 = tpu.reciprocal %63 {approx = true} : vector<8x1xf32> -> vector<8x1xf32>
    %65 = vector.broadcast %64 : vector<8x1xf32> to vector<8x6xf32>
    %66 = arith.mulf %61, %65 : vector<8x6xf32>
    %67 = vector.extract_strided_slice %29 {offsets = [0, 0], sizes = [6, 8], strides = [1, 1]} : vector<6x32xbf16> to vector<6x8xbf16>
    %68 = arith.truncf %66 : vector<8x6xf32> to vector<8x6xbf16>
    %cst_27 = arith.constant dense<0.000000e+00> : vector<8x8xf32>
    %69 = tpu.matmul %68, %67, %cst_27 {dimension_numbers = #tpu.dot_dimension_numbers<[1], [0], [0], [1], [0, 0, 1, 1], [], []>} : vector<8x6xbf16>, vector<6x8xbf16>, vector<8x8xf32> -> vector<8x8xf32>
    %70 = vector.extract_strided_slice %25 {offsets = [0, 8], sizes = [6, 8], strides = [1, 1]} : vector<6x32xbf16> to vector<6x8xbf16>
    %71 = vector.extract_strided_slice %21 {offsets = [0, 8], sizes = [8, 8], strides = [1, 1]} : vector<8x32xbf16> to vector<8x8xbf16>
    %cst_28 = arith.constant dense<0.000000e+00> : vector<6x8xf32>
    %72 = tpu.matmul %70, %71, %cst_28 {dimension_numbers = #tpu.dot_dimension_numbers<[1], [1], [0], [0], [0, 0, 1, 0], [], []>} : vector<6x8xbf16>, vector<8x8xbf16>, vector<6x8xf32> -> vector<6x8xf32>
    %73 = arith.addf %72, %32 : vector<6x8xf32>
    %cst_29 = arith.constant dense<0xFF800000> : vector<6xf32>
    %74 = vector.multi_reduction <maximumf>, %73, %cst_29 [1] : vector<6x8xf32> to vector<6xf32>
    %75 = vector.shape_cast %74 : vector<6xf32> to vector<6x1xf32>
    %76 = vector.broadcast %75 : vector<6x1xf32> to vector<6x8xf32>
    %77 = arith.subf %73, %76 : vector<6x8xf32>
    %78 = math.exp %77 : vector<6x8xf32>
    %cst_30 = arith.constant dense<0.000000e+00> : vector<6xf32>
    %79 = vector.multi_reduction <add>, %78, %cst_30 [1] : vector<6x8xf32> to vector<6xf32>
    %80 = vector.shape_cast %79 : vector<6xf32> to vector<6x1xf32>
    %81 = tpu.reciprocal %80 {approx = true} : vector<6x1xf32> -> vector<6x1xf32>
    %82 = vector.broadcast %81 : vector<6x1xf32> to vector<6x8xf32>
    %83 = arith.mulf %78, %82 : vector<6x8xf32>
    %84 = vector.extract_strided_slice %23 {offsets = [0, 8], sizes = [8, 8], strides = [1, 1]} : vector<8x32xbf16> to vector<8x8xbf16>
    %85 = arith.truncf %83 : vector<6x8xf32> to vector<6x8xbf16>
    %cst_31 = arith.constant dense<0.000000e+00> : vector<6x8xf32>
    %86 = tpu.matmul %85, %84, %cst_31 {dimension_numbers = #tpu.dot_dimension_numbers<[1], [0], [0], [1], [0, 0, 1, 1], [], []>} : vector<6x8xbf16>, vector<8x8xbf16>, vector<6x8xf32> -> vector<6x8xf32>
    %87 = vector.extract_strided_slice %19 {offsets = [0, 8], sizes = [8, 8], strides = [1, 1]} : vector<8x32xbf16> to vector<8x8xbf16>
    %88 = vector.extract_strided_slice %27 {offsets = [0, 8], sizes = [6, 8], strides = [1, 1]} : vector<6x32xbf16> to vector<6x8xbf16>
    %cst_32 = arith.constant dense<0.000000e+00> : vector<8x6xf32>
    %89 = tpu.matmul %87, %88, %cst_32 {dimension_numbers = #tpu.dot_dimension_numbers<[1], [1], [0], [0], [0, 0, 1, 0], [], []>} : vector<8x8xbf16>, vector<6x8xbf16>, vector<8x6xf32> -> vector<8x6xf32>
    %90 = arith.addf %89, %35 : vector<8x6xf32>
    %cst_33 = arith.constant dense<0xFF800000> : vector<8xf32>
    %91 = vector.multi_reduction <maximumf>, %90, %cst_33 [1] : vector<8x6xf32> to vector<8xf32>
    %92 = vector.shape_cast %91 : vector<8xf32> to vector<8x1xf32>
    %93 = vector.broadcast %92 : vector<8x1xf32> to vector<8x6xf32>
    %94 = arith.subf %90, %93 : vector<8x6xf32>
    %95 = math.exp %94 : vector<8x6xf32>
    %cst_34 = arith.constant dense<0.000000e+00> : vector<8xf32>
    %96 = vector.multi_reduction <add>, %95, %cst_34 [1] : vector<8x6xf32> to vector<8xf32>
    %97 = vector.shape_cast %96 : vector<8xf32> to vector<8x1xf32>
    %98 = tpu.reciprocal %97 {approx = true} : vector<8x1xf32> -> vector<8x1xf32>
    %99 = vector.broadcast %98 : vector<8x1xf32> to vector<8x6xf32>
    %100 = arith.mulf %95, %99 : vector<8x6xf32>
    %101 = vector.extract_strided_slice %29 {offsets = [0, 8], sizes = [6, 8], strides = [1, 1]} : vector<6x32xbf16> to vector<6x8xbf16>
    %102 = arith.truncf %100 : vector<8x6xf32> to vector<8x6xbf16>
    %cst_35 = arith.constant dense<0.000000e+00> : vector<8x8xf32>
    %103 = tpu.matmul %102, %101, %cst_35 {dimension_numbers = #tpu.dot_dimension_numbers<[1], [0], [0], [1], [0, 0, 1, 1], [], []>} : vector<8x6xbf16>, vector<6x8xbf16>, vector<8x8xf32> -> vector<8x8xf32>
    %104 = vector.extract_strided_slice %25 {offsets = [0, 16], sizes = [6, 8], strides = [1, 1]} : vector<6x32xbf16> to vector<6x8xbf16>
    %105 = vector.extract_strided_slice %21 {offsets = [0, 16], sizes = [8, 8], strides = [1, 1]} : vector<8x32xbf16> to vector<8x8xbf16>
    %cst_36 = arith.constant dense<0.000000e+00> : vector<6x8xf32>
    %106 = tpu.matmul %104, %105, %cst_36 {dimension_numbers = #tpu.dot_dimension_numbers<[1], [1], [0], [0], [0, 0, 1, 0], [], []>} : vector<6x8xbf16>, vector<8x8xbf16>, vector<6x8xf32> -> vector<6x8xf32>
    %107 = arith.addf %106, %32 : vector<6x8xf32>
    %cst_37 = arith.constant dense<0xFF800000> : vector<6xf32>
    %108 = vector.multi_reduction <maximumf>, %107, %cst_37 [1] : vector<6x8xf32> to vector<6xf32>
    %109 = vector.shape_cast %108 : vector<6xf32> to vector<6x1xf32>
    %110 = vector.broadcast %109 : vector<6x1xf32> to vector<6x8xf32>
    %111 = arith.subf %107, %110 : vector<6x8xf32>
    %112 = math.exp %111 : vector<6x8xf32>
    %cst_38 = arith.constant dense<0.000000e+00> : vector<6xf32>
    %113 = vector.multi_reduction <add>, %112, %cst_38 [1] : vector<6x8xf32> to vector<6xf32>
    %114 = vector.shape_cast %113 : vector<6xf32> to vector<6x1xf32>
    %115 = tpu.reciprocal %114 {approx = true} : vector<6x1xf32> -> vector<6x1xf32>
    %116 = vector.broadcast %115 : vector<6x1xf32> to vector<6x8xf32>
    %117 = arith.mulf %112, %116 : vector<6x8xf32>
    %118 = vector.extract_strided_slice %23 {offsets = [0, 16], sizes = [8, 8], strides = [1, 1]} : vector<8x32xbf16> to vector<8x8xbf16>
    %119 = arith.truncf %117 : vector<6x8xf32> to vector<6x8xbf16>
    %cst_39 = arith.constant dense<0.000000e+00> : vector<6x8xf32>
    %120 = tpu.matmul %119, %118, %cst_39 {dimension_numbers = #tpu.dot_dimension_numbers<[1], [0], [0], [1], [0, 0, 1, 1], [], []>} : vector<6x8xbf16>, vector<8x8xbf16>, vector<6x8xf32> -> vector<6x8xf32>
    %121 = vector.extract_strided_slice %19 {offsets = [0, 16], sizes = [8, 8], strides = [1, 1]} : vector<8x32xbf16> to vector<8x8xbf16>
    %122 = vector.extract_strided_slice %27 {offsets = [0, 16], sizes = [6, 8], strides = [1, 1]} : vector<6x32xbf16> to vector<6x8xbf16>
    %cst_40 = arith.constant dense<0.000000e+00> : vector<8x6xf32>
    %123 = tpu.matmul %121, %122, %cst_40 {dimension_numbers = #tpu.dot_dimension_numbers<[1], [1], [0], [0], [0, 0, 1, 0], [], []>} : vector<8x8xbf16>, vector<6x8xbf16>, vector<8x6xf32> -> vector<8x6xf32>
    %124 = arith.addf %123, %35 : vector<8x6xf32>
    %cst_41 = arith.constant dense<0xFF800000> : vector<8xf32>
    %125 = vector.multi_reduction <maximumf>, %124, %cst_41 [1] : vector<8x6xf32> to vector<8xf32>
    %126 = vector.shape_cast %125 : vector<8xf32> to vector<8x1xf32>
    %127 = vector.broadcast %126 : vector<8x1xf32> to vector<8x6xf32>
    %128 = arith.subf %124, %127 : vector<8x6xf32>
    %129 = math.exp %128 : vector<8x6xf32>
    %cst_42 = arith.constant dense<0.000000e+00> : vector<8xf32>
    %130 = vector.multi_reduction <add>, %129, %cst_42 [1] : vector<8x6xf32> to vector<8xf32>
    %131 = vector.shape_cast %130 : vector<8xf32> to vector<8x1xf32>
    %132 = tpu.reciprocal %131 {approx = true} : vector<8x1xf32> -> vector<8x1xf32>
    %133 = vector.broadcast %132 : vector<8x1xf32> to vector<8x6xf32>
    %134 = arith.mulf %129, %133 : vector<8x6xf32>
    %135 = vector.extract_strided_slice %29 {offsets = [0, 16], sizes = [6, 8], strides = [1, 1]} : vector<6x32xbf16> to vector<6x8xbf16>
    %136 = arith.truncf %134 : vector<8x6xf32> to vector<8x6xbf16>
    %cst_43 = arith.constant dense<0.000000e+00> : vector<8x8xf32>
    %137 = tpu.matmul %136, %135, %cst_43 {dimension_numbers = #tpu.dot_dimension_numbers<[1], [0], [0], [1], [0, 0, 1, 1], [], []>} : vector<8x6xbf16>, vector<6x8xbf16>, vector<8x8xf32> -> vector<8x8xf32>
    %138 = vector.extract_strided_slice %25 {offsets = [0, 24], sizes = [6, 8], strides = [1, 1]} : vector<6x32xbf16> to vector<6x8xbf16>
    %139 = vector.extract_strided_slice %21 {offsets = [0, 24], sizes = [8, 8], strides = [1, 1]} : vector<8x32xbf16> to vector<8x8xbf16>
    %cst_44 = arith.constant dense<0.000000e+00> : vector<6x8xf32>
    %140 = tpu.matmul %138, %139, %cst_44 {dimension_numbers = #tpu.dot_dimension_numbers<[1], [1], [0], [0], [0, 0, 1, 0], [], []>} : vector<6x8xbf16>, vector<8x8xbf16>, vector<6x8xf32> -> vector<6x8xf32>
    %141 = arith.addf %140, %32 : vector<6x8xf32>
    %cst_45 = arith.constant dense<0xFF800000> : vector<6xf32>
    %142 = vector.multi_reduction <maximumf>, %141, %cst_45 [1] : vector<6x8xf32> to vector<6xf32>
    %143 = vector.shape_cast %142 : vector<6xf32> to vector<6x1xf32>
    %144 = vector.broadcast %143 : vector<6x1xf32> to vector<6x8xf32>
    %145 = arith.subf %141, %144 : vector<6x8xf32>
    %146 = math.exp %145 : vector<6x8xf32>
    %cst_46 = arith.constant dense<0.000000e+00> : vector<6xf32>
    %147 = vector.multi_reduction <add>, %146, %cst_46 [1] : vector<6x8xf32> to vector<6xf32>
    %148 = vector.shape_cast %147 : vector<6xf32> to vector<6x1xf32>
    %149 = tpu.reciprocal %148 {approx = true} : vector<6x1xf32> -> vector<6x1xf32>
    %150 = vector.broadcast %149 : vector<6x1xf32> to vector<6x8xf32>
    %151 = arith.mulf %146, %150 : vector<6x8xf32>
    %152 = vector.extract_strided_slice %23 {offsets = [0, 24], sizes = [8, 8], strides = [1, 1]} : vector<8x32xbf16> to vector<8x8xbf16>
    %153 = arith.truncf %151 : vector<6x8xf32> to vector<6x8xbf16>
    %cst_47 = arith.constant dense<0.000000e+00> : vector<6x8xf32>
    %154 = tpu.matmul %153, %152, %cst_47 {dimension_numbers = #tpu.dot_dimension_numbers<[1], [0], [0], [1], [0, 0, 1, 1], [], []>} : vector<6x8xbf16>, vector<8x8xbf16>, vector<6x8xf32> -> vector<6x8xf32>
    %155 = vector.extract_strided_slice %19 {offsets = [0, 24], sizes = [8, 8], strides = [1, 1]} : vector<8x32xbf16> to vector<8x8xbf16>
    %156 = vector.extract_strided_slice %27 {offsets = [0, 24], sizes = [6, 8], strides = [1, 1]} : vector<6x32xbf16> to vector<6x8xbf16>
    %cst_48 = arith.constant dense<0.000000e+00> : vector<8x6xf32>
    %157 = tpu.matmul %155, %156, %cst_48 {dimension_numbers = #tpu.dot_dimension_numbers<[1], [1], [0], [0], [0, 0, 1, 0], [], []>} : vector<8x8xbf16>, vector<6x8xbf16>, vector<8x6xf32> -> vector<8x6xf32>
    %158 = arith.addf %157, %35 : vector<8x6xf32>
    %cst_49 = arith.constant dense<0xFF800000> : vector<8xf32>
    %159 = vector.multi_reduction <maximumf>, %158, %cst_49 [1] : vector<8x6xf32> to vector<8xf32>
    %160 = vector.shape_cast %159 : vector<8xf32> to vector<8x1xf32>
    %161 = vector.broadcast %160 : vector<8x1xf32> to vector<8x6xf32>
    %162 = arith.subf %158, %161 : vector<8x6xf32>
    %163 = math.exp %162 : vector<8x6xf32>
    %cst_50 = arith.constant dense<0.000000e+00> : vector<8xf32>
    %164 = vector.multi_reduction <add>, %163, %cst_50 [1] : vector<8x6xf32> to vector<8xf32>
    %165 = vector.shape_cast %164 : vector<8xf32> to vector<8x1xf32>
    %166 = tpu.reciprocal %165 {approx = true} : vector<8x1xf32> -> vector<8x1xf32>
    %167 = vector.broadcast %166 : vector<8x1xf32> to vector<8x6xf32>
    %168 = arith.mulf %163, %167 : vector<8x6xf32>
    %169 = vector.extract_strided_slice %29 {offsets = [0, 24], sizes = [6, 8], strides = [1, 1]} : vector<6x32xbf16> to vector<6x8xbf16>
    %170 = arith.truncf %168 : vector<8x6xf32> to vector<8x6xbf16>
    %cst_51 = arith.constant dense<0.000000e+00> : vector<8x8xf32>
    %171 = tpu.matmul %170, %169, %cst_51 {dimension_numbers = #tpu.dot_dimension_numbers<[1], [0], [0], [1], [0, 0, 1, 1], [], []>} : vector<8x6xbf16>, vector<6x8xbf16>, vector<8x8xf32> -> vector<8x8xf32>
    %172 = tpu.concatenate %52, %86, %120, %154 in 1 : vector<6x8xf32>, vector<6x8xf32>, vector<6x8xf32>, vector<6x8xf32> -> vector<6x32xf32>
    %173 = tpu.concatenate %69, %103, %137, %171 in 1 : vector<8x8xf32>, vector<8x8xf32>, vector<8x8xf32>, vector<8x8xf32> -> vector<8x32xf32>
    %c0_52 = arith.constant 0 : index
    %c0_53 = arith.constant 0 : index
    %174 = vector.load %arg9[%c0_52, %c0_53] : memref<32x32xbf16, #tpu.memory_space<vmem>>, vector<32x32xbf16>
    %175 = arith.truncf %173 : vector<8x32xf32> to vector<8x32xbf16>
    %cst_54 = arith.constant dense<0.000000e+00> : vector<8x32xf32>
    %176 = tpu.matmul %175, %174, %cst_54 {dimension_numbers = #tpu.dot_dimension_numbers<[1], [0], [0], [1], [0, 0, 1, 1], [], []>} : vector<8x32xbf16>, vector<32x32xbf16>, vector<8x32xf32> -> vector<8x32xf32>
    %c0_55 = arith.constant 0 : index
    %c0_56 = arith.constant 0 : index
    %177 = vector.load %arg10[%c0_55, %c0_56] : memref<1x32xf32, #tpu.memory_space<vmem>>, vector<1x32xf32>
    %178 = vector.broadcast %177 : vector<1x32xf32> to vector<8x32xf32>
    %179 = arith.addf %176, %178 : vector<8x32xf32>
    %180 = arith.addf %179, %4 : vector<8x32xf32>
    %c0_57 = arith.constant 0 : index
    %c0_58 = arith.constant 0 : index
    %181 = vector.load %arg13[%c0_57, %c0_58] : memref<1x32xf32, #tpu.memory_space<vmem>>, vector<1x32xf32>
    %c0_59 = arith.constant 0 : index
    %c0_60 = arith.constant 0 : index
    %182 = vector.load %arg14[%c0_59, %c0_60] : memref<1x32xf32, #tpu.memory_space<vmem>>, vector<1x32xf32>
    %cst_61 = arith.constant dense<0.000000e+00> : vector<8xf32>
    %183 = vector.multi_reduction <add>, %180, %cst_61 [1] : vector<8x32xf32> to vector<8xf32>
    %184 = vector.shape_cast %183 : vector<8xf32> to vector<8x1xf32>
    %cst_62 = arith.constant 3.200000e+01 : f32
    %185 = vector.broadcast %cst_62 : f32 to vector<8x1xf32>
    %186 = arith.divf %184, %185 : vector<8x1xf32>
    %187 = vector.broadcast %186 : vector<8x1xf32> to vector<8x32xf32>
    %188 = arith.subf %180, %187 : vector<8x32xf32>
    %189 = arith.mulf %188, %188 : vector<8x32xf32>
    %cst_63 = arith.constant dense<0.000000e+00> : vector<8xf32>
    %190 = vector.multi_reduction <add>, %189, %cst_63 [1] : vector<8x32xf32> to vector<8xf32>
    %191 = vector.shape_cast %190 : vector<8xf32> to vector<8x1xf32>
    %cst_64 = arith.constant 3.200000e+01 : f32
    %192 = vector.broadcast %cst_64 : f32 to vector<8x1xf32>
    %193 = arith.divf %191, %192 : vector<8x1xf32>
    %cst_65 = arith.constant 9.99999996E-13 : f32
    %194 = vector.broadcast %cst_65 : f32 to vector<8x1xf32>
    %195 = arith.addf %193, %194 : vector<8x1xf32>
    %196 = math.rsqrt %195 : vector<8x1xf32>
    %197 = vector.broadcast %196 : vector<8x1xf32> to vector<8x32xf32>
    %198 = arith.mulf %188, %197 : vector<8x32xf32>
    %199 = vector.broadcast %181 : vector<1x32xf32> to vector<8x32xf32>
    %200 = arith.mulf %198, %199 : vector<8x32xf32>
    %201 = vector.broadcast %182 : vector<1x32xf32> to vector<8x32xf32>
    %202 = arith.addf %200, %201 : vector<8x32xf32>
    %c0_66 = arith.constant 0 : index
    %c0_67 = arith.constant 0 : index
    %203 = vector.load %arg11[%c0_66, %c0_67] : memref<32x32xbf16, #tpu.memory_space<vmem>>, vector<32x32xbf16>
    %204 = arith.truncf %172 : vector<6x32xf32> to vector<6x32xbf16>
    %cst_68 = arith.constant dense<0.000000e+00> : vector<6x32xf32>
    %205 = tpu.matmul %204, %203, %cst_68 {dimension_numbers = #tpu.dot_dimension_numbers<[1], [0], [0], [1], [0, 0, 1, 1], [], []>} : vector<6x32xbf16>, vector<32x32xbf16>, vector<6x32xf32> -> vector<6x32xf32>
    %c0_69 = arith.constant 0 : index
    %c0_70 = arith.constant 0 : index
    %206 = vector.load %arg12[%c0_69, %c0_70] : memref<1x32xf32, #tpu.memory_space<vmem>>, vector<1x32xf32>
    %207 = vector.broadcast %206 : vector<1x32xf32> to vector<6x32xf32>
    %208 = arith.addf %205, %207 : vector<6x32xf32>
    %209 = arith.addf %208, %5 : vector<6x32xf32>
    %c0_71 = arith.constant 0 : index
    %c0_72 = arith.constant 0 : index
    %210 = vector.load %arg15[%c0_71, %c0_72] : memref<1x32xf32, #tpu.memory_space<vmem>>, vector<1x32xf32>
    %c0_73 = arith.constant 0 : index
    %c0_74 = arith.constant 0 : index
    %211 = vector.load %arg16[%c0_73, %c0_74] : memref<1x32xf32, #tpu.memory_space<vmem>>, vector<1x32xf32>
    %cst_75 = arith.constant dense<0.000000e+00> : vector<6xf32>
    %212 = vector.multi_reduction <add>, %209, %cst_75 [1] : vector<6x32xf32> to vector<6xf32>
    %213 = vector.shape_cast %212 : vector<6xf32> to vector<6x1xf32>
    %cst_76 = arith.constant 3.200000e+01 : f32
    %214 = vector.broadcast %cst_76 : f32 to vector<6x1xf32>
    %215 = arith.divf %213, %214 : vector<6x1xf32>
    %216 = vector.broadcast %215 : vector<6x1xf32> to vector<6x32xf32>
    %217 = arith.subf %209, %216 : vector<6x32xf32>
    %218 = arith.mulf %217, %217 : vector<6x32xf32>
    %cst_77 = arith.constant dense<0.000000e+00> : vector<6xf32>
    %219 = vector.multi_reduction <add>, %218, %cst_77 [1] : vector<6x32xf32> to vector<6xf32>
    %220 = vector.shape_cast %219 : vector<6xf32> to vector<6x1xf32>
    %cst_78 = arith.constant 3.200000e+01 : f32
    %221 = vector.broadcast %cst_78 : f32 to vector<6x1xf32>
    %222 = arith.divf %220, %221 : vector<6x1xf32>
    %cst_79 = arith.constant 9.99999996E-13 : f32
    %223 = vector.broadcast %cst_79 : f32 to vector<6x1xf32>
    %224 = arith.addf %222, %223 : vector<6x1xf32>
    %225 = math.rsqrt %224 : vector<6x1xf32>
    %226 = vector.broadcast %225 : vector<6x1xf32> to vector<6x32xf32>
    %227 = arith.mulf %217, %226 : vector<6x32xf32>
    %228 = vector.broadcast %210 : vector<1x32xf32> to vector<6x32xf32>
    %229 = arith.mulf %227, %228 : vector<6x32xf32>
    %230 = vector.broadcast %211 : vector<1x32xf32> to vector<6x32xf32>
    %231 = arith.addf %229, %230 : vector<6x32xf32>
    %c0_80 = arith.constant 0 : index
    %c0_81 = arith.constant 0 : index
    %232 = vector.load %arg17[%c0_80, %c0_81] : memref<32x64xbf16, #tpu.memory_space<vmem>>, vector<32x64xbf16>
    %233 = arith.truncf %202 : vector<8x32xf32> to vector<8x32xbf16>
    %cst_82 = arith.constant dense<0.000000e+00> : vector<8x64xf32>
    %234 = tpu.matmul %233, %232, %cst_82 {dimension_numbers = #tpu.dot_dimension_numbers<[1], [0], [0], [1], [0, 0, 1, 1], [], []>} : vector<8x32xbf16>, vector<32x64xbf16>, vector<8x64xf32> -> vector<8x64xf32>
    %c0_83 = arith.constant 0 : index
    %c0_84 = arith.constant 0 : index
    %235 = vector.load %arg18[%c0_83, %c0_84] : memref<1x64xf32, #tpu.memory_space<vmem>>, vector<1x64xf32>
    %236 = vector.broadcast %235 : vector<1x64xf32> to vector<8x64xf32>
    %237 = arith.addf %234, %236 : vector<8x64xf32>
    %cst_85 = arith.constant 5.000000e-01 : f32
    %238 = vector.broadcast %cst_85 : f32 to vector<8x64xf32>
    %239 = arith.mulf %238, %237 : vector<8x64xf32>
    %cst_86 = arith.constant 4.471500e-02 : f32
    %240 = vector.broadcast %cst_86 : f32 to vector<8x64xf32>
    %241 = arith.mulf %240, %237 : vector<8x64xf32>
    %242 = arith.mulf %241, %237 : vector<8x64xf32>
    %243 = arith.mulf %242, %237 : vector<8x64xf32>
    %244 = arith.addf %237, %243 : vector<8x64xf32>
    %cst_87 = arith.constant 0.797884583 : f32
    %245 = vector.broadcast %cst_87 : f32 to vector<8x64xf32>
    %246 = arith.mulf %245, %244 : vector<8x64xf32>
    %247 = math.tanh %246 : vector<8x64xf32>
    %cst_88 = arith.constant 1.000000e+00 : f32
    %248 = vector.broadcast %cst_88 : f32 to vector<8x64xf32>
    %249 = arith.addf %248, %247 : vector<8x64xf32>
    %250 = arith.mulf %239, %249 : vector<8x64xf32>
    %c0_89 = arith.constant 0 : index
    %c0_90 = arith.constant 0 : index
    %251 = vector.load %arg19[%c0_89, %c0_90] : memref<64x32xbf16, #tpu.memory_space<vmem>>, vector<64x32xbf16>
    %252 = arith.truncf %250 : vector<8x64xf32> to vector<8x64xbf16>
    %cst_91 = arith.constant dense<0.000000e+00> : vector<8x32xf32>
    %253 = tpu.matmul %252, %251, %cst_91 {dimension_numbers = #tpu.dot_dimension_numbers<[1], [0], [0], [1], [0, 0, 1, 1], [], []>} : vector<8x64xbf16>, vector<64x32xbf16>, vector<8x32xf32> -> vector<8x32xf32>
    %c0_92 = arith.constant 0 : index
    %c0_93 = arith.constant 0 : index
    %254 = vector.load %arg20[%c0_92, %c0_93] : memref<1x32xf32, #tpu.memory_space<vmem>>, vector<1x32xf32>
    %255 = vector.broadcast %254 : vector<1x32xf32> to vector<8x32xf32>
    %256 = arith.addf %253, %255 : vector<8x32xf32>
    %257 = arith.addf %256, %202 : vector<8x32xf32>
    %c0_94 = arith.constant 0 : index
    %c0_95 = arith.constant 0 : index
    %258 = vector.load %arg21[%c0_94, %c0_95] : memref<1x32xf32, #tpu.memory_space<vmem>>, vector<1x32xf32>
    %c0_96 = arith.constant 0 : index
    %c0_97 = arith.constant 0 : index
    %259 = vector.load %arg22[%c0_96, %c0_97] : memref<1x32xf32, #tpu.memory_space<vmem>>, vector<1x32xf32>
    %cst_98 = arith.constant dense<0.000000e+00> : vector<8xf32>
    %260 = vector.multi_reduction <add>, %257, %cst_98 [1] : vector<8x32xf32> to vector<8xf32>
    %261 = vector.shape_cast %260 : vector<8xf32> to vector<8x1xf32>
    %cst_99 = arith.constant 3.200000e+01 : f32
    %262 = vector.broadcast %cst_99 : f32 to vector<8x1xf32>
    %263 = arith.divf %261, %262 : vector<8x1xf32>
    %264 = vector.broadcast %263 : vector<8x1xf32> to vector<8x32xf32>
    %265 = arith.subf %257, %264 : vector<8x32xf32>
    %266 = arith.mulf %265, %265 : vector<8x32xf32>
    %cst_100 = arith.constant dense<0.000000e+00> : vector<8xf32>
    %267 = vector.multi_reduction <add>, %266, %cst_100 [1] : vector<8x32xf32> to vector<8xf32>
    %268 = vector.shape_cast %267 : vector<8xf32> to vector<8x1xf32>
    %cst_101 = arith.constant 3.200000e+01 : f32
    %269 = vector.broadcast %cst_101 : f32 to vector<8x1xf32>
    %270 = arith.divf %268, %269 : vector<8x1xf32>
    %cst_102 = arith.constant 9.99999996E-13 : f32
    %271 = vector.broadcast %cst_102 : f32 to vector<8x1xf32>
    %272 = arith.addf %270, %271 : vector<8x1xf32>
    %273 = math.rsqrt %272 : vector<8x1xf32>
    %274 = vector.broadcast %273 : vector<8x1xf32> to vector<8x32xf32>
    %275 = arith.mulf %265, %274 : vector<8x32xf32>
    %276 = vector.broadcast %258 : vector<1x32xf32> to vector<8x32xf32>
    %277 = arith.mulf %275, %276 : vector<8x32xf32>
    %278 = vector.broadcast %259 : vector<1x32xf32> to vector<8x32xf32>
    %279 = arith.addf %277, %278 : vector<8x32xf32>
    %280 = vector.shape_cast %279 : vector<8x32xf32> to vector<1x8x32xf32>
    %c0_103 = arith.constant 0 : index
    %c0_104 = arith.constant 0 : index
    %c0_105 = arith.constant 0 : index
    %281 = vector.load %arg29[%c0_103, %c0_104, %c0_105] : memref<1x8x32xf32, #tpu.memory_space<vmem>>, vector<1x8x32xf32>
    tpu.vector_store %arg29[%c0_103, %c0_104, %c0_105], %280 {strides = array<i32>} : memref<1x8x32xf32, #tpu.memory_space<vmem>>, vector<1x8x32xf32>,
    %c0_106 = arith.constant 0 : index
    %c0_107 = arith.constant 0 : index
    %282 = vector.load %arg23[%c0_106, %c0_107] : memref<32x64xbf16, #tpu.memory_space<vmem>>, vector<32x64xbf16>
    %283 = arith.truncf %231 : vector<6x32xf32> to vector<6x32xbf16>
    %cst_108 = arith.constant dense<0.000000e+00> : vector<6x64xf32>
    %284 = tpu.matmul %283, %282, %cst_108 {dimension_numbers = #tpu.dot_dimension_numbers<[1], [0], [0], [1], [0, 0, 1, 1], [], []>} : vector<6x32xbf16>, vector<32x64xbf16>, vector<6x64xf32> -> vector<6x64xf32>
    %c0_109 = arith.constant 0 : index
    %c0_110 = arith.constant 0 : index
    %285 = vector.load %arg24[%c0_109, %c0_110] : memref<1x64xf32, #tpu.memory_space<vmem>>, vector<1x64xf32>
    %286 = vector.broadcast %285 : vector<1x64xf32> to vector<6x64xf32>
    %287 = arith.addf %284, %286 : vector<6x64xf32>
    %cst_111 = arith.constant 5.000000e-01 : f32
    %288 = vector.broadcast %cst_111 : f32 to vector<6x64xf32>
    %289 = arith.mulf %288, %287 : vector<6x64xf32>
    %cst_112 = arith.constant 4.471500e-02 : f32
    %290 = vector.broadcast %cst_112 : f32 to vector<6x64xf32>
    %291 = arith.mulf %290, %287 : vector<6x64xf32>
    %292 = arith.mulf %291, %287 : vector<6x64xf32>
    %293 = arith.mulf %292, %287 : vector<6x64xf32>
    %294 = arith.addf %287, %293 : vector<6x64xf32>
    %cst_113 = arith.constant 0.797884583 : f32
    %295 = vector.broadcast %cst_113 : f32 to vector<6x64xf32>
    %296 = arith.mulf %295, %294 : vector<6x64xf32>
    %297 = math.tanh %296 : vector<6x64xf32>
    %cst_114 = arith.constant 1.000000e+00 : f32
    %298 = vector.broadcast %cst_114 : f32 to vector<6x64xf32>
    %299 = arith.addf %298, %297 : vector<6x64xf32>
    %300 = arith.mulf %289, %299 : vector<6x64xf32>
    %c0_115 = arith.constant 0 : index
    %c0_116 = arith.constant 0 : index
    %301 = vector.load %arg25[%c0_115, %c0_116] : memref<64x32xbf16, #tpu.memory_space<vmem>>, vector<64x32xbf16>
    %302 = arith.truncf %300 : vector<6x64xf32> to vector<6x64xbf16>
    %cst_117 = arith.constant dense<0.000000e+00> : vector<6x32xf32>
    %303 = tpu.matmul %302, %301, %cst_117 {dimension_numbers = #tpu.dot_dimension_numbers<[1], [0], [0], [1], [0, 0, 1, 1], [], []>} : vector<6x64xbf16>, vector<64x32xbf16>, vector<6x32xf32> -> vector<6x32xf32>
    %c0_118 = arith.constant 0 : index
    %c0_119 = arith.constant 0 : index
    %304 = vector.load %arg26[%c0_118, %c0_119] : memref<1x32xf32, #tpu.memory_space<vmem>>, vector<1x32xf32>
    %305 = vector.broadcast %304 : vector<1x32xf32> to vector<6x32xf32>
    %306 = arith.addf %303, %305 : vector<6x32xf32>
    %307 = arith.addf %306, %231 : vector<6x32xf32>
    %c0_120 = arith.constant 0 : index
    %c0_121 = arith.constant 0 : index
    %308 = vector.load %arg27[%c0_120, %c0_121] : memref<1x32xf32, #tpu.memory_space<vmem>>, vector<1x32xf32>
    %c0_122 = arith.constant 0 : index
    %c0_123 = arith.constant 0 : index
    %309 = vector.load %arg28[%c0_122, %c0_123] : memref<1x32xf32, #tpu.memory_space<vmem>>, vector<1x32xf32>
    %cst_124 = arith.constant dense<0.000000e+00> : vector<6xf32>
    %310 = vector.multi_reduction <add>, %307, %cst_124 [1] : vector<6x32xf32> to vector<6xf32>
    %311 = vector.shape_cast %310 : vector<6xf32> to vector<6x1xf32>
    %cst_125 = arith.constant 3.200000e+01 : f32
    %312 = vector.broadcast %cst_125 : f32 to vector<6x1xf32>
    %313 = arith.divf %311, %312 : vector<6x1xf32>
    %314 = vector.broadcast %313 : vector<6x1xf32> to vector<6x32xf32>
    %315 = arith.subf %307, %314 : vector<6x32xf32>
    %316 = arith.mulf %315, %315 : vector<6x32xf32>
    %cst_126 = arith.constant dense<0.000000e+00> : vector<6xf32>
    %317 = vector.multi_reduction <add>, %316, %cst_126 [1] : vector<6x32xf32> to vector<6xf32>
    %318 = vector.shape_cast %317 : vector<6xf32> to vector<6x1xf32>
    %cst_127 = arith.constant 3.200000e+01 : f32
    %319 = vector.broadcast %cst_127 : f32 to vector<6x1xf32>
    %320 = arith.divf %318, %319 : vector<6x1xf32>
    %cst_128 = arith.constant 9.99999996E-13 : f32
    %321 = vector.broadcast %cst_128 : f32 to vector<6x1xf32>
    %322 = arith.addf %320, %321 : vector<6x1xf32>
    %323 = math.rsqrt %322 : vector<6x1xf32>
    %324 = vector.broadcast %323 : vector<6x1xf32> to vector<6x32xf32>
    %325 = arith.mulf %315, %324 : vector<6x32xf32>
    %326 = vector.broadcast %308 : vector<1x32xf32> to vector<6x32xf32>
    %327 = arith.mulf %325, %326 : vector<6x32xf32>
    %328 = vector.broadcast %309 : vector<1x32xf32> to vector<6x32xf32>
    %329 = arith.addf %327, %328 : vector<6x32xf32>
    %330 = vector.shape_cast %329 : vector<6x32xf32> to vector<1x6x32xf32>
    %c0_129 = arith.constant 0 : index
    %c0_130 = arith.constant 0 : index
    %c0_131 = arith.constant 0 : index
    %331 = vector.load %arg30[%c0_129, %c0_130, %c0_131] : memref<1x6x32xf32, #tpu.memory_space<vmem>>, vector<1x6x32xf32>
    tpu.vector_store %arg30[%c0_129, %c0_130, %c0_131], %330 {strides = array<i32>} : memref<1x6x32xf32, #tpu.memory_space<vmem>>, vector<1x6x32xf32>,
    return
  }
  func.func @transform_0(%arg0: i32) -> (i32, i32, i32) {
    %c0_i32 = arith.constant 0 : i32
    %c0_i32_0 = arith.constant 0 : i32
    %c0_i32_1 = arith.constant 0 : i32
    return %arg0, %c0_i32, %c0_i32_0 : i32, i32, i32
  }
  func.func @transform_1(%arg0: i32) -> (i32, i32, i32) {
    %c0_i32 = arith.constant 0 : i32
    %c0_i32_0 = arith.constant 0 : i32
    %c0_i32_1 = arith.constant 0 : i32
    return %arg0, %c0_i32, %c0_i32_0 : i32, i32, i32
  }
  func.func @transform_2(%arg0: i32) -> (i32, i32, i32) {
    %c0_i32 = arith.constant 0 : i32
    %c0_i32_0 = arith.constant 0 : i32
    %c0_i32_1 = arith.constant 0 : i32
    return %arg0, %c0_i32, %c0_i32_0 : i32, i32, i32
  }
  func.func @transform_3(%arg0: i32) -> (i32, i32, i32) {
    %c0_i32 = arith.constant 0 : i32
    %c0_i32_0 = arith.constant 0 : i32
    %c0_i32_1 = arith.constant 0 : i32
    return %arg0, %c0_i32, %c0_i32_0 : i32, i32, i32
  }
  func.func @transform_4(%arg0: i32) -> (i32, i32) {
    %c0_i32 = arith.constant 0 : i32
    %c0_i32_0 = arith.constant 0 : i32
    %c0_i32_1 = arith.constant 0 : i32
    return %c0_i32, %c0_i32_0 : i32, i32
  }
  func.func @transform_5(%arg0: i32) -> (i32, i32) {
    %c0_i32 = arith.constant 0 : i32
    %c0_i32_0 = arith.constant 0 : i32
    %c0_i32_1 = arith.constant 0 : i32
    return %c0_i32, %c0_i32_0 : i32, i32
  }
  func.func @transform_6(%arg0: i32) -> (i32, i32) {
    %c0_i32 = arith.constant 0 : i32
    %c0_i32_0 = arith.constant 0 : i32
    %c0_i32_1 = arith.constant 0 : i32
    return %c0_i32, %c0_i32_0 : i32, i32
  }
  func.func @transform_7(%arg0: i32) -> (i32, i32) {
    %c0_i32 = arith.constant 0 : i32
    %c0_i32_0 = arith.constant 0 : i32
    %c0_i32_1 = arith.constant 0 : i32
    return %c0_i32, %c0_i32_0 : i32, i32
  }
  func.func @transform_8(%arg0: i32) -> (i32, i32) {
    %c0_i32 = arith.constant 0 : i32
    %c0_i32_0 = arith.constant 0 : i32
    %c0_i32_1 = arith.constant 0 : i32
    return %c0_i32, %c0_i32_0 : i32, i32
  }
  func.func @transform_9(%arg0: i32) -> (i32, i32) {
    %c0_i32 = arith.constant 0 : i32
    %c0_i32_0 = arith.constant 0 : i32
    %c0_i32_1 = arith.constant 0 : i32
    return %c0_i32, %c0_i32_0 : i32, i32
  }
  func.func @transform_10(%arg0: i32) -> (i32, i32) {
    %c0_i32 = arith.constant 0 : i32
    %c0_i32_0 = arith.constant 0 : i32
    %c0_i32_1 = arith.constant 0 : i32
    return %c0_i32, %c0_i32_0 : i32, i32
  }
  func.func @transform_11(%arg0: i32) -> (i32, i32) {
    %c0_i32 = arith.constant 0 : i32
    %c0_i32_0 = arith.constant 0 : i32
    %c0_i32_1 = arith.constant 0 : i32
    return %c0_i32, %c0_i32_0 : i32, i32
  }
  func.func @transform_12(%arg0: i32) -> (i32, i32) {
    %c0_i32 = arith.constant 0 : i32
    %c0_i32_0 = arith.constant 0 : i32
    %c0_i32_1 = arith.constant 0 : i32
    return %c0_i32, %c0_i32_0 : i32, i32
  }
  func.func @transform_13(%arg0: i32) -> (i32, i32) {
    %c0_i32 = arith.constant 0 : i32
    %c0_i32_0 = arith.constant 0 : i32
    %c0_i32_1 = arith.constant 0 : i32
    return %c0_i32, %c0_i32_0 : i32, i32
  }
  func.func @transform_14(%arg0: i32) -> (i32, i32) {
    %c0_i32 = arith.constant 0 : i32
    %c0_i32_0 = arith.constant 0 : i32
    %c0_i32_1 = arith.constant 0 : i32
    return %c0_i32, %c0_i32_0 : i32, i32
  }
  func.func @transform_15(%arg0: i32) -> (i32, i32) {
    %c0_i32 = arith.constant 0 : i32
    %c0_i32_0 = arith.constant 0 : i32
    %c0_i32_1 = arith.constant 0 : i32
    return %c0_i32, %c0_i32_0 : i32, i32
  }
  func.func @transform_16(%arg0: i32) -> (i32, i32) {
    %c0_i32 = arith.constant 0 : i32
    %c0_i32_0 = arith.constant 0 : i32
    %c0_i32_1 = arith.constant 0 : i32
    return %c0_i32, %c0_i32_0 : i32, i32
  }
  func.func @transform_17(%arg0: i32) -> (i32, i32) {
    %c0_i32 = arith.constant 0 : i32
    %c0_i32_0 = arith.constant 0 : i32
    %c0_i32_1 = arith.constant 0 : i32
    return %c0_i32, %c0_i32_0 : i32, i32
  }
  func.func @transform_18(%arg0: i32) -> (i32, i32) {
    %c0_i32 = arith.constant 0 : i32
    %c0_i32_0 = arith.constant 0 : i32
    %c0_i32_1 = arith.constant 0 : i32
    return %c0_i32, %c0_i32_0 : i32, i32
  }
  func.func @transform_19(%arg0: i32) -> (i32, i32) {
    %c0_i32 = arith.constant 0 : i32
    %c0_i32_0 = arith.constant 0 : i32
    %c0_i32_1 = arith.constant 0 : i32
    return %c0_i32, %c0_i32_0 : i32, i32
  }
  func.func @transform_20(%arg0: i32) -> (i32, i32) {
    %c0_i32 = arith.constant 0 : i32
    %c0_i32_0 = arith.constant 0 : i32
    %c0_i32_1 = arith.constant 0 : i32
    return %c0_i32, %c0_i32_0 : i32, i32
  }
  func.func @transform_21(%arg0: i32) -> (i32, i32) {
    %c0_i32 = arith.constant 0 : i32
    %c0_i32_0 = arith.constant 0 : i32
    %c0_i32_1 = arith.constant 0 : i32
    return %c0_i32, %c0_i32_0 : i32, i32
  }
  func.func @transform_22(%arg0: i32) -> (i32, i32) {
    %c0_i32 = arith.constant 0 : i32
    %c0_i32_0 = arith.constant 0 : i32
    %c0_i32_1 = arith.constant 0 : i32
    return %c0_i32, %c0_i32_0 : i32, i32
  }
  func.func @transform_23(%arg0: i32) -> (i32, i32) {
    %c0_i32 = arith.constant 0 : i32
    %c0_i32_0 = arith.constant 0 : i32
    %c0_i32_1 = arith.constant 0 : i32
    return %c0_i32, %c0_i32_0 : i32, i32
  }
  func.func @transform_24(%arg0: i32) -> (i32, i32) {
    %c0_i32 = arith.constant 0 : i32
    %c0_i32_0 = arith.constant 0 : i32
    %c0_i32_1 = arith.constant 0 : i32
    return %c0_i32, %c0_i32_0 : i32, i32
  }
  func.func @transform_25(%arg0: i32) -> (i32, i32) {
    %c0_i32 = arith.constant 0 : i32
    %c0_i32_0 = arith.constant 0 : i32
    %c0_i32_1 = arith.constant 0 : i32
    return %c0_i32, %c0_i32_0 : i32, i32
  }
  func.func @transform_26(%arg0: i32) -> (i32, i32) {
    %c0_i32 = arith.constant 0 : i32
    %c0_i32_0 = arith.constant 0 : i32
    %c0_i32_1 = arith.constant 0 : i32
    return %c0_i32, %c0_i32_0 : i32, i32
  }
  func.func @transform_27(%arg0: i32) -> (i32, i32) {
    %c0_i32 = arith.constant 0 : i32
    %c0_i32_0 = arith.constant 0 : i32
    %c0_i32_1 = arith.constant 0 : i32
    return %c0_i32, %c0_i32_0 : i32, i32
  }
  func.func @transform_28(%arg0: i32) -> (i32, i32, i32) {
    %c0_i32 = arith.constant 0 : i32
    %c0_i32_0 = arith.constant 0 : i32
    %c0_i32_1 = arith.constant 0 : i32
    return %arg0, %c0_i32, %c0_i32_0 : i32, i32, i32
  }
  func.func @transform_29(%arg0: i32) -> (i32, i32, i32) {
    %c0_i32 = arith.constant 0 : i32
    %c0_i32_0 = arith.constant 0 : i32
    %c0_i32_1 = arith.constant 0 : i32
    return %arg0, %c0_i32, %c0_i32_0 : i32, i32, i32
  }
}

module attributes {stable_mosaic.version = 11 : i64} {
  func.func @_cross_layer_kernel(%arg0: i32, %arg1: memref<1x8x32xf32, #tpu.memory_space<vmem>>, %arg2: memref<1x6x32xf32, #tpu.memory_space<vmem>>, %arg3: memref<1x1x8xf32, #tpu.memory_space<vmem>>, %arg4: memref<1x1x6xf32, #tpu.memory_space<vmem>>, %arg5: memref<32x96xbf16, #tpu.memory_space<vmem>>, %arg6: memref<1x96xf32, #tpu.memory_space<vmem>>, %arg7: memref<32x96xbf16, #tpu.memory_space<vmem>>, %arg8: memref<1x96xf32, #tpu.memory_space<vmem>>, %arg9: memref<32x32xbf16, #tpu.memory_space<vmem>>, %arg10: memref<1x32xf32, #tpu.memory_space<vmem>>, %arg11: memref<32x32xbf16, #tpu.memory_space<vmem>>, %arg12: memref<1x32xf32, #tpu.memory_space<vmem>>, %arg13: memref<1x32xf32, #tpu.memory_space<vmem>>, %arg14: memref<1x32xf32, #tpu.memory_space<vmem>>, %arg15: memref<1x32xf32, #tpu.memory_space<vmem>>, %arg16: memref<1x32xf32, #tpu.memory_space<vmem>>, %arg17: memref<32x64xbf16, #tpu.memory_space<vmem>>, %arg18: memref<1x64xf32, #tpu.memory_space<vmem>>, %arg19: memref<64x32xbf16, #tpu.memory_space<vmem>>, %arg20: memref<1x32xf32, #tpu.memory_space<vmem>>, %arg21: memref<1x32xf32, #tpu.memory_space<vmem>>, %arg22: memref<1x32xf32, #tpu.memory_space<vmem>>, %arg23: memref<32x64xbf16, #tpu.memory_space<vmem>>, %arg24: memref<1x64xf32, #tpu.memory_space<vmem>>, %arg25: memref<64x32xbf16, #tpu.memory_space<vmem>>, %arg26: memref<1x32xf32, #tpu.memory_space<vmem>>, %arg27: memref<1x32xf32, #tpu.memory_space<vmem>>, %arg28: memref<1x32xf32, #tpu.memory_space<vmem>>, %arg29: memref<1x8x32xf32, #tpu.memory_space<vmem>>, %arg30: memref<1x6x32xf32, #tpu.memory_space<vmem>>) attributes {dimension_semantics = [#tpu.dimension_semantics<parallel>], iteration_bounds = array<i64: 2>, scalar_prefetch = 0 : i64, scratch_operands = 0 : i64, tpu.core_type = #tpu.core_type<tc>, window_params = [{transform_indices = @transform_0, window_bounds = array<i64: 1, 8, 32>}, {transform_indices = @transform_1, window_bounds = array<i64: 1, 6, 32>}, {transform_indices = @transform_2, window_bounds = array<i64: 1, 1, 8>}, {transform_indices = @transform_3, window_bounds = array<i64: 1, 1, 6>}, {pipeline_mode = #tpu.pipeline_mode<synchronous>, transform_indices = @transform_4, window_bounds = array<i64: 32, 96>}, {pipeline_mode = #tpu.pipeline_mode<synchronous>, transform_indices = @transform_5, window_bounds = array<i64: 1, 96>}, {pipeline_mode = #tpu.pipeline_mode<synchronous>, transform_indices = @transform_6, window_bounds = array<i64: 32, 96>}, {pipeline_mode = #tpu.pipeline_mode<synchronous>, transform_indices = @transform_7, window_bounds = array<i64: 1, 96>}, {pipeline_mode = #tpu.pipeline_mode<synchronous>, transform_indices = @transform_8, window_bounds = array<i64: 32, 32>}, {pipeline_mode = #tpu.pipeline_mode<synchronous>, transform_indices = @transform_9, window_bounds = array<i64: 1, 32>}, {pipeline_mode = #tpu.pipeline_mode<synchronous>, transform_indices = @transform_10, window_bounds = array<i64: 32, 32>}, {pipeline_mode = #tpu.pipeline_mode<synchronous>, transform_indices = @transform_11, window_bounds = array<i64: 1, 32>}, {pipeline_mode = #tpu.pipeline_mode<synchronous>, transform_indices = @transform_12, window_bounds = array<i64: 1, 32>}, {pipeline_mode = #tpu.pipeline_mode<synchronous>, transform_indices = @transform_13, window_bounds = array<i64: 1, 32>}, {pipeline_mode = #tpu.pipeline_mode<synchronous>, transform_indices = @transform_14, window_bounds = array<i64: 1, 32>}, {pipeline_mode = #tpu.pipeline_mode<synchronous>, transform_indices = @transform_15, window_bounds = array<i64: 1, 32>}, {pipeline_mode = #tpu.pipeline_mode<synchronous>, transform_indices = @transform_16, window_bounds = array<i64: 32, 64>}, {pipeline_mode = #tpu.pipeline_mode<synchronous>, transform_indices = @transform_17, window_bounds = array<i64: 1, 64>}, {pipeline_mode = #tpu.pipeline_mode<synchronous>, transform_indices = @transform_18, window_bounds = array<i64: 64, 32>}, {pipeline_mode = #tpu.pipeline_mode<synchronous>, transform_indices = @transform_19, window_bounds = array<i64: 1, 32>}, {pipeline_mode = #tpu.pipeline_mode<synchronous>, transform_indices = @transform_20, window_bounds = array<i64: 1, 32>}, {pipeline_mode = #tpu.pipeline_mode<synchronous>, transform_indices = @transform_21, window_bounds = array<i64: 1, 32>}, {pipeline_mode = #tpu.pipeline_mode<synchronous>, transform_indices = @transform_22, window_bounds = array<i64: 32, 64>}, {pipeline_mode = #tpu.pipeline_mode<synchronous>, transform_indices = @transform_23, window_bounds = array<i64: 1, 64>}, {pipeline_mode = #tpu.pipeline_mode<synchronous>, transform_indices = @transform_24, window_bounds = array<i64: 64, 32>}, {pipeline_mode = #tpu.pipeline_mode<synchronous>, transform_indices = @transform_25, window_bounds = array<i64: 1, 32>}, {pipeline_mode = #tpu.pipeline_mode<synchronous>, transform_indices = @transform_26, window_bounds = array<i64: 1, 32>}, {pipeline_mode = #tpu.pipeline_mode<synchronous>, transform_indices = @transform_27, window_bounds = array<i64: 1, 32>}, {transform_indices = @transform_28, window_bounds = array<i64: 1, 8, 32>}, {transform_indices = @transform_29, window_bounds = array<i64: 1, 6, 32>}]} {
    %c0 = arith.constant 0 : index
    %c0_0 = arith.constant 0 : index
    %c0_1 = arith.constant 0 : index
    %0 = vector.load %arg1[%c0, %c0_0, %c0_1] : memref<1x8x32xf32, #tpu.memory_space<vmem>>, vector<1x8x32xf32>
    %c0_2 = arith.constant 0 : index
    %c0_3 = arith.constant 0 : index
    %c0_4 = arith.constant 0 : index
    %1 = vector.load %arg2[%c0_2, %c0_3, %c0_4] : memref<1x6x32xf32, #tpu.memory_space<vmem>>, vector<1x6x32xf32>
    %c0_5 = arith.constant 0 : index
    %c0_6 = arith.constant 0 : index
    %c0_7 = arith.constant 0 : index
    %2 = vector.load %arg3[%c0_5, %c0_6, %c0_7] : memref<1x1x8xf32, #tpu.memory_space<vmem>>, vector<1x1x8xf32>
    %c0_8 = arith.constant 0 : index
    %c0_9 = arith.constant 0 : index
    %c0_10 = arith.constant 0 : index
    %3 = vector.load %arg4[%c0_8, %c0_9, %c0_10] : memref<1x1x6xf32, #tpu.memory_space<vmem>>, vector<1x1x6xf32>
    %4 = vector.shape_cast %0 : vector<1x8x32xf32> to vector<8x32xf32>
    %5 = vector.shape_cast %1 : vector<1x6x32xf32> to vector<6x32xf32>
    %c0_11 = arith.constant 0 : index
    %c0_12 = arith.constant 0 : index
    %6 = vector.load %arg5[%c0_11, %c0_12] : memref<32x96xbf16, #tpu.memory_space<vmem>>, vector<32x96xbf16>
    %7 = arith.truncf %4 : vector<8x32xf32> to vector<8x32xbf16>
    %cst = arith.constant dense<0.000000e+00> : vector<8x96xf32>
    %8 = tpu.matmul %7, %6, %cst {dimension_numbers = #tpu.dot_dimension_numbers<[1], [0], [0], [1], [0, 0, 1, 1], [], []>} : vector<8x32xbf16>, vector<32x96xbf16>, vector<8x96xf32> -> vector<8x96xf32>
    %c0_13 = arith.constant 0 : index
    %c0_14 = arith.constant 0 : index
    %9 = vector.load %arg6[%c0_13, %c0_14] : memref<1x96xf32, #tpu.memory_space<vmem>>, vector<1x96xf32>
    %10 = vector.broadcast %9 : vector<1x96xf32> to vector<8x96xf32>
    %11 = arith.addf %8, %10 : vector<8x96xf32>
    %c0_15 = arith.constant 0 : index
    %c0_16 = arith.constant 0 : index
    %12 = vector.load %arg7[%c0_15, %c0_16] : memref<32x96xbf16, #tpu.memory_space<vmem>>, vector<32x96xbf16>
    %13 = arith.truncf %5 : vector<6x32xf32> to vector<6x32xbf16>
    %cst_17 = arith.constant dense<0.000000e+00> : vector<6x96xf32>
    %14 = tpu.matmul %13, %12, %cst_17 {dimension_numbers = #tpu.dot_dimension_numbers<[1], [0], [0], [1], [0, 0, 1, 1], [], []>} : vector<6x32xbf16>, vector<32x96xbf16>, vector<6x96xf32> -> vector<6x96xf32>
    %c0_18 = arith.constant 0 : index
    %c0_19 = arith.constant 0 : index
    %15 = vector.load %arg8[%c0_18, %c0_19] : memref<1x96xf32, #tpu.memory_space<vmem>>, vector<1x96xf32>
    %16 = vector.broadcast %15 : vector<1x96xf32> to vector<6x96xf32>
    %17 = arith.addf %14, %16 : vector<6x96xf32>
    %18 = vector.extract_strided_slice %11 {offsets = [0, 0], sizes = [8, 32], strides = [1, 1]} : vector<8x96xf32> to vector<8x32xf32>
    %19 = arith.truncf %18 : vector<8x32xf32> to vector<8x32xbf16>
    %20 = vector.extract_strided_slice %11 {offsets = [0, 32], sizes = [8, 32], strides = [1, 1]} : vector<8x96xf32> to vector<8x32xf32>
    %21 = arith.truncf %20 : vector<8x32xf32> to vector<8x32xbf16>
    %22 = vector.extract_strided_slice %11 {offsets = [0, 64], sizes = [8, 32], strides = [1, 1]} : vector<8x96xf32> to vector<8x32xf32>
    %23 = arith.truncf %22 : vector<8x32xf32> to vector<8x32xbf16>
    %24 = vector.extract_strided_slice %17 {offsets = [0, 0], sizes = [6, 32], strides = [1, 1]} : vector<6x96xf32> to vector<6x32xf32>
    %25 = arith.truncf %24 : vector<6x32xf32> to vector<6x32xbf16>
    %26 = vector.extract_strided_slice %17 {offsets = [0, 32], sizes = [6, 32], strides = [1, 1]} : vector<6x96xf32> to vector<6x32xf32>
    %27 = arith.truncf %26 : vector<6x32xf32> to vector<6x32xbf16>
    %28 = vector.extract_strided_slice %17 {offsets = [0, 64], sizes = [6, 32], strides = [1, 1]} : vector<6x96xf32> to vector<6x32xf32>
    %29 = arith.truncf %28 : vector<6x32xf32> to vector<6x32xbf16>
    %30 = vector.shape_cast %2 : vector<1x1x8xf32> to vector<1x8xf32>
    %31 = vector.shape_cast %30 : vector<1x8xf32> to vector<1x8xf32>
    %32 = vector.broadcast %31 : vector<1x8xf32> to vector<6x8xf32>
    %33 = vector.shape_cast %3 : vector<1x1x6xf32> to vector<1x6xf32>
    %34 = vector.shape_cast %33 : vector<1x6xf32> to vector<1x6xf32>
    %35 = vector.broadcast %34 : vector<1x6xf32> to vector<8x6xf32>
    %36 = vector.extract_strided_slice %25 {offsets = [0, 0], sizes = [6, 8], strides = [1, 1]} : vector<6x32xbf16> to vector<6x8xbf16>
    %37 = vector.extract_strided_slice %21 {offsets = [0, 0], sizes = [8, 8], strides = [1, 1]} : vector<8x32xbf16> to vector<8x8xbf16>
    %cst_20 = arith.constant dense<0.000000e+00> : vector<6x8xf32>
    %38 = tpu.matmul %36, %37, %cst_20 {dimension_numbers = #tpu.dot_dimension_numbers<[1], [1], [0], [0], [0, 0, 1, 0], [], []>} : vector<6x8xbf16>, vector<8x8xbf16>, vector<6x8xf32> -> vector<6x8xf32>
    %39 = arith.addf %38, %32 : vector<6x8xf32>
    %cst_21 = arith.constant dense<0xFF800000> : vector<6xf32>
    %40 = vector.multi_reduction <maximumf>, %39, %cst_21 [1] : vector<6x8xf32> to vector<6xf32>
    %41 = vector.shape_cast %40 : vector<6xf32> to vector<6x1xf32>
    %42 = vector.broadcast %41 : vector<6x1xf32> to vector<6x8xf32>
    %43 = arith.subf %39, %42 : vector<6x8xf32>
    %44 = math.exp %43 : vector<6x8xf32>
    %cst_22 = arith.constant dense<0.000000e+00> : vector<6xf32>
    %45 = vector.multi_reduction <add>, %44, %cst_22 [1] : vector<6x8xf32> to vector<6xf32>
    %46 = vector.shape_cast %45 : vector<6xf32> to vector<6x1xf32>
    %47 = tpu.reciprocal %46 {approx = true} : vector<6x1xf32> -> vector<6x1xf32>
    %48 = vector.broadcast %47 : vector<6x1xf32> to vector<6x8xf32>
    %49 = arith.mulf %44, %48 : vector<6x8xf32>
    %50 = vector.extract_strided_slice %23 {offsets = [0, 0], sizes = [8, 8], strides = [1, 1]} : vector<8x32xbf16> to vector<8x8xbf16>
    %51 = arith.truncf %49 : vector<6x8xf32> to vector<6x8xbf16>
    %cst_23 = arith.constant dense<0.000000e+00> : vector<6x8xf32>
    %52 = tpu.matmul %51, %50, %cst_23 {dimension_numbers = #tpu.dot_dimension_numbers<[1], [0], [0], [1], [0, 0, 1, 1], [], []>} : vector<6x8xbf16>, vector<8x8xbf16>, vector<6x8xf32> -> vector<6x8xf32>
    %53 = vector.extract_strided_slice %19 {offsets = [0, 0], sizes = [8, 8], strides = [1, 1]} : vector<8x32xbf16> to vector<8x8xbf16>
    %54 = vector.extract_strided_slice %27 {offsets = [0, 0], sizes = [6, 8], strides = [1, 1]} : vector<6x32xbf16> to vector<6x8xbf16>
    %cst_24 = arith.constant dense<0.000000e+00> : vector<8x6xf32>
    %55 = tpu.matmul %53, %54, %cst_24 {dimension_numbers = #tpu.dot_dimension_numbers<[1], [1], [0], [0], [0, 0, 1, 0], [], []>} : vector<8x8xbf16>, vector<6x8xbf16>, vector<8x6xf32> -> vector<8x6xf32>
    %56 = arith.addf %55, %35 : vector<8x6xf32>
    %cst_25 = arith.constant dense<0xFF800000> : vector<8xf32>
    %57 = vector.multi_reduction <maximumf>, %56, %cst_25 [1] : vector<8x6xf32> to vector<8xf32>
    %58 = vector.shape_cast %57 : vector<8xf32> to vector<8x1xf32>
    %59 = vector.broadcast %58 : vector<8x1xf32> to vector<8x6xf32>
    %60 = arith.subf %56, %59 : vector<8x6xf32>
    %61 = math.exp %60 : vector<8x6xf32>
    %cst_26 = arith.constant dense<0.000000e+00> : vector<8xf32>
    %62 = vector.multi_reduction <add>, %61, %cst_26 [1] : vector<8x6xf32> to vector<8xf32>
    %63 = vector.shape_cast %62 : vector<8xf32> to vector<8x1xf32>
    %64 = tpu.reciprocal %63 {approx = true} : vector<8x1xf32> -> vector<8x1xf32>
    %65 = vector.broadcast %64 : vector<8x1xf32> to vector<8x6xf32>
    %66 = arith.mulf %61, %65 : vector<8x6xf32>
    %67 = vector.extract_strided_slice %29 {offsets = [0, 0], sizes = [6, 8], strides = [1, 1]} : vector<6x32xbf16> to vector<6x8xbf16>
    %68 = arith.truncf %66 : vector<8x6xf32> to vector<8x6xbf16>
    %cst_27 = arith.constant dense<0.000000e+00> : vector<8x8xf32>
    %69 = tpu.matmul %68, %67, %cst_27 {dimension_numbers = #tpu.dot_dimension_numbers<[1], [0], [0], [1], [0, 0, 1, 1], [], []>} : vector<8x6xbf16>, vector<6x8xbf16>, vector<8x8xf32> -> vector<8x8xf32>
    %70 = vector.extract_strided_slice %25 {offsets = [0, 8], sizes = [6, 8], strides = [1, 1]} : vector<6x32xbf16> to vector<6x8xbf16>
    %71 = vector.extract_strided_slice %21 {offsets = [0, 8], sizes = [8, 8], strides = [1, 1]} : vector<8x32xbf16> to vector<8x8xbf16>
    %cst_28 = arith.constant dense<0.000000e+00> : vector<6x8xf32>
    %72 = tpu.matmul %70, %71, %cst_28 {dimension_numbers = #tpu.dot_dimension_numbers<[1], [1], [0], [0], [0, 0, 1, 0], [], []>} : vector<6x8xbf16>, vector<8x8xbf16>, vector<6x8xf32> -> vector<6x8xf32>
    %73 = arith.addf %72, %32 : vector<6x8xf32>
    %cst_29 = arith.constant dense<0xFF800000> : vector<6xf32>
    %74 = vector.multi_reduction <maximumf>, %73, %cst_29 [1] : vector<6x8xf32> to vector<6xf32>
    %75 = vector.shape_cast %74 : vector<6xf32> to vector<6x1xf32>
    %76 = vector.broadcast %75 : vector<6x1xf32> to vector<6x8xf32>
    %77 = arith.subf %73, %76 : vector<6x8xf32>
    %78 = math.exp %77 : vector<6x8xf32>
    %cst_30 = arith.constant dense<0.000000e+00> : vector<6xf32>
    %79 = vector.multi_reduction <add>, %78, %cst_30 [1] : vector<6x8xf32> to vector<6xf32>
    %80 = vector.shape_cast %79 : vector<6xf32> to vector<6x1xf32>
    %81 = tpu.reciprocal %80 {approx = true} : vector<6x1xf32> -> vector<6x1xf32>
    %82 = vector.broadcast %81 : vector<6x1xf32> to vector<6x8xf32>
    %83 = arith.mulf %78, %82 : vector<6x8xf32>
    %84 = vector.extract_strided_slice %23 {offsets = [0, 8], sizes = [8, 8], strides = [1, 1]} : vector<8x32xbf16> to vector<8x8xbf16>
    %85 = arith.truncf %83 : vector<6x8xf32> to vector<6x8xbf16>
    %cst_31 = arith.constant dense<0.000000e+00> : vector<6x8xf32>
    %86 = tpu.matmul %85, %84, %cst_31 {dimension_numbers = #tpu.dot_dimension_numbers<[1], [0], [0], [1], [0, 0, 1, 1], [], []>} : vector<6x8xbf16>, vector<8x8xbf16>, vector<6x8xf32> -> vector<6x8xf32>
    %87 = vector.extract_strided_slice %19 {offsets = [0, 8], sizes = [8, 8], strides = [1, 1]} : vector<8x32xbf16> to vector<8x8xbf16>
    %88 = vector.extract_strided_slice %27 {offsets = [0, 8], sizes = [6, 8], strides = [1, 1]} : vector<6x32xbf16> to vector<6x8xbf16>
    %cst_32 = arith.constant dense<0.000000e+00> : vector<8x6xf32>
    %89 = tpu.matmul %87, %88, %cst_32 {dimension_numbers = #tpu.dot_dimension_numbers<[1], [1], [0], [0], [0, 0, 1, 0], [], []>} : vector<8x8xbf16>, vector<6x8xbf16>, vector<8x6xf32> -> vector<8x6xf32>
    %90 = arith.addf %89, %35 : vector<8x6xf32>
    %cst_33 = arith.constant dense<0xFF800000> : vector<8xf32>
    %91 = vector.multi_reduction <maximumf>, %90, %cst_33 [1] : vector<8x6xf32> to vector<8xf32>
    %92 = vector.shape_cast %91 : vector<8xf32> to vector<8x1xf32>
    %93 = vector.broadcast %92 : vector<8x1xf32> to vector<8x6xf32>
    %94 = arith.subf %90, %93 : vector<8x6xf32>
    %95 = math.exp %94 : vector<8x6xf32>
    %cst_34 = arith.constant dense<0.000000e+00> : vector<8xf32>
    %96 = vector.multi_reduction <add>, %95, %cst_34 [1] : vector<8x6xf32> to vector<8xf32>
    %97 = vector.shape_cast %96 : vector<8xf32> to vector<8x1xf32>
    %98 = tpu.reciprocal %97 {approx = true} : vector<8x1xf32> -> vector<8x1xf32>
    %99 = vector.broadcast %98 : vector<8x1xf32> to vector<8x6xf32>
    %100 = arith.mulf %95, %99 : vector<8x6xf32>
    %101 = vector.extract_strided_slice %29 {offsets = [0, 8], sizes = [6, 8], strides = [1, 1]} : vector<6x32xbf16> to vector<6x8xbf16>
    %102 = arith.truncf %100 : vector<8x6xf32> to vector<8x6xbf16>
    %cst_35 = arith.constant dense<0.000000e+00> : vector<8x8xf32>
    %103 = tpu.matmul %102, %101, %cst_35 {dimension_numbers = #tpu.dot_dimension_numbers<[1], [0], [0], [1], [0, 0, 1, 1], [], []>} : vector<8x6xbf16>, vector<6x8xbf16>, vector<8x8xf32> -> vector<8x8xf32>
    %104 = vector.extract_strided_slice %25 {offsets = [0, 16], sizes = [6, 8], strides = [1, 1]} : vector<6x32xbf16> to vector<6x8xbf16>
    %105 = vector.extract_strided_slice %21 {offsets = [0, 16], sizes = [8, 8], strides = [1, 1]} : vector<8x32xbf16> to vector<8x8xbf16>
    %cst_36 = arith.constant dense<0.000000e+00> : vector<6x8xf32>
    %106 = tpu.matmul %104, %105, %cst_36 {dimension_numbers = #tpu.dot_dimension_numbers<[1], [1], [0], [0], [0, 0, 1, 0], [], []>} : vector<6x8xbf16>, vector<8x8xbf16>, vector<6x8xf32> -> vector<6x8xf32>
    %107 = arith.addf %106, %32 : vector<6x8xf32>
    %cst_37 = arith.constant dense<0xFF800000> : vector<6xf32>
    %108 = vector.multi_reduction <maximumf>, %107, %cst_37 [1] : vector<6x8xf32> to vector<6xf32>
    %109 = vector.shape_cast %108 : vector<6xf32> to vector<6x1xf32>
    %110 = vector.broadcast %109 : vector<6x1xf32> to vector<6x8xf32>
    %111 = arith.subf %107, %110 : vector<6x8xf32>
    %112 = math.exp %111 : vector<6x8xf32>
    %cst_38 = arith.constant dense<0.000000e+00> : vector<6xf32>
    %113 = vector.multi_reduction <add>, %112, %cst_38 [1] : vector<6x8xf32> to vector<6xf32>
    %114 = vector.shape_cast %113 : vector<6xf32> to vector<6x1xf32>
    %115 = tpu.reciprocal %114 {approx = true} : vector<6x1xf32> -> vector<6x1xf32>
    %116 = vector.broadcast %115 : vector<6x1xf32> to vector<6x8xf32>
    %117 = arith.mulf %112, %116 : vector<6x8xf32>
    %118 = vector.extract_strided_slice %23 {offsets = [0, 16], sizes = [8, 8], strides = [1, 1]} : vector<8x32xbf16> to vector<8x8xbf16>
    %119 = arith.truncf %117 : vector<6x8xf32> to vector<6x8xbf16>
    %cst_39 = arith.constant dense<0.000000e+00> : vector<6x8xf32>
    %120 = tpu.matmul %119, %118, %cst_39 {dimension_numbers = #tpu.dot_dimension_numbers<[1], [0], [0], [1], [0, 0, 1, 1], [], []>} : vector<6x8xbf16>, vector<8x8xbf16>, vector<6x8xf32> -> vector<6x8xf32>
    %121 = vector.extract_strided_slice %19 {offsets = [0, 16], sizes = [8, 8], strides = [1, 1]} : vector<8x32xbf16> to vector<8x8xbf16>
    %122 = vector.extract_strided_slice %27 {offsets = [0, 16], sizes = [6, 8], strides = [1, 1]} : vector<6x32xbf16> to vector<6x8xbf16>
    %cst_40 = arith.constant dense<0.000000e+00> : vector<8x6xf32>
    %123 = tpu.matmul %121, %122, %cst_40 {dimension_numbers = #tpu.dot_dimension_numbers<[1], [1], [0], [0], [0, 0, 1, 0], [], []>} : vector<8x8xbf16>, vector<6x8xbf16>, vector<8x6xf32> -> vector<8x6xf32>
    %124 = arith.addf %123, %35 : vector<8x6xf32>
    %cst_41 = arith.constant dense<0xFF800000> : vector<8xf32>
    %125 = vector.multi_reduction <maximumf>, %124, %cst_41 [1] : vector<8x6xf32> to vector<8xf32>
    %126 = vector.shape_cast %125 : vector<8xf32> to vector<8x1xf32>
    %127 = vector.broadcast %126 : vector<8x1xf32> to vector<8x6xf32>
    %128 = arith.subf %124, %127 : vector<8x6xf32>
    %129 = math.exp %128 : vector<8x6xf32>
    %cst_42 = arith.constant dense<0.000000e+00> : vector<8xf32>
    %130 = vector.multi_reduction <add>, %129, %cst_42 [1] : vector<8x6xf32> to vector<8xf32>
    %131 = vector.shape_cast %130 : vector<8xf32> to vector<8x1xf32>
    %132 = tpu.reciprocal %131 {approx = true} : vector<8x1xf32> -> vector<8x1xf32>
    %133 = vector.broadcast %132 : vector<8x1xf32> to vector<8x6xf32>
    %134 = arith.mulf %129, %133 : vector<8x6xf32>
    %135 = vector.extract_strided_slice %29 {offsets = [0, 16], sizes = [6, 8], strides = [1, 1]} : vector<6x32xbf16> to vector<6x8xbf16>
    %136 = arith.truncf %134 : vector<8x6xf32> to vector<8x6xbf16>
    %cst_43 = arith.constant dense<0.000000e+00> : vector<8x8xf32>
    %137 = tpu.matmul %136, %135, %cst_43 {dimension_numbers = #tpu.dot_dimension_numbers<[1], [0], [0], [1], [0, 0, 1, 1], [], []>} : vector<8x6xbf16>, vector<6x8xbf16>, vector<8x8xf32> -> vector<8x8xf32>
    %138 = vector.extract_strided_slice %25 {offsets = [0, 24], sizes = [6, 8], strides = [1, 1]} : vector<6x32xbf16> to vector<6x8xbf16>
    %139 = vector.extract_strided_slice %21 {offsets = [0, 24], sizes = [8, 8], strides = [1, 1]} : vector<8x32xbf16> to vector<8x8xbf16>
    %cst_44 = arith.constant dense<0.000000e+00> : vector<6x8xf32>
    %140 = tpu.matmul %138, %139, %cst_44 {dimension_numbers = #tpu.dot_dimension_numbers<[1], [1], [0], [0], [0, 0, 1, 0], [], []>} : vector<6x8xbf16>, vector<8x8xbf16>, vector<6x8xf32> -> vector<6x8xf32>
    %141 = arith.addf %140, %32 : vector<6x8xf32>
    %cst_45 = arith.constant dense<0xFF800000> : vector<6xf32>
    %142 = vector.multi_reduction <maximumf>, %141, %cst_45 [1] : vector<6x8xf32> to vector<6xf32>
    %143 = vector.shape_cast %142 : vector<6xf32> to vector<6x1xf32>
    %144 = vector.broadcast %143 : vector<6x1xf32> to vector<6x8xf32>
    %145 = arith.subf %141, %144 : vector<6x8xf32>
    %146 = math.exp %145 : vector<6x8xf32>
    %cst_46 = arith.constant dense<0.000000e+00> : vector<6xf32>
    %147 = vector.multi_reduction <add>, %146, %cst_46 [1] : vector<6x8xf32> to vector<6xf32>
    %148 = vector.shape_cast %147 : vector<6xf32> to vector<6x1xf32>
    %149 = tpu.reciprocal %148 {approx = true} : vector<6x1xf32> -> vector<6x1xf32>
    %150 = vector.broadcast %149 : vector<6x1xf32> to vector<6x8xf32>
    %151 = arith.mulf %146, %150 : vector<6x8xf32>
    %152 = vector.extract_strided_slice %23 {offsets = [0, 24], sizes = [8, 8], strides = [1, 1]} : vector<8x32xbf16> to vector<8x8xbf16>
    %153 = arith.truncf %151 : vector<6x8xf32> to vector<6x8xbf16>
    %cst_47 = arith.constant dense<0.000000e+00> : vector<6x8xf32>
    %154 = tpu.matmul %153, %152, %cst_47 {dimension_numbers = #tpu.dot_dimension_numbers<[1], [0], [0], [1], [0, 0, 1, 1], [], []>} : vector<6x8xbf16>, vector<8x8xbf16>, vector<6x8xf32> -> vector<6x8xf32>
    %155 = vector.extract_strided_slice %19 {offsets = [0, 24], sizes = [8, 8], strides = [1, 1]} : vector<8x32xbf16> to vector<8x8xbf16>
    %156 = vector.extract_strided_slice %27 {offsets = [0, 24], sizes = [6, 8], strides = [1, 1]} : vector<6x32xbf16> to vector<6x8xbf16>
    %cst_48 = arith.constant dense<0.000000e+00> : vector<8x6xf32>
    %157 = tpu.matmul %155, %156, %cst_48 {dimension_numbers = #tpu.dot_dimension_numbers<[1], [1], [0], [0], [0, 0, 1, 0], [], []>} : vector<8x8xbf16>, vector<6x8xbf16>, vector<8x6xf32> -> vector<8x6xf32>
    %158 = arith.addf %157, %35 : vector<8x6xf32>
    %cst_49 = arith.constant dense<0xFF800000> : vector<8xf32>
    %159 = vector.multi_reduction <maximumf>, %158, %cst_49 [1] : vector<8x6xf32> to vector<8xf32>
    %160 = vector.shape_cast %159 : vector<8xf32> to vector<8x1xf32>
    %161 = vector.broadcast %160 : vector<8x1xf32> to vector<8x6xf32>
    %162 = arith.subf %158, %161 : vector<8x6xf32>
    %163 = math.exp %162 : vector<8x6xf32>
    %cst_50 = arith.constant dense<0.000000e+00> : vector<8xf32>
    %164 = vector.multi_reduction <add>, %163, %cst_50 [1] : vector<8x6xf32> to vector<8xf32>
    %165 = vector.shape_cast %164 : vector<8xf32> to vector<8x1xf32>
    %166 = tpu.reciprocal %165 {approx = true} : vector<8x1xf32> -> vector<8x1xf32>
    %167 = vector.broadcast %166 : vector<8x1xf32> to vector<8x6xf32>
    %168 = arith.mulf %163, %167 : vector<8x6xf32>
    %169 = vector.extract_strided_slice %29 {offsets = [0, 24], sizes = [6, 8], strides = [1, 1]} : vector<6x32xbf16> to vector<6x8xbf16>
    %170 = arith.truncf %168 : vector<8x6xf32> to vector<8x6xbf16>
    %cst_51 = arith.constant dense<0.000000e+00> : vector<8x8xf32>
    %171 = tpu.matmul %170, %169, %cst_51 {dimension_numbers = #tpu.dot_dimension_numbers<[1], [0], [0], [1], [0, 0, 1, 1], [], []>} : vector<8x6xbf16>, vector<6x8xbf16>, vector<8x8xf32> -> vector<8x8xf32>
    %172 = tpu.concatenate %52, %86, %120, %154 in 1 : vector<6x8xf32>, vector<6x8xf32>, vector<6x8xf32>, vector<6x8xf32> -> vector<6x32xf32>
    %173 = tpu.concatenate %69, %103, %137, %171 in 1 : vector<8x8xf32>, vector<8x8xf32>, vector<8x8xf32>, vector<8x8xf32> -> vector<8x32xf32>
    %c0_52 = arith.constant 0 : index
    %c0_53 = arith.constant 0 : index
    %174 = vector.load %arg9[%c0_52, %c0_53] : memref<32x32xbf16, #tpu.memory_space<vmem>>, vector<32x32xbf16>
    %175 = arith.truncf %173 : vector<8x32xf32> to vector<8x32xbf16>
    %cst_54 = arith.constant dense<0.000000e+00> : vector<8x32xf32>
    %176 = tpu.matmul %175, %174, %cst_54 {dimension_numbers = #tpu.dot_dimension_numbers<[1], [0], [0], [1], [0, 0, 1, 1], [], []>} : vector<8x32xbf16>, vector<32x32xbf16>, vector<8x32xf32> -> vector<8x32xf32>
    %c0_55 = arith.constant 0 : index
    %c0_56 = arith.constant 0 : index
    %177 = vector.load %arg10[%c0_55, %c0_56] : memref<1x32xf32, #tpu.memory_space<vmem>>, vector<1x32xf32>
    %178 = vector.broadcast %177 : vector<1x32xf32> to vector<8x32xf32>
    %179 = arith.addf %176, %178 : vector<8x32xf32>
    %180 = arith.addf %179, %4 : vector<8x32xf32>
    %c0_57 = arith.constant 0 : index
    %c0_58 = arith.constant 0 : index
    %181 = vector.load %arg13[%c0_57, %c0_58] : memref<1x32xf32, #tpu.memory_space<vmem>>, vector<1x32xf32>
    %c0_59 = arith.constant 0 : index
    %c0_60 = arith.constant 0 : index
    %182 = vector.load %arg14[%c0_59, %c0_60] : memref<1x32xf32, #tpu.memory_space<vmem>>, vector<1x32xf32>
    %cst_61 = arith.constant dense<0.000000e+00> : vector<8xf32>
    %183 = vector.multi_reduction <add>, %180, %cst_61 [1] : vector<8x32xf32> to vector<8xf32>
    %184 = vector.shape_cast %183 : vector<8xf32> to vector<8x1xf32>
    %cst_62 = arith.constant 3.200000e+01 : f32
    %185 = vector.broadcast %cst_62 : f32 to vector<8x1xf32>
    %186 = arith.divf %184, %185 : vector<8x1xf32>
    %187 = vector.broadcast %186 : vector<8x1xf32> to vector<8x32xf32>
    %188 = arith.subf %180, %187 : vector<8x32xf32>
    %189 = arith.mulf %188, %188 : vector<8x32xf32>
    %cst_63 = arith.constant dense<0.000000e+00> : vector<8xf32>
    %190 = vector.multi_reduction <add>, %189, %cst_63 [1] : vector<8x32xf32> to vector<8xf32>
    %191 = vector.shape_cast %190 : vector<8xf32> to vector<8x1xf32>
    %cst_64 = arith.constant 3.200000e+01 : f32
    %192 = vector.broadcast %cst_64 : f32 to vector<8x1xf32>
    %193 = arith.divf %191, %192 : vector<8x1xf32>
    %cst_65 = arith.constant 9.99999996E-13 : f32
    %194 = vector.broadcast %cst_65 : f32 to vector<8x1xf32>
    %195 = arith.addf %193, %194 : vector<8x1xf32>
    %196 = math.rsqrt %195 : vector<8x1xf32>
    %197 = vector.broadcast %196 : vector<8x1xf32> to vector<8x32xf32>
    %198 = arith.mulf %188, %197 : vector<8x32xf32>
    %199 = vector.broadcast %181 : vector<1x32xf32> to vector<8x32xf32>
    %200 = arith.mulf %198, %199 : vector<8x32xf32>
    %201 = vector.broadcast %182 : vector<1x32xf32> to vector<8x32xf32>
    %202 = arith.addf %200, %201 : vector<8x32xf32>
    %c0_66 = arith.constant 0 : index
    %c0_67 = arith.constant 0 : index
    %203 = vector.load %arg11[%c0_66, %c0_67] : memref<32x32xbf16, #tpu.memory_space<vmem>>, vector<32x32xbf16>
    %204 = arith.truncf %172 : vector<6x32xf32> to vector<6x32xbf16>
    %cst_68 = arith.constant dense<0.000000e+00> : vector<6x32xf32>
    %205 = tpu.matmul %204, %203, %cst_68 {dimension_numbers = #tpu.dot_dimension_numbers<[1], [0], [0], [1], [0, 0, 1, 1], [], []>} : vector<6x32xbf16>, vector<32x32xbf16>, vector<6x32xf32> -> vector<6x32xf32>
    %c0_69 = arith.constant 0 : index
    %c0_70 = arith.constant 0 : index
    %206 = vector.load %arg12[%c0_69, %c0_70] : memref<1x32xf32, #tpu.memory_space<vmem>>, vector<1x32xf32>
    %207 = vector.broadcast %206 : vector<1x32xf32> to vector<6x32xf32>
    %208 = arith.addf %205, %207 : vector<6x32xf32>
    %209 = arith.addf %208, %5 : vector<6x32xf32>
    %c0_71 = arith.constant 0 : index
    %c0_72 = arith.constant 0 : index
    %210 = vector.load %arg15[%c0_71, %c0_72] : memref<1x32xf32, #tpu.memory_space<vmem>>, vector<1x32xf32>
    %c0_73 = arith.constant 0 : index
    %c0_74 = arith.constant 0 : index
    %211 = vector.load %arg16[%c0_73, %c0_74] : memref<1x32xf32, #tpu.memory_space<vmem>>, vector<1x32xf32>
    %cst_75 = arith.constant dense<0.000000e+00> : vector<6xf32>
    %212 = vector.multi_reduction <add>, %209, %cst_75 [1] : vector<6x32xf32> to vector<6xf32>
    %213 = vector.shape_cast %212 : vector<6xf32> to vector<6x1xf32>
    %cst_76 = arith.constant 3.200000e+01 : f32
    %214 = vector.broadcast %cst_76 : f32 to vector<6x1xf32>
    %215 = arith.divf %213, %214 : vector<6x1xf32>
    %216 = vector.broadcast %215 : vector<6x1xf32> to vector<6x32xf32>
    %217 = arith.subf %209, %216 : vector<6x32xf32>
    %218 = arith.mulf %217, %217 : vector<6x32xf32>
    %cst_77 = arith.constant dense<0.000000e+00> : vector<6xf32>
    %219 = vector.multi_reduction <add>, %218, %cst_77 [1] : vector<6x32xf32> to vector<6xf32>
    %220 = vector.shape_cast %219 : vector<6xf32> to vector<6x1xf32>
    %cst_78 = arith.constant 3.200000e+01 : f32
    %221 = vector.broadcast %cst_78 : f32 to vector<6x1xf32>
    %222 = arith.divf %220, %221 : vector<6x1xf32>
    %cst_79 = arith.constant 9.99999996E-13 : f32
    %223 = vector.broadcast %cst_79 : f32 to vector<6x1xf32>
    %224 = arith.addf %222, %223 : vector<6x1xf32>
    %225 = math.rsqrt %224 : vector<6x1xf32>
    %226 = vector.broadcast %225 : vector<6x1xf32> to vector<6x32xf32>
    %227 = arith.mulf %217, %226 : vector<6x32xf32>
    %228 = vector.broadcast %210 : vector<1x32xf32> to vector<6x32xf32>
    %229 = arith.mulf %227, %228 : vector<6x32xf32>
    %230 = vector.broadcast %211 : vector<1x32xf32> to vector<6x32xf32>
    %231 = arith.addf %229, %230 : vector<6x32xf32>
    %c0_80 = arith.constant 0 : index
    %c0_81 = arith.constant 0 : index
    %232 = vector.load %arg17[%c0_80, %c0_81] : memref<32x64xbf16, #tpu.memory_space<vmem>>, vector<32x64xbf16>
    %233 = arith.truncf %202 : vector<8x32xf32> to vector<8x32xbf16>
    %cst_82 = arith.constant dense<0.000000e+00> : vector<8x64xf32>
    %234 = tpu.matmul %233, %232, %cst_82 {dimension_numbers = #tpu.dot_dimension_numbers<[1], [0], [0], [1], [0, 0, 1, 1], [], []>} : vector<8x32xbf16>, vector<32x64xbf16>, vector<8x64xf32> -> vector<8x64xf32>
    %c0_83 = arith.constant 0 : index
    %c0_84 = arith.constant 0 : index
    %235 = vector.load %arg18[%c0_83, %c0_84] : memref<1x64xf32, #tpu.memory_space<vmem>>, vector<1x64xf32>
    %236 = vector.broadcast %235 : vector<1x64xf32> to vector<8x64xf32>
    %237 = arith.addf %234, %236 : vector<8x64xf32>
    %cst_85 = arith.constant 5.000000e-01 : f32
    %238 = vector.broadcast %cst_85 : f32 to vector<8x64xf32>
    %239 = arith.mulf %238, %237 : vector<8x64xf32>
    %cst_86 = arith.constant 4.471500e-02 : f32
    %240 = vector.broadcast %cst_86 : f32 to vector<8x64xf32>
    %241 = arith.mulf %240, %237 : vector<8x64xf32>
    %242 = arith.mulf %241, %237 : vector<8x64xf32>
    %243 = arith.mulf %242, %237 : vector<8x64xf32>
    %244 = arith.addf %237, %243 : vector<8x64xf32>
    %cst_87 = arith.constant 0.797884583 : f32
    %245 = vector.broadcast %cst_87 : f32 to vector<8x64xf32>
    %246 = arith.mulf %245, %244 : vector<8x64xf32>
    %247 = math.tanh %246 : vector<8x64xf32>
    %cst_88 = arith.constant 1.000000e+00 : f32
    %248 = vector.broadcast %cst_88 : f32 to vector<8x64xf32>
    %249 = arith.addf %248, %247 : vector<8x64xf32>
    %250 = arith.mulf %239, %249 : vector<8x64xf32>
    %c0_89 = arith.constant 0 : index
    %c0_90 = arith.constant 0 : index
    %251 = vector.load %arg19[%c0_89, %c0_90] : memref<64x32xbf16, #tpu.memory_space<vmem>>, vector<64x32xbf16>
    %252 = arith.truncf %250 : vector<8x64xf32> to vector<8x64xbf16>
    %cst_91 = arith.constant dense<0.000000e+00> : vector<8x32xf32>
    %253 = tpu.matmul %252, %251, %cst_91 {dimension_numbers = #tpu.dot_dimension_numbers<[1], [0], [0], [1], [0, 0, 1, 1], [], []>} : vector<8x64xbf16>, vector<64x32xbf16>, vector<8x32xf32> -> vector<8x32xf32>
    %c0_92 = arith.constant 0 : index
    %c0_93 = arith.constant 0 : index
    %254 = vector.load %arg20[%c0_92, %c0_93] : memref<1x32xf32, #tpu.memory_space<vmem>>, vector<1x32xf32>
    %255 = vector.broadcast %254 : vector<1x32xf32> to vector<8x32xf32>
    %256 = arith.addf %253, %255 : vector<8x32xf32>
    %257 = arith.addf %256, %202 : vector<8x32xf32>
    %c0_94 = arith.constant 0 : index
    %c0_95 = arith.constant 0 : index
    %258 = vector.load %arg21[%c0_94, %c0_95] : memref<1x32xf32, #tpu.memory_space<vmem>>, vector<1x32xf32>
    %c0_96 = arith.constant 0 : index
    %c0_97 = arith.constant 0 : index
    %259 = vector.load %arg22[%c0_96, %c0_97] : memref<1x32xf32, #tpu.memory_space<vmem>>, vector<1x32xf32>
    %cst_98 = arith.constant dense<0.000000e+00> : vector<8xf32>
    %260 = vector.multi_reduction <add>, %257, %cst_98 [1] : vector<8x32xf32> to vector<8xf32>
    %261 = vector.shape_cast %260 : vector<8xf32> to vector<8x1xf32>
    %cst_99 = arith.constant 3.200000e+01 : f32
    %262 = vector.broadcast %cst_99 : f32 to vector<8x1xf32>
    %263 = arith.divf %261, %262 : vector<8x1xf32>
    %264 = vector.broadcast %263 : vector<8x1xf32> to vector<8x32xf32>
    %265 = arith.subf %257, %264 : vector<8x32xf32>
    %266 = arith.mulf %265, %265 : vector<8x32xf32>
    %cst_100 = arith.constant dense<0.000000e+00> : vector<8xf32>
    %267 = vector.multi_reduction <add>, %266, %cst_100 [1] : vector<8x32xf32> to vector<8xf32>
    %268 = vector.shape_cast %267 : vector<8xf32> to vector<8x1xf32>
    %cst_101 = arith.constant 3.200000e+01 : f32
    %269 = vector.broadcast %cst_101 : f32 to vector<8x1xf32>
    %270 = arith.divf %268, %269 : vector<8x1xf32>
    %cst_102 = arith.constant 9.99999996E-13 : f32
    %271 = vector.broadcast %cst_102 : f32 to vector<8x1xf32>
    %272 = arith.addf %270, %271 : vector<8x1xf32>
    %273 = math.rsqrt %272 : vector<8x1xf32>
    %274 = vector.broadcast %273 : vector<8x1xf32> to vector<8x32xf32>
    %275 = arith.mulf %265, %274 : vector<8x32xf32>
    %276 = vector.broadcast %258 : vector<1x32xf32> to vector<8x32xf32>
    %277 = arith.mulf %275, %276 : vector<8x32xf32>
    %278 = vector.broadcast %259 : vector<1x32xf32> to vector<8x32xf32>
    %279 = arith.addf %277, %278 : vector<8x32xf32>
    %280 = vector.shape_cast %279 : vector<8x32xf32> to vector<1x8x32xf32>
    %c0_103 = arith.constant 0 : index
    %c0_104 = arith.constant 0 : index
    %c0_105 = arith.constant 0 : index
    %281 = vector.load %arg29[%c0_103, %c0_104, %c0_105] : memref<1x8x32xf32, #tpu.memory_space<vmem>>, vector<1x8x32xf32>
    tpu.vector_store %arg29[%c0_103, %c0_104, %c0_105], %280 {strides = array<i32>} : memref<1x8x32xf32, #tpu.memory_space<vmem>>, vector<1x8x32xf32>,
    %c0_106 = arith.constant 0 : index
    %c0_107 = arith.constant 0 : index
    %282 = vector.load %arg23[%c0_106, %c0_107] : memref<32x64xbf16, #tpu.memory_space<vmem>>, vector<32x64xbf16>
    %283 = arith.truncf %231 : vector<6x32xf32> to vector<6x32xbf16>
    %cst_108 = arith.constant dense<0.000000e+00> : vector<6x64xf32>
    %284 = tpu.matmul %283, %282, %cst_108 {dimension_numbers = #tpu.dot_dimension_numbers<[1], [0], [0], [1], [0, 0, 1, 1], [], []>} : vector<6x32xbf16>, vector<32x64xbf16>, vector<6x64xf32> -> vector<6x64xf32>
    %c0_109 = arith.constant 0 : index
    %c0_110 = arith.constant 0 : index
    %285 = vector.load %arg24[%c0_109, %c0_110] : memref<1x64xf32, #tpu.memory_space<vmem>>, vector<1x64xf32>
    %286 = vector.broadcast %285 : vector<1x64xf32> to vector<6x64xf32>
    %287 = arith.addf %284, %286 : vector<6x64xf32>
    %cst_111 = arith.constant 5.000000e-01 : f32
    %288 = vector.broadcast %cst_111 : f32 to vector<6x64xf32>
    %289 = arith.mulf %288, %287 : vector<6x64xf32>
    %cst_112 = arith.constant 4.471500e-02 : f32
    %290 = vector.broadcast %cst_112 : f32 to vector<6x64xf32>
    %291 = arith.mulf %290, %287 : vector<6x64xf32>
    %292 = arith.mulf %291, %287 : vector<6x64xf32>
    %293 = arith.mulf %292, %287 : vector<6x64xf32>
    %294 = arith.addf %287, %293 : vector<6x64xf32>
    %cst_113 = arith.constant 0.797884583 : f32
    %295 = vector.broadcast %cst_113 : f32 to vector<6x64xf32>
    %296 = arith.mulf %295, %294 : vector<6x64xf32>
    %297 = math.tanh %296 : vector<6x64xf32>
    %cst_114 = arith.constant 1.000000e+00 : f32
    %298 = vector.broadcast %cst_114 : f32 to vector<6x64xf32>
    %299 = arith.addf %298, %297 : vector<6x64xf32>
    %300 = arith.mulf %289, %299 : vector<6x64xf32>
    %c0_115 = arith.constant 0 : index
    %c0_116 = arith.constant 0 : index
    %301 = vector.load %arg25[%c0_115, %c0_116] : memref<64x32xbf16, #tpu.memory_space<vmem>>, vector<64x32xbf16>
    %302 = arith.truncf %300 : vector<6x64xf32> to vector<6x64xbf16>
    %cst_117 = arith.constant dense<0.000000e+00> : vector<6x32xf32>
    %303 = tpu.matmul %302, %301, %cst_117 {dimension_numbers = #tpu.dot_dimension_numbers<[1], [0], [0], [1], [0, 0, 1, 1], [], []>} : vector<6x64xbf16>, vector<64x32xbf16>, vector<6x32xf32> -> vector<6x32xf32>
    %c0_118 = arith.constant 0 : index
    %c0_119 = arith.constant 0 : index
    %304 = vector.load %arg26[%c0_118, %c0_119] : memref<1x32xf32, #tpu.memory_space<vmem>>, vector<1x32xf32>
    %305 = vector.broadcast %304 : vector<1x32xf32> to vector<6x32xf32>
    %306 = arith.addf %303, %305 : vector<6x32xf32>
    %307 = arith.addf %306, %231 : vector<6x32xf32>
    %c0_120 = arith.constant 0 : index
    %c0_121 = arith.constant 0 : index
    %308 = vector.load %arg27[%c0_120, %c0_121] : memref<1x32xf32, #tpu.memory_space<vmem>>, vector<1x32xf32>
    %c0_122 = arith.constant 0 : index
    %c0_123 = arith.constant 0 : index
    %309 = vector.load %arg28[%c0_122, %c0_123] : memref<1x32xf32, #tpu.memory_space<vmem>>, vector<1x32xf32>
    %cst_124 = arith.constant dense<0.000000e+00> : vector<6xf32>
    %310 = vector.multi_reduction <add>, %307, %cst_124 [1] : vector<6x32xf32> to vector<6xf32>
    %311 = vector.shape_cast %310 : vector<6xf32> to vector<6x1xf32>
    %cst_125 = arith.constant 3.200000e+01 : f32
    %312 = vector.broadcast %cst_125 : f32 to vector<6x1xf32>
    %313 = arith.divf %311, %312 : vector<6x1xf32>
    %314 = vector.broadcast %313 : vector<6x1xf32> to vector<6x32xf32>
    %315 = arith.subf %307, %314 : vector<6x32xf32>
    %316 = arith.mulf %315, %315 : vector<6x32xf32>
    %cst_126 = arith.constant dense<0.000000e+00> : vector<6xf32>
    %317 = vector.multi_reduction <add>, %316, %cst_126 [1] : vector<6x32xf32> to vector<6xf32>
    %318 = vector.shape_cast %317 : vector<6xf32> to vector<6x1xf32>
    %cst_127 = arith.constant 3.200000e+01 : f32
    %319 = vector.broadcast %cst_127 : f32 to vector<6x1xf32>
    %320 = arith.divf %318, %319 : vector<6x1xf32>
    %cst_128 = arith.constant 9.99999996E-13 : f32
    %321 = vector.broadcast %cst_128 : f32 to vector<6x1xf32>
    %322 = arith.addf %320, %321 : vector<6x1xf32>
    %323 = math.rsqrt %322 : vector<6x1xf32>
    %324 = vector.broadcast %323 : vector<6x1xf32> to vector<6x32xf32>
    %325 = arith.mulf %315, %324 : vector<6x32xf32>
    %326 = vector.broadcast %308 : vector<1x32xf32> to vector<6x32xf32>
    %327 = arith.mulf %325, %326 : vector<6x32xf32>
    %328 = vector.broadcast %309 : vector<1x32xf32> to vector<6x32xf32>
    %329 = arith.addf %327, %328 : vector<6x32xf32>
    %330 = vector.shape_cast %329 : vector<6x32xf32> to vector<1x6x32xf32>
    %c0_129 = arith.constant 0 : index
    %c0_130 = arith.constant 0 : index
    %c0_131 = arith.constant 0 : index
    %331 = vector.load %arg30[%c0_129, %c0_130, %c0_131] : memref<1x6x32xf32, #tpu.memory_space<vmem>>, vector<1x6x32xf32>
    tpu.vector_store %arg30[%c0_129, %c0_130, %c0_131], %330 {strides = array<i32>} : memref<1x6x32xf32, #tpu.memory_space<vmem>>, vector<1x6x32xf32>,
    return
  }
  func.func @transform_0(%arg0: i32) -> (i32, i32, i32) {
    %c0_i32 = arith.constant 0 : i32
    %c0_i32_0 = arith.constant 0 : i32
    %c0_i32_1 = arith.constant 0 : i32
    return %arg0, %c0_i32, %c0_i32_0 : i32, i32, i32
  }
  func.func @transform_1(%arg0: i32) -> (i32, i32, i32) {
    %c0_i32 = arith.constant 0 : i32
    %c0_i32_0 = arith.constant 0 : i32
    %c0_i32_1 = arith.constant 0 : i32
    return %arg0, %c0_i32, %c0_i32_0 : i32, i32, i32
  }
  func.func @transform_2(%arg0: i32) -> (i32, i32, i32) {
    %c0_i32 = arith.constant 0 : i32
    %c0_i32_0 = arith.constant 0 : i32
    %c0_i32_1 = arith.constant 0 : i32
    return %arg0, %c0_i32, %c0_i32_0 : i32, i32, i32
  }
  func.func @transform_3(%arg0: i32) -> (i32, i32, i32) {
    %c0_i32 = arith.constant 0 : i32
    %c0_i32_0 = arith.constant 0 : i32
    %c0_i32_1 = arith.constant 0 : i32
    return %arg0, %c0_i32, %c0_i32_0 : i32, i32, i32
  }
  func.func @transform_4(%arg0: i32) -> (i32, i32) {
    %c0_i32 = arith.constant 0 : i32
    %c0_i32_0 = arith.constant 0 : i32
    %c0_i32_1 = arith.constant 0 : i32
    return %c0_i32, %c0_i32_0 : i32, i32
  }
  func.func @transform_5(%arg0: i32) -> (i32, i32) {
    %c0_i32 = arith.constant 0 : i32
    %c0_i32_0 = arith.constant 0 : i32
    %c0_i32_1 = arith.constant 0 : i32
    return %c0_i32, %c0_i32_0 : i32, i32
  }
  func.func @transform_6(%arg0: i32) -> (i32, i32) {
    %c0_i32 = arith.constant 0 : i32
    %c0_i32_0 = arith.constant 0 : i32
    %c0_i32_1 = arith.constant 0 : i32
    return %c0_i32, %c0_i32_0 : i32, i32
  }
  func.func @transform_7(%arg0: i32) -> (i32, i32) {
    %c0_i32 = arith.constant 0 : i32
    %c0_i32_0 = arith.constant 0 : i32
    %c0_i32_1 = arith.constant 0 : i32
    return %c0_i32, %c0_i32_0 : i32, i32
  }
  func.func @transform_8(%arg0: i32) -> (i32, i32) {
    %c0_i32 = arith.constant 0 : i32
    %c0_i32_0 = arith.constant 0 : i32
    %c0_i32_1 = arith.constant 0 : i32
    return %c0_i32, %c0_i32_0 : i32, i32
  }
  func.func @transform_9(%arg0: i32) -> (i32, i32) {
    %c0_i32 = arith.constant 0 : i32
    %c0_i32_0 = arith.constant 0 : i32
    %c0_i32_1 = arith.constant 0 : i32
    return %c0_i32, %c0_i32_0 : i32, i32
  }
  func.func @transform_10(%arg0: i32) -> (i32, i32) {
    %c0_i32 = arith.constant 0 : i32
    %c0_i32_0 = arith.constant 0 : i32
    %c0_i32_1 = arith.constant 0 : i32
    return %c0_i32, %c0_i32_0 : i32, i32
  }
  func.func @transform_11(%arg0: i32) -> (i32, i32) {
    %c0_i32 = arith.constant 0 : i32
    %c0_i32_0 = arith.constant 0 : i32
    %c0_i32_1 = arith.constant 0 : i32
    return %c0_i32, %c0_i32_0 : i32, i32
  }
  func.func @transform_12(%arg0: i32) -> (i32, i32) {
    %c0_i32 = arith.constant 0 : i32
    %c0_i32_0 = arith.constant 0 : i32
    %c0_i32_1 = arith.constant 0 : i32
    return %c0_i32, %c0_i32_0 : i32, i32
  }
  func.func @transform_13(%arg0: i32) -> (i32, i32) {
    %c0_i32 = arith.constant 0 : i32
    %c0_i32_0 = arith.constant 0 : i32
    %c0_i32_1 = arith.constant 0 : i32
    return %c0_i32, %c0_i32_0 : i32, i32
  }
  func.func @transform_14(%arg0: i32) -> (i32, i32) {
    %c0_i32 = arith.constant 0 : i32
    %c0_i32_0 = arith.constant 0 : i32
    %c0_i32_1 = arith.constant 0 : i32
    return %c0_i32, %c0_i32_0 : i32, i32
  }
  func.func @transform_15(%arg0: i32) -> (i32, i32) {
    %c0_i32 = arith.constant 0 : i32
    %c0_i32_0 = arith.constant 0 : i32
    %c0_i32_1 = arith.constant 0 : i32
    return %c0_i32, %c0_i32_0 : i32, i32
  }
  func.func @transform_16(%arg0: i32) -> (i32, i32) {
    %c0_i32 = arith.constant 0 : i32
    %c0_i32_0 = arith.constant 0 : i32
    %c0_i32_1 = arith.constant 0 : i32
    return %c0_i32, %c0_i32_0 : i32, i32
  }
  func.func @transform_17(%arg0: i32) -> (i32, i32) {
    %c0_i32 = arith.constant 0 : i32
    %c0_i32_0 = arith.constant 0 : i32
    %c0_i32_1 = arith.constant 0 : i32
    return %c0_i32, %c0_i32_0 : i32, i32
  }
  func.func @transform_18(%arg0: i32) -> (i32, i32) {
    %c0_i32 = arith.constant 0 : i32
    %c0_i32_0 = arith.constant 0 : i32
    %c0_i32_1 = arith.constant 0 : i32
    return %c0_i32, %c0_i32_0 : i32, i32
  }
  func.func @transform_19(%arg0: i32) -> (i32, i32) {
    %c0_i32 = arith.constant 0 : i32
    %c0_i32_0 = arith.constant 0 : i32
    %c0_i32_1 = arith.constant 0 : i32
    return %c0_i32, %c0_i32_0 : i32, i32
  }
  func.func @transform_20(%arg0: i32) -> (i32, i32) {
    %c0_i32 = arith.constant 0 : i32
    %c0_i32_0 = arith.constant 0 : i32
    %c0_i32_1 = arith.constant 0 : i32
    return %c0_i32, %c0_i32_0 : i32, i32
  }
  func.func @transform_21(%arg0: i32) -> (i32, i32) {
    %c0_i32 = arith.constant 0 : i32
    %c0_i32_0 = arith.constant 0 : i32
    %c0_i32_1 = arith.constant 0 : i32
    return %c0_i32, %c0_i32_0 : i32, i32
  }
  func.func @transform_22(%arg0: i32) -> (i32, i32) {
    %c0_i32 = arith.constant 0 : i32
    %c0_i32_0 = arith.constant 0 : i32
    %c0_i32_1 = arith.constant 0 : i32
    return %c0_i32, %c0_i32_0 : i32, i32
  }
  func.func @transform_23(%arg0: i32) -> (i32, i32) {
    %c0_i32 = arith.constant 0 : i32
    %c0_i32_0 = arith.constant 0 : i32
    %c0_i32_1 = arith.constant 0 : i32
    return %c0_i32, %c0_i32_0 : i32, i32
  }
  func.func @transform_24(%arg0: i32) -> (i32, i32) {
    %c0_i32 = arith.constant 0 : i32
    %c0_i32_0 = arith.constant 0 : i32
    %c0_i32_1 = arith.constant 0 : i32
    return %c0_i32, %c0_i32_0 : i32, i32
  }
  func.func @transform_25(%arg0: i32) -> (i32, i32) {
    %c0_i32 = arith.constant 0 : i32
    %c0_i32_0 = arith.constant 0 : i32
    %c0_i32_1 = arith.constant 0 : i32
    return %c0_i32, %c0_i32_0 : i32, i32
  }
  func.func @transform_26(%arg0: i32) -> (i32, i32) {
    %c0_i32 = arith.constant 0 : i32
    %c0_i32_0 = arith.constant 0 : i32
    %c0_i32_1 = arith.constant 0 : i32
    return %c0_i32, %c0_i32_0 : i32, i32
  }
  func.func @transform_27(%arg0: i32) -> (i32, i32) {
    %c0_i32 = arith.constant 0 : i32
    %c0_i32_0 = arith.constant 0 : i32
    %c0_i32_1 = arith.constant 0 : i32
    return %c0_i32, %c0_i32_0 : i32, i32
  }
  func.func @transform_28(%arg0: i32) -> (i32, i32, i32) {
    %c0_i32 = arith.constant 0 : i32
    %c0_i32_0 = arith.constant 0 : i32
    %c0_i32_1 = arith.constant 0 : i32
    return %arg0, %c0_i32, %c0_i32_0 : i32, i32, i32
  }
  func.func @transform_29(%arg0: i32) -> (i32, i32, i32) {
    %c0_i32 = arith.constant 0 : i32
    %c0_i32_0 = arith.constant 0 : i32
    %c0_i32_1 = arith.constant 0 : i32
    return %arg0, %c0_i32, %c0_i32_0 : i32, i32, i32
  }
}

</mosaic_0001>

<bundles_post_ra>
// kernel: cross_self_attention_fixcross_forward.4
= control target key start
LH: loop header
LB: loop body
LE: loop exit
PB: predicated region body
PF: predicated region fallthrough
CT: control target
= control target key end

     0   :  { %s2030_s24 = smov 0   ;;  %s2243_s0 = inlined_call_operand.vmem [shape: f32[2,14,32], index: 0, kind: input, shape index: {}]   ;;  %s2244_s1 = inlined_call_operand.vmem [shape: f32[2,14,32], index: 1, kind: input, shape index: {}]   ;;  %s2245_s2 = inlined_call_operand.vmem [shape: f32[2,1,14], index: 2, kind: input, shape index: {}]   ;;  %s2246_s3 = inlined_call_operand.vmem [shape: bf16[32,64], index: 3, kind: input, shape index: {}]   ;;  %s2247_s4 = inlined_call_operand.vmem [shape: f32[1,64], index: 4, kind: input, shape index: {}]   ;;  %s2248_s5 = inlined_call_operand.vmem [shape: bf16[32,32], index: 5, kind: input, shape index: {}]   ;;  %s2249_s6 = inlined_call_operand.vmem [shape: f32[1,32], index: 6, kind: input, shape index: {}]   ;;  %s2250_s7 = inlined_call_operand.vmem [shape: bf16[32,32], index: 7, kind: input, shape index: {}]   ;;  %s2251_s8 = inlined_call_operand.vmem [shape: f32[1,32], index: 8, kind: input, shape index: {}]   ;;  %s2252_s9 = inlined_call_operand.vmem [shape: f32[1,32], index: 9, kind: input, shape index: {}]   ;;  %s2253_s10 = inlined_call_operand.vmem [shape: f32[1,32], index: 10, kind: input, shape index: {}]   ;;  %s2254_s11 = inlined_call_operand.vmem [shape: bf16[32,64], index: 11, kind: input, shape index: {}]   ;;  %s2255_s12 = inlined_call_operand.vmem [shape: f32[1,64], index: 12, kind: input, shape index: {}]   ;;  %s2256_s13 = inlined_call_operand.vmem [shape: bf16[64,32], index: 13, kind: input, shape index: {}]   ;;  %s2257_s14 = inlined_call_operand.vmem [shape: f32[1,32], index: 14, kind: input, shape index: {}]   ;;  %s2258_s15 = inlined_call_operand.vmem [shape: f32[1,32], index: 15, kind: input, shape index: {}]   ;;  %s2259_s16 = inlined_call_operand.vmem [shape: f32[1,32], index: 16, kind: input, shape index: {}]   ;;  %s2260_s17 = inlined_call_operand.vmem [shape: f32[2,14,32], index: 17, kind: output, shape index: {}]  }
   0x1   :  { %2261 = sst [smem:[#allocation2_spill]] %s2243_s0 }
   0x2   :  { %2262 = sst [smem:[#allocation3_spill]] %s2244_s1 }
   0x3 LB: > { %s1657_s25 = sadd.s32 4294967295, %s1926_s24   ;;  %p1661_p0 = scmp.ge.s32.totalorder %s1926_s24, 1  ;;  %s1926_s24 = sphi %s2030_s24, %s27_s24  }
   0x4   : > { %p505_p1 = scmp.lt.s32.totalorder %s1926_s24, 3 }
   0x6   : > { %p506_p2 = pnand %p1661_p0, %p505_p1 }
   0x7   : > { %v1868_v0 = vld [vmem:[%s2246_s3] sm:$0xff] (!%p506_p2)   ;;  %v1928_v1 = vmov (!%p506_p2), 0.0   ;;  %v1869_v2 = vld [vmem:[%s2246_s3 + $0x8] sm:$0xff] (!%p506_p2)   ;;  %vm1929_vm0 = vmmov (!%p506_p2), 0   ;;  %p565_p3 = scmp.lt.s32.totalorder (!%p506_p2), %s1657_s25, 1  ;;  %s2263_s19 = sld [smem:[#allocation2_spill]] (!%p506_p2) }
   0x8   : > { %509 = sbr.rel (%p506_p2) target bundleno = 2587 (0xa1b), region = 88  ;;  %1741 = vmatprep.subr.bf16.mxu1 (!%p506_p2), %v1928_v1  ;;  %1757 = vmatprep.subr.bf16.mxu0 (!%p506_p2), %v1928_v1  ;;  %s2264_s22 = sld [smem:[#allocation3_spill]] (!%p506_p2)  ;;  %vm615_vm1 = vcmask (!%p506_p2), 261120   ;;  %v1668_v10 = vld [vmem:[%s2247_s4] ss:$0 sm:$0xff] (!%p506_p2)  ;;  %v1871_v19 = vld [vmem:[%s2248_s5 + $0x8] sm:$0xff] (!%p506_p2)  }
   0x9   : > { %1742 = vmatpush3.bf16.msra.mxu1 (!%p506_p2), %v1868_v0  ;;  %1745 = vmatprep.mubr.msk.bf16.mxu1 (!%p506_p2), %vm1929_vm0, %v1928_v1  ;;  %s1930_s28 = smov (!%p506_p2), 120   ;;  %s1931_s29 = smov (!%p506_p2), 96   ;;  %v1870_v18 = vld [vmem:[%s2248_s5] sm:$0xff] (!%p506_p2)   ;;  %vm739_vm2 = vcmask (!%p506_p2), 64512   ;;  %vm787_vm3 = vcmask (!%p506_p2), 113664   ;;  %vm791_vm4 = vcmask (!%p506_p2), 111616  }
   0xa   : > { %1743 = vmatprep.subr.bf16.mxu1 (!%p506_p2), %v1928_v1  ;;  %1759 = vmatprep.mubr.msk.bf16.mxu0 (!%p506_p2), %vm1929_vm0, %v1928_v1  ;;  %s1932_s30 = smov (!%p506_p2), 80   ;;  %s1933_s18 = smov (!%p506_p2), 88   ;;  %vm815_vm5 = vcmask (!%p506_p2), 1046528   ;;  %vm1256_vm6 = vcmask (!%p506_p2), 130048   ;;  %vm1259_vm7 = vcmask (!%p506_p2), 195584   ;;  %vm1337_vm8 = vcmask (!%p506_p2), 259072  }
   0xb   : > { %s1936_s20 = smov (!%p506_p2), 104   ;;  %vm1488_vm9 = vcmask (!%p506_p2), 523264  }
   0xd   : > { %1744 = vmatpush3.bf16.msra.mxu1 (!%p506_p2), %v1869_v2  ;;  %v1672_v2 = vld [vmem:[%s2249_s6] ss:$0 sm:$0xff] (!%p506_p2) }
   0xe   : > { %1749 = vmatprep.subr.bf16.mxu1 (!%p506_p2), %v1928_v1 }
   0xf   : > { %s2266_s25 = smov (!%p565_p3, %s1657_s25), 1 }
  0x10   : > { %s2054_s0 = sshll.u32 %s2266_s25, 4 }
  0x11   : > { %s569_s1 = scalar_lea.vmem %s2263_s19, %s2054_s0  ;;  %s574_s23 = scalar_lea.vmem %s2264_s22, %s2054_s0 }
  0x12   : > { %v2065_v3 = vld [vmem:[%s569_s1] sm:$0xff]  ;;  %v2067_v4 = vld [vmem:[%s569_s1 + $0x8] sm:$0x3f]  ;;  %s1934_s19 = smov 72   ;;  %s1935_s1 = smov 112  }
  0x13   : > { %v586_v5 = vld [vmem:[%s574_s23] sm:$0xff]  ;;  %v587_v6 = vld [vmem:[%s574_s23 + $0x8] sm:$0x3f]  ;;  %v664_v20 = vpack.c.bf16 %v2067_v4, %v2065_v3  ;;  %s1939_s23 = smov 24  }
  0x14   : > { %v589_v7 = vadd.f32 %v586_v5, %v2065_v3  ;;  %v590_v8 = vadd.f32 %v587_v6, %v2067_v4 }
  0x16   : > { %v595_v9 = vpack.c.bf16 %v590_v8, %v589_v7 }
  0x18   : > { %1746 = vmatmul.mubr.msk.bf16.vlgmr.msra.gmra.mrb[0].mxu1 %vm615_vm1, %v595_v9 }
  0x19   : > { %1753 = vmatprep.mubr.msk.bf16.mxu1 %vm1929_vm0, %v1928_v1  ;;  %1750 = vmatpush3.bf16.msra.mxu1 %v1870_v18 }
  0x1a   : > { %1751 = vmatprep.subr.bf16.mxu1 %v1928_v1 }
  0x1d   : > { %1752 = vmatpush3.bf16.msra.mxu1 %v1871_v19 }
  0x1e   : > { %1763 = vmatprep.subr.bf16.mxu1 %v1928_v1 }
  0x20   : > { %1754 = vmatmul.mubr.msk.bf16.vlgmr.msra.gmra.mrb[4].mxu1 %vm615_vm1, %v664_v20 }
  0x21   : > { %1765 = vmatprep.mubr.msk.bf16.mxu1 %vm1929_vm0, %v1928_v1 }
  0xeb   : > { %v653_v11 = vpop.f32.mrb[0].mxu1 }
  0xec   : > { %v1747_v12 = vpop.f32.mrb[1].mxu1  ;;  %v654_v14 = vadd.f32 %v1668_v10, %v653_v11 }
  0xed   : > { %v656_v13 = vpop.f32.mrb[2].mxu1 }
  0xee   : > { %v657_v15 = vadd.f32 %v1668_v10, %v656_v13  ;;  %v1748_v16 = vpop.f32.mrb[3].mxu1 }
  0xf0   : > { %v728_v17 = vpack.c.bf16 %v657_v15, %v654_v14 }
  0xf2   : > { %860 = vrot.lane.b32.xlu1 %v728_v17, %s1930_s28  ;;  %737 = vrot.lane.b32.xlu0 %v728_v17, %s1931_s29  ;;  %s582_s29 = scalar_lea.vmem %s2260_s17, %s2054_s0 }
  0xf3   : > { %v721_v5 = vpop.f32.mrb[4].mxu1 }
  0xf4   : > { %v722_v6 = vadd.f32 %v1672_v2, %v721_v5  ;;  %v1755_v7 = vpop.f32.mrb[5].mxu1 }
  0xf5   : > { %v724_v8 = vpop.f32.mrb[6].mxu1 }
  0xf6   : > { %986 = vrot.lane.b32.xlu1 %v728_v17, %s1932_s30  ;;  %862 = vrot.lane.b32.xlu0 %v728_v17, %s1933_s18  ;;  %s577_s30 = scalar_lea.vmem %s2245_s2, %s2266_s25  ;;  %v725_v9 = vadd.f32 %v1672_v2, %v724_v8  ;;  %v1756_v10 = vpop.f32.mrb[7].mxu1 }
  0xf7   : > { %v1676_v32 = vld [vmem:[%s577_s30] ss:$0 sm:$0xff] }
  0xf8   : > { %v729_v11 = vpack.c.bf16 %v725_v9, %v722_v6 }
  0xfa   : > { %1109 = vrot.lane.b32.xlu1 %v728_v17, %s1934_s19  ;;  %984 = vrot.lane.b32.xlu0 %v728_v17, %s1935_s1  ;;  %v817_v12 = vsel %vm815_vm5, %v729_v11, 0 }
  0xfb   : > { %1764 = vmatpush3.bf16.msra.mxu1 %v817_v12 }
  0xfc   : > { %1775 = vmatprep.subr.bf16.mxu1 %v1928_v1 }
  0xfe   : > { %1107 = vrot.lane.b32.xlu0 %v728_v17, %s1936_s20 }
 0x164   : > { %v738_v21 = vpop.permute.xlu0 %737  ;;  %v861_v24 = vpop.permute.xlu1 %860 }
 0x165   : > { %v744_v22 = vsel %vm739_vm2, %v738_v21, 0 }
 0x166   : > { %1758 = vmatpush3.bf16.xpose.msra.mxu0 %v744_v22 }
 0x167   : > { %1769 = vmatprep.subr.bf16.mxu0 %v1928_v1 }
 0x168   : > { %v863_v23 = vpop.permute.xlu0 %862  ;;  %v987_v26 = vpop.permute.xlu1 %986 }
 0x169   : > { %v868_v25 = vsel %vm739_vm2, %v863_v23, 0  ;;  %v992_v27 = vsel %vm739_vm2, %v987_v26, 0 }
 0x16c   : > { %v1110_v28 = vpop.permute.xlu1 %1109  ;;  %v985_v29 = vpop.permute.xlu0 %984 }
 0x16d   : > { %1760 = vmatmul.mubr.msk.bf16.vlgmr.msra.gmra.mrb[0].mxu0 %vm739_vm2, %v728_v17  ;;  %v1115_v30 = vsel %vm739_vm2, %v1110_v28, 0 }
 0x16e   : > { %1770 = vmatpush3.bf16.xpose.msra.mxu0 %v868_v25  ;;  %1771 = vmatprep.mubr.msk.bf16.mxu0 %vm1929_vm0, %v1928_v1 }
 0x16f   : > { %1781 = vmatprep.subr.bf16.mxu0 %v1928_v1 }
 0x170   : > { %v1108_v31 = vpop.permute.xlu0 %1107 }
 0x175   : > { %1772 = vmatmul.mubr.msk.bf16.vlgmr.msra.gmra.mrb[4].mxu0 %vm739_vm2, %v861_v24 }
 0x176   : > { %1782 = vmatpush3.bf16.xpose.msra.mxu0 %v992_v27  ;;  %1783 = vmatprep.mubr.msk.bf16.mxu0 %vm1929_vm0, %v1928_v1 }
 0x177   : > { %1793 = vmatprep.subr.bf16.mxu0 %v1928_v1 }
 0x17d   : > { %1784 = vmatmul.mubr.msk.bf16.vlgmr.msra.gmra.mrb[8].mxu0 %vm739_vm2, %v985_v29 }
 0x17e   : > { %1794 = vmatpush3.bf16.xpose.msra.mxu0 %v1115_v30  ;;  %1795 = vmatprep.mubr.msk.bf16.mxu0 %vm1929_vm0, %v1928_v1 }
 0x17f   : > { %1805 = vmatprep.subr.bf16.mxu0 %v1928_v1 }
 0x185   : > { %1796 = vmatmul.mubr.msk.bf16.vlgmr.msra.gmra.mrb[12].mxu0 %vm739_vm2, %v1108_v31 }
 0x186   : > { %1809 = vmatprep.mubr.msk.bf16.mxu0 %vm1929_vm0, %v1928_v1 }
 0x240   : > { %v780_v33 = vpop.f32.mrb[0].mxu0 }
 0x241   : > { %v781_v34 = vadd.f32 %v1676_v32, %v780_v33  ;;  %v1761_v35 = vpop.f32.mrb[1].mxu0 }
 0x242   : > { %v783_v36 = vpop.f32.mrb[2].mxu0 }
 0x243   : > { %v784_v37 = vadd.f32 %v1676_v32, %v783_v36  ;;  %v1762_v38 = vpop.f32.mrb[3].mxu0  ;;  %v788_v39 = vsel %vm787_vm3, %v781_v34, -inf }
 0x244   : > { %789 = vmax.xlane.f32.xlu1 %v788_v39 }
 0x245   : > { %v792_v40 = vsel %vm791_vm4, %v784_v37, -inf }
 0x246   : > { %793 = vmax.xlane.f32.xlu0 %v792_v40 }
 0x248   : > { %v904_v41 = vpop.f32.mrb[4].mxu0 }
 0x249   : > { %v905_v42 = vadd.f32 %v1676_v32, %v904_v41  ;;  %v1773_v43 = vpop.f32.mrb[5].mxu0 }
 0x24a   : > { %v907_v44 = vpop.f32.mrb[6].mxu0 }
 0x24b   : > { %v908_v45 = vadd.f32 %v1676_v32, %v907_v44  ;;  %v1774_v46 = vpop.f32.mrb[7].mxu0  ;;  %v911_v47 = vsel %vm787_vm3, %v905_v42, -inf }
 0x24c   : > { %912 = vmax.xlane.f32.xlu0 %v911_v47 }
 0x24d   : > { %v914_v48 = vsel %vm791_vm4, %v908_v45, -inf }
 0x24e   : > { %915 = vmax.xlane.f32.xlu1 %v914_v48 }
 0x250   : > { %v1028_v49 = vpop.f32.mrb[8].mxu0 }
 0x251   : > { %v1029_v50 = vadd.f32 %v1676_v32, %v1028_v49  ;;  %v1785_v51 = vpop.f32.mrb[9].mxu0 }
 0x252   : > { %v1031_v52 = vpop.f32.mrb[10].mxu0 }
 0x253   : > { %v1032_v53 = vadd.f32 %v1676_v32, %v1031_v52  ;;  %v1786_v54 = vpop.f32.mrb[11].mxu0  ;;  %v1035_v55 = vsel %vm787_vm3, %v1029_v50, -inf }
 0x254   : > { %1036 = vmax.xlane.f32.xlu0 %v1035_v55 }
 0x255   : > { %v1038_v56 = vsel %vm791_vm4, %v1032_v53, -inf }
 0x256   : > { %1039 = vmax.xlane.f32.xlu1 %v1038_v56 }
 0x258   : > { %v1151_v57 = vpop.f32.mrb[12].mxu0 }
 0x259   : > { %v1152_v58 = vadd.f32 %v1676_v32, %v1151_v57  ;;  %v1797_v59 = vpop.f32.mrb[13].mxu0 }
 0x25a   : > { %v1154_v60 = vpop.f32.mrb[14].mxu0 }
 0x25b   : > { %v2123_v61 = vadd.f32 %v1676_v32, %v1154_v60  ;;  %v1798_v62 = vpop.f32.mrb[15].mxu0  ;;  %v1158_v63 = vsel %vm787_vm3, %v1152_v58, -inf }
 0x25c   : > { %1159 = vmax.xlane.f32.xlu0 %v1158_v63 }
 0x25d   : > { %v1161_v0 = vsel %vm791_vm4, %v2123_v61, -inf }
 0x25e   : > { %1162 = vmax.xlane.f32.xlu1 %v1161_v0 }
 0x2d1   : > { %v790_v13 = vpop.xlane.xlu1 %789 }
 0x2d2   : > { %v795_v14 = vsub.f32 %v781_v34, %v790_v13 }
 0x2d3   : > { %v794_v15 = vpop.xlane.xlu0 %793 }
 0x2d4   : > { %v797_v16 = vmul.f32 1.442695, %v795_v14  ;;  %v796_v17 = vsub.f32 %v784_v37, %v794_v15 }
 0x2d6   : > { %1880 = vpow2.f32 %v797_v16  ;;  %v799_v18 = vmul.f32 1.442695, %v796_v17 }
 0x2d8   : > { %1882 = vpow2.f32 %v799_v18 }
 0x2d9   : > { %v913_v19 = vpop.xlane.xlu0 %912 }
 0x2da   : > { %v917_v20 = vsub.f32 %v905_v42, %v913_v19 }
 0x2db   : > { %v916_v21 = vpop.xlane.xlu1 %915 }
 0x2dc   : > { %v919_v22 = vmul.f32 1.442695, %v917_v20  ;;  %v918_v23 = vsub.f32 %v908_v45, %v916_v21 }
 0x2de   : > { %1884 = vpow2.f32 %v919_v22  ;;  %v921_v24 = vmul.f32 1.442695, %v918_v23 }
 0x2e0   : > { %v1881_v25 = vpop.eup %1880  ;;  %1886 = vpow2.f32 %v921_v24 }
 0x2e1   : > { %v1037_v26 = vpop.xlane.xlu0 %1036  ;;  %v801_v27 = vsel %vm787_vm3, %v1881_v25, 0.0 }
 0x2e2   : > { %v1883_v28 = vpop.eup %1882  ;;  %v1041_v29 = vsub.f32 %v1029_v50, %v1037_v26  ;;  %802 = vadd.xlane.f32.xlu0 %v801_v27 }
 0x2e3   : > { %v1040_v30 = vpop.xlane.xlu1 %1039  ;;  %v804_v31 = vsel %vm791_vm4, %v1883_v28, 0.0 }
 0x2e4   : > { %v1043_v32 = vmul.f32 1.442695, %v1041_v29  ;;  %v1042_v33 = vsub.f32 %v1032_v53, %v1040_v30  ;;  %805 = vadd.xlane.f32.xlu1 %v804_v31 }
 0x2e6   : > { %1888 = vpow2.f32 %v1043_v32  ;;  %v1045_v34 = vmul.f32 1.442695, %v1042_v33  ;;  %v1872_v33 = vld [vmem:[%s2250_s7] sm:$0xff]  }
 0x2e7   : > { %1806 = vmatpush3.bf16.msra.mxu0 %v1872_v33 }
 0x2e8   : > { %v1885_v35 = vpop.eup %1884  ;;  %1890 = vpow2.f32 %v1045_v34  ;;  %1807 = vmatprep.subr.bf16.mxu0 %v1928_v1 }
 0x2e9   : > { %v1160_v36 = vpop.xlane.xlu0 %1159  ;;  %v923_v37 = vsel %vm787_vm3, %v1885_v35, 0.0 }
 0x2ea   : > { %v1887_v38 = vpop.eup %1886  ;;  %v1164_v39 = vsub.f32 %v1152_v58, %v1160_v36  ;;  %924 = vadd.xlane.f32.xlu0 %v923_v37 }
 0x2eb   : > { %v926_v40 = vsel %vm791_vm4, %v1887_v38, 0.0  ;;  %v1163_v48 = vpop.xlane.xlu1 %1162 }
 0x2ec   : > { %v1166_v41 = vmul.f32 1.442695, %v1164_v39  ;;  %927 = vadd.xlane.f32.xlu1 %v926_v40  ;;  %v1165_v49 = vsub.f32 %v2123_v61, %v1163_v48 }
 0x2ee   : > { %1892 = vpow2.f32 %v1166_v41  ;;  %v1168_v50 = vmul.f32 1.442695, %v1165_v49  ;;  %v1873_v41 = vld [vmem:[%s2250_s7 + $0x8] sm:$0xff]  }
 0x2ef   : > { %1808 = vmatpush3.bf16.msra.mxu0 %v1873_v41 }
 0x2f0   : > { %v1889_v42 = vpop.eup %1888  ;;  %1894 = vpow2.f32 %v1168_v50  ;;  %1821 = vmatprep.subr.bf16.mxu0 %v1928_v1 }
 0x2f1   : > { %v1047_v43 = vsel %vm787_vm3, %v1889_v42, 0.0 }
 0x2f2   : > { %v1891_v44 = vpop.eup %1890  ;;  %1048 = vadd.xlane.f32.xlu0 %v1047_v43 }
 0x2f3   : > { %v1050_v45 = vsel %vm791_vm4, %v1891_v44, 0.0 }
 0x2f4   : > { %1051 = vadd.xlane.f32.xlu1 %v1050_v45 }
 0x2f8   : > { %v2139_v46 = vpop.eup %1892 }
 0x2f9   : > { %v1170_v47 = vsel %vm787_vm3, %v2139_v46, 0.0 }
 0x2fa   : > { %1171 = vadd.xlane.f32.xlu0 %v1170_v47  ;;  %v1895_v51 = vpop.eup %1894 }
 0x2fb   : > { %v1173_v52 = vsel %vm791_vm4, %v1895_v51, 0.0 }
 0x305   : > { %1058 = vrot.lane.b32.xlu1 %v729_v11, %s1935_s1  ;;  %s1937_s1 = smov 8  }
 0x310   : > { %935 = vrot.lane.b32.xlu0 %v729_v11, %s1930_s28 }
 0x329   : > { %1174 = vadd.xlane.f32.xlu1 %v1173_v52 }
 0x33a   : > { %1181 = vrot.lane.b32.xlu1 %v729_v11, %s1936_s20  ;;  %s1938_s20 = smov 16  }
 0x36f   : > { %v803_v53 = vpop.xlane.xlu0 %802 }
 0x370   : > { %1896 = vrcp.f32 %v803_v53 }
 0x371   : > { %v806_v54 = vpop.xlane.xlu1 %805 }
 0x372   : > { %1898 = vrcp.f32 %v806_v54 }
 0x377   : > { %v925_v58 = vpop.xlane.xlu0 %924 }
 0x379   : > { %v928_v56 = vpop.xlane.xlu1 %927 }
 0x37a   : > { %v1897_v55 = vpop.eup %1896  ;;  %1900 = vrcp.f32 %v928_v56 }
 0x37b   : > { %v809_v59 = vmul.f32 %v1897_v55, %v1881_v25  ;;  %1902 = vrcp.f32 %v925_v58 }
 0x37c   : > { %v1899_v57 = vpop.eup %1898 }
 0x37d   : > { %v810_v60 = vmul.f32 %v1899_v57, %v1883_v28 }
 0x37f   : > { %v811_v61 = vpack.c.bf16 %v810_v60, %v809_v59  ;;  %v1049_v63 = vpop.xlane.xlu0 %1048 }
 0x381   : > { %1766 = vmatmul.mubr.msk.bf16.vlgmr.msra.gmra.mrb[8].mxu1 %vm787_vm3, %v811_v61  ;;  %v1052_v62 = vpop.xlane.xlu1 %1051 }
 0x382   : > { %1777 = vmatprep.mubr.msk.bf16.mxu1 %vm1929_vm0, %v1928_v1  ;;  %1904 = vrcp.f32 %v1052_v62 }
 0x383   : > { %1906 = vrcp.f32 %v1049_v63  ;;  %v1685_v63 = vld [vmem:[%s2251_s8] ss:$0 sm:$0xff] }
 0x384   : > { %v1901_v0 = vpop.eup %1900 }
 0x385   : > { %v1903_v5 = vpop.eup %1902  ;;  %v932_v6 = vmul.f32 %v1901_v0, %v1887_v38  ;;  %v1059_v10 = vpop.permute.xlu1 %1058 }
 0x386   : > { %v931_v8 = vmul.f32 %v1903_v5, %v1885_v35  ;;  %v1064_v13 = vsel %vm815_vm5, %v1059_v10, 0 }
 0x387   : > { %v1172_v2 = vpop.xlane.xlu0 %1171 }
 0x388   : > { %v933_v11 = vpack.c.bf16 %v932_v6, %v931_v8  ;;  %1908 = vrcp.f32 %v1172_v2 }
 0x38b   : > { %v936_v7 = vpop.permute.xlu0 %935 }
 0x38c   : > { %v941_v9 = vsel %vm815_vm5, %v936_v7, 0  ;;  %v1905_v12 = vpop.eup %1904 }
 0x38d   : > { %1776 = vmatpush3.bf16.msra.mxu1 %v941_v9  ;;  %v1907_v14 = vpop.eup %1906  ;;  %v1056_v15 = vmul.f32 %v1905_v12, %v1891_v44 }
 0x38e   : > { %1787 = vmatprep.subr.bf16.mxu1 %v1928_v1  ;;  %v1055_v16 = vmul.f32 %v1907_v14, %v1889_v42 }
 0x390   : > { %1778 = vmatmul.mubr.msk.bf16.vlgmr.msra.gmra.mrb[12].mxu1 %vm787_vm3, %v933_v11  ;;  %v1057_v17 = vpack.c.bf16 %v1056_v15, %v1055_v16 }
 0x391   : > { %1788 = vmatpush3.bf16.msra.mxu1 %v1064_v13  ;;  %1789 = vmatprep.mubr.msk.bf16.mxu1 %vm1929_vm0, %v1928_v1 }
 0x392   : > { %1799 = vmatprep.subr.bf16.mxu1 %v1928_v1  ;;  %v1909_v21 = vpop.eup %1908 }
 0x393   : > { %v1178_v23 = vmul.f32 %v1909_v21, %v2139_v46 }
 0x398   : > { %1790 = vmatmul.mubr.msk.bf16.vlgmr.msra.gmra.mrb[16].mxu1 %vm787_vm3, %v1057_v17 }
 0x399   : > { %1801 = vmatprep.mubr.msk.bf16.mxu1 %vm1929_vm0, %v1928_v1 }
 0x3b6   : > { %v1175_v18 = vpop.xlane.xlu1 %1174 }
 0x3b7   : > { %1910 = vrcp.f32 %v1175_v18 }
 0x3ba   : > { %v1182_v19 = vpop.permute.xlu1 %1181 }
 0x3bb   : > { %v1187_v20 = vsel %vm815_vm5, %v1182_v19, 0 }
 0x3bc   : > { %1800 = vmatpush3.bf16.msra.mxu1 %v1187_v20 }
 0x3bd   : > { %1813 = vmatprep.subr.bf16.mxu1 %v1928_v1 }
 0x3c1   : > { %v1911_v22 = vpop.eup %1910 }
 0x3c2   : > { %v1179_v24 = vmul.f32 %v1911_v22, %v1895_v51  ;;  %v1875_v22 = vld [vmem:[%s2254_s11 + $0x8] sm:$0xff]  }
 0x3c4   : > { %v1180_v25 = vpack.c.bf16 %v1179_v24, %v1178_v23  ;;  %v1876_v23 = vld [vmem:[%s2256_s13] sm:$0xff]   ;;  %v1877_v24 = vld [vmem:[%s2256_s13 + $0x8] sm:$0xff]  }
 0x3c6   : > { %1802 = vmatmul.mubr.msk.bf16.vlgmr.msra.gmra.mrb[20].mxu1 %vm787_vm3, %v1180_v25 }
 0x3c7   : > { %1817 = vmatprep.mubr.msk.bf16.mxu1 %vm1929_vm0, %v1928_v1 }
 0x454   : > { %v853_v26 = vpop.f32.mrb[8].mxu1 }
 0x455   : > { %v1767_v27 = vpop.f32.mrb[9].mxu1 }
 0x456   : > { %v856_v28 = vpop.f32.mrb[10].mxu1 }
 0x457   : > { %v1768_v29 = vpop.f32.mrb[11].mxu1 }
 0x463   : > { %v977_v30 = vpop.f32.mrb[12].mxu1 }
 0x464   : > { %v1779_v31 = vpop.f32.mrb[13].mxu1 }
 0x465   : > { %v980_v32 = vpop.f32.mrb[14].mxu1 }
 0x466   : > { %v1853_v34 = vpack.i.bf16 %v980_v32, %v977_v30  ;;  %v1780_v35 = vpop.f32.mrb[15].mxu1  ;;  %v1689_v32 = vld [vmem:[%s2252_s9] ss:$0 sm:$0xff] }
 0x468   : > { %1854 = vrot.lane.b32.xlu0 %v1853_v34, %s1937_s1 }
 0x46b   : > { %v1100_v36 = vpop.f32.mrb[16].mxu1 }
 0x46c   : > { %v1791_v37 = vpop.f32.mrb[17].mxu1 }
 0x46d   : > { %v1103_v38 = vpop.f32.mrb[18].mxu1  ;;  %v1690_v37 = vld [vmem:[%s2253_s10] ss:$0 sm:$0xff] }
 0x46e   : > { %v1858_v39 = vpack.i.bf16 %v1103_v38, %v1100_v36  ;;  %v1792_v40 = vpop.f32.mrb[19].mxu1 }
 0x470   : > { %1859 = vrot.lane.b32.xlu1 %v1858_v39, %s1938_s20 }
 0x499   : > { %v1223_v42 = vpop.f32.mrb[20].mxu1 }
 0x49a   : > { %v1803_v43 = vpop.f32.mrb[21].mxu1 }
 0x49b   : > { %v1226_v44 = vpop.f32.mrb[22].mxu1  ;;  %v1879_v43 = vld [vmem:[%s2256_s13 + $0x18] sm:$0xff]  }
 0x49c   : > { %v1863_v45 = vpack.i.bf16 %v1226_v44, %v1223_v42  ;;  %v1804_v46 = vpop.f32.mrb[23].mxu1  ;;  %v1878_v42 = vld [vmem:[%s2256_s13 + $0x10] sm:$0xff]   ;;  %v1691_v44 = vld [vmem:[%s2255_s12] ss:$0 sm:$0xff] }
 0x49e   : > { %1864 = vrot.lane.b32.xlu0 %v1863_v45, %s1939_s23 }
 0x4da   : > { %v1855_v47 = vpop.permute.xlu0 %1854 }
 0x4db   : > { %v1857_v49 = vunpack.i.h.bf16 %v1855_v47  ;;  %v1856_v50 = vunpack.i.l.bf16 %v1855_v47 }
 0x4dd   : > { %v1255_v54 = vsel %vm739_vm2, %v856_v28, %v1857_v49  ;;  %v1254_v55 = vsel %vm739_vm2, %v853_v26, %v1856_v50 }
 0x4e2   : > { %v1860_v48 = vpop.permute.xlu1 %1859 }
 0x4e3   : > { %v1862_v51 = vunpack.i.h.bf16 %v1860_v48  ;;  %v1861_v52 = vunpack.i.l.bf16 %v1860_v48 }
 0x4e5   : > { %v1258_v58 = vsel %vm1256_vm6, %v1255_v54, %v1862_v51  ;;  %v1257_v59 = vsel %vm1256_vm6, %v1254_v55, %v1861_v52 }
 0x510   : > { %v1865_v53 = vpop.permute.xlu0 %1864 }
 0x511   : > { %v1867_v56 = vunpack.i.h.bf16 %v1865_v53  ;;  %v1866_v57 = vunpack.i.l.bf16 %v1865_v53 }
 0x513   : > { %v1261_v60 = vsel %vm1259_vm7, %v1258_v58, %v1867_v56  ;;  %v1260_v61 = vsel %vm1259_vm7, %v1257_v59, %v1866_v57 }
 0x514   : > { %v1266_v62 = vpack.c.bf16 %v1261_v60, %v1260_v61 }
 0x516   : > { %1810 = vmatmul.mubr.msk.bf16.vlgmr.msra.gmra.mrb[16].mxu0 %vm615_vm1, %v1266_v62 }
 0x517   : > { %1829 = vmatprep.mubr.msk.bf16.mxu0 %vm1929_vm0, %v1928_v1  ;;  %1822 = vmatpush3.bf16.msra.mxu0 %v1876_v23 }
 0x518   : > { %1823 = vmatprep.subr.bf16.mxu0 %v1928_v1 }
 0x51b   : > { %1824 = vmatpush3.bf16.msra.mxu0 %v1877_v24 }
 0x51c   : > { %1825 = vmatprep.subr.bf16.mxu0 %v1928_v1 }
 0x51f   : > { %1826 = vmatpush3.bf16.msra.mxu0 %v1878_v42 }
 0x520   : > { %1827 = vmatprep.subr.bf16.mxu0 %v1928_v1 }
 0x523   : > { %1828 = vmatpush3.bf16.msra.mxu0 %v1879_v43 }
 0x5e9   : > { %v1323_v0 = vpop.f32.mrb[16].mxu0 }
 0x5ea   : > { %v1324_v2 = vadd.f32 %v1685_v63, %v1323_v0  ;;  %v1811_v5 = vpop.f32.mrb[17].mxu0 }
 0x5eb   : > { %v1326_v6 = vpop.f32.mrb[18].mxu0 }
 0x5ec   : > { %v1327_v7 = vadd.f32 %v1685_v63, %v1326_v6  ;;  %v1812_v8 = vpop.f32.mrb[19].mxu0  ;;  %v1330_v9 = vadd.f32 %v1324_v2, %v2065_v3 }
 0x5ee   : > { %v1334_v10 = vsel %vm615_vm1, %v1330_v9, 0.0  ;;  %v1331_v11 = vadd.f32 %v1327_v7, %v2067_v4  ;;  %v1874_v4 = vld [vmem:[%s2254_s11] sm:$0xff]  }
 0x5ef   : > { %1335 = vadd.xlane.f32.xlu1 %v1334_v10  ;;  %1814 = vmatpush3.bf16.msra.mxu1 %v1874_v4  ;;  %v1702_v4 = vld [vmem:[%s2259_s16] ss:$0 sm:$0xff] }
 0x5f0   : > { %v1338_v12 = vsel %vm1337_vm8, %v1331_v11, 0.0  ;;  %1815 = vmatprep.subr.bf16.mxu1 %v1928_v1  ;;  %v1695_v1 = vld [vmem:[%s2257_s14] ss:$0 sm:$0xff] }
 0x5f1   : > { %1339 = vadd.xlane.f32.xlu0 %v1338_v12 }
 0x5f3   : > { %1816 = vmatpush3.bf16.msra.mxu1 %v1875_v22 }
 0x67c   : > { %v1336_v13 = vpop.xlane.xlu1 %1335 }
 0x67d   : > { %v1342_v14 = vmul.f32 0.03125, %v1336_v13 }
 0x67e   : > { %v1340_v15 = vpop.xlane.xlu0 %1339 }
 0x67f   : > { %v1344_v16 = vsub.f32 %v1330_v9, %v1342_v14  ;;  %v1343_v17 = vmul.f32 0.03125, %v1340_v15 }
 0x681   : > { %v1345_v18 = vsub.f32 %v1331_v11, %v1343_v17  ;;  %v1346_v19 = vmul.f32 %v1344_v16, %v1344_v16 }
 0x683   : > { %v1348_v20 = vsel %vm615_vm1, %v1346_v19, 0.0  ;;  %v1347_v21 = vmul.f32 %v1345_v18, %v1345_v18 }
 0x684   : > { %1349 = vadd.xlane.f32.xlu0 %v1348_v20  ;;  %v1701_v20 = vld [vmem:[%s2258_s15] ss:$0 sm:$0xff] }
 0x685   : > { %v1351_v3 = vsel %vm1337_vm8, %v1347_v21, 0.0 }
 0x686   : > { %1352 = vadd.xlane.f32.xlu1 %v1351_v3 }
 0x711   : > { %v1350_v25 = vpop.xlane.xlu0 %1349 }
 0x712   : > { %v1354_v26 = vmul.f32 0.03125, %v1350_v25 }
 0x713   : > { %v1353_v27 = vpop.xlane.xlu1 %1352 }
 0x714   : > { %v1356_v28 = vadd.f32 1e-05, %v1354_v26  ;;  %v1355_v29 = vmul.f32 0.03125, %v1353_v27 }
 0x716   : > { %1912 = vrsqrt.f32 %v1356_v28  ;;  %v1357_v30 = vadd.f32 1e-05, %v1355_v29 }
 0x718   : > { %1914 = vrsqrt.f32 %v1357_v30 }
 0x720   : > { %v1913_v31 = vpop.eup %1912 }
 0x721   : > { %v1360_v33 = vmul.f32 %v1913_v31, %v1344_v16 }
 0x722   : > { %v1915_v34 = vpop.eup %1914 }
 0x723   : > { %v1368_v35 = vmul.f32 %v1689_v32, %v1360_v33  ;;  %v1361_v36 = vmul.f32 %v1915_v34, %v1345_v18 }
 0x725   : > { %v1369_v38 = vmul.f32 %v1689_v32, %v1361_v36  ;;  %v1376_v39 = vadd.f32 %v1690_v37, %v1368_v35 }
 0x727   : > { %v1377_v40 = vadd.f32 %v1690_v37, %v1369_v38 }
 0x729   : > { %v1382_v41 = vpack.c.bf16 %v1377_v40, %v1376_v39 }
 0x72b   : > { %1818 = vmatmul.mubr.msk.bf16.vlgmr.msra.gmra.mrb[24].mxu1 %vm615_vm1, %v1382_v41 }
 0x7fe   : > { %v1439_v45 = vpop.f32.mrb[24].mxu1 }
 0x7ff   : > { %v1440_v46 = vadd.f32 %v1691_v44, %v1439_v45  ;;  %v1819_v47 = vpop.f32.mrb[25].mxu1 }
 0x800   : > { %v1442_v48 = vpop.f32.mrb[26].mxu1 }
 0x801   : > { %v1443_v49 = vadd.f32 %v1691_v44, %v1442_v48  ;;  %v1820_v50 = vpop.f32.mrb[27].mxu1  ;;  %v1446_v51 = vmax.f32 %v1440_v46, 0.0 }
 0x803   : > { %v1447_v52 = vmax.f32 %v1443_v49, 0.0 }
 0x805   : > { %v1456_v53 = vpack.c.bf16 %v1447_v52, %v1446_v51 }
 0x807   : > { %1830 = vmatmul.mubr.msk.bf16.vlgmr.msra.gmra.mrb[20].mxu0 %vm1488_vm9, %v1456_v53 }
 0x8da   : > { %v1526_v54 = vpop.f32.mrb[20].mxu0 }
 0x8db   : > { %v1527_v55 = vadd.f32 %v1695_v1, %v1526_v54  ;;  %v1831_v56 = vpop.f32.mrb[21].mxu0 }
 0x8dc   : > { %v1529_v57 = vpop.f32.mrb[22].mxu0 }
 0x8dd   : > { %v1530_v58 = vadd.f32 %v1695_v1, %v1529_v57  ;;  %v1832_v59 = vpop.f32.mrb[23].mxu0  ;;  %v1533_v60 = vadd.f32 %v1527_v55, %v1376_v39 }
 0x8df   : > { %v1537_v61 = vsel %vm615_vm1, %v1533_v60, 0.0  ;;  %v1534_v62 = vadd.f32 %v1530_v58, %v1377_v40 }
 0x8e0   : > { %1538 = vadd.xlane.f32.xlu0 %v1537_v61 }
 0x8e1   : > { %v1540_v63 = vsel %vm1337_vm8, %v1534_v62, 0.0 }
 0x8e2   : > { %1541 = vadd.xlane.f32.xlu1 %v1540_v63 }
 0x96d   : > { %v1539_v0 = vpop.xlane.xlu0 %1538 }
 0x96e   : > { %v1543_v2 = vmul.f32 0.03125, %v1539_v0 }
 0x96f   : > { %v1542_v5 = vpop.xlane.xlu1 %1541 }
 0x970   : > { %v1545_v6 = vsub.f32 %v1533_v60, %v1543_v2  ;;  %v1544_v7 = vmul.f32 0.03125, %v1542_v5 }
 0x972   : > { %v1546_v8 = vsub.f32 %v1534_v62, %v1544_v7  ;;  %v1547_v9 = vmul.f32 %v1545_v6, %v1545_v6 }
 0x974   : > { %v1549_v10 = vsel %vm615_vm1, %v1547_v9, 0.0  ;;  %v1548_v11 = vmul.f32 %v1546_v8, %v1546_v8 }
 0x975   : > { %1550 = vadd.xlane.f32.xlu0 %v1549_v10 }
 0x976   : > { %v1552_v12 = vsel %vm1337_vm8, %v1548_v11, 0.0 }
 0x977   : > { %1553 = vadd.xlane.f32.xlu1 %v1552_v12 }
 0xa02   : > { %v1551_v13 = vpop.xlane.xlu0 %1550 }
 0xa03   : > { %v1555_v14 = vmul.f32 0.03125, %v1551_v13 }
 0xa04   : > { %v1554_v15 = vpop.xlane.xlu1 %1553 }
 0xa05   : > { %v1557_v16 = vadd.f32 1e-05, %v1555_v14  ;;  %v1556_v17 = vmul.f32 0.03125, %v1554_v15 }
 0xa07   : > { %1916 = vrsqrt.f32 %v1557_v16  ;;  %v1558_v18 = vadd.f32 1e-05, %v1556_v17 }
 0xa09   : > { %1918 = vrsqrt.f32 %v1558_v18 }
 0xa11   : > { %v1917_v19 = vpop.eup %1916 }
 0xa12   : > { %v1561_v21 = vmul.f32 %v1917_v19, %v1545_v6 }
 0xa13   : > { %v1919_v3 = vpop.eup %1918 }
 0xa14   : > { %v1569_v22 = vmul.f32 %v1701_v20, %v1561_v21  ;;  %v1562_v23 = vmul.f32 %v1919_v3, %v1546_v8 }
 0xa16   : > { %v1577_v24 = vadd.f32 %v1702_v4, %v1569_v22  ;;  %v1570_v25 = vmul.f32 %v1701_v20, %v1562_v23 }
 0xa18   : > { %1579 = vst.msk [vmem:[%s582_s29] sm:$0xff] %vm615_vm1, %v1577_v24  ;;  %v1578_v26 = vadd.f32 %v1702_v4, %v1570_v25 }
 0xa1a   : > { %1580 = vst.msk [vmem:[%s582_s29 + $0x8] sm:$0x3f] %vm1337_vm8, %v1578_v26 }
 0xa1b PF: > { %s27_s24 = sadd.s32 1, %s1926_s24  }
 0xa1c   : > { %p24_p4 = scmp.ge.s32.totalorder %s27_s24, 4  }
 0xa1e   :  { %26 = sbr.rel (!%p24_p4) target bundleno = 3 (0x3), region = 124 }

// kernel: cross_self_attention_fixcross_forward.7
= control target key start
LH: loop header
LB: loop body
LE: loop exit
PB: predicated region body
PF: predicated region fallthrough
CT: control target
= control target key end

     0   :  { %s3277_s6 = smov 1   ;;  %s3278_s10 = smov 2   ;;  %s3869_s0 = inlined_call_operand.smem [shape: u32[30], index: -1, kind: input, shape index: {}] }
   0x1   :  { %s3331_s5 = sld [smem:[%s3869_s0]]   ;;  %s3279_s14 = smov 3  }
   0x2   :  { %s3336_s9 = sld [smem:[%s3869_s0 + %s3277_s6]]   ;;  %s3280_s18 = smov 4  }
   0x3   :  { %s3341_s13 = sld [smem:[%s3869_s0 + %s3278_s10]]   ;;  %s3281_s22 = smov 5  }
   0x4   :  { %s3346_s17 = sld [smem:[%s3869_s0 + %s3279_s14]]   ;;  %s3282_s26 = smov 6  }
   0x5   :  { %s3351_s21 = sld [smem:[%s3869_s0 + %s3280_s18]]   ;;  %s3283_s30 = smov 7  }
   0x6   :  { %s3356_s25 = sld [smem:[%s3869_s0 + %s3281_s22]]   ;;  %s3284_s4 = smov 8  }
   0x7   :  { %3876 = sst [smem:[#allocation5_spill]] %s3331_s5  ;;  %s3285_s10 = smov 9  }
   0x8   :  { %3877 = sst [smem:[#allocation6_spill]] %s3336_s9  ;;  %s3286_s15 = smov 10  }
   0x9   :  { %3878 = sst [smem:[#allocation7_spill]] %s3341_s13  ;;  %s3287_s20 = smov 11  }
   0xa   :  { %s3361_s29 = sld [smem:[%s3869_s0 + %s3282_s26]]   ;;  %s3288_s26 = smov 12  }
   0xb   :  { %3879 = sst [smem:[#allocation8_spill]] %s3351_s21  ;;  %s3289_s1 = smov 13  }
   0xc   :  { %3880 = sst [smem:[#allocation9_spill]] %s3356_s25  ;;  %s3290_s7 = smov 14  }
   0xd   :  { %s3366_s3 = sld [smem:[%s3869_s0 + %s3283_s30]]   ;;  %s3292_s22 = smov 16  }
   0xe   :  { %s3371_s8 = sld [smem:[%s3869_s0 + %s3284_s4]]   ;;  %s3293_s28 = smov 17  }
   0xf   :  { %s3376_s14 = sld [smem:[%s3869_s0 + %s3285_s10]]  }
  0x10   :  { %s3381_s19 = sld [smem:[%s3869_s0 + %s3286_s15]]   ;;  %s3291_s15 = smov 15  }
  0x11   :  { %s3386_s24 = sld [smem:[%s3869_s0 + %s3287_s20]]  }
  0x12   :  { %s3391_s30 = sld [smem:[%s3869_s0 + %s3288_s26]]  }
  0x13   :  { %3881 = sst [smem:[#allocation10_spill]] %s3366_s3 }
  0x14   :  { %3882 = sst [smem:[#allocation11_spill]] %s3371_s8 }
  0x15   :  { %3883 = sst [smem:[#allocation12_spill]] %s3376_s14 }
  0x16   :  { %s3396_s6 = sld [smem:[%s3869_s0 + %s3289_s1]]  }
  0x17   :  { %s3401_s12 = sld [smem:[%s3869_s0 + %s3290_s7]]   ;;  %s3294_s7 = smov 18  }
  0x18   :  { %s3406_s20 = sld [smem:[%s3869_s0 + %s3291_s15]]   ;;  %s3295_s15 = smov 19  }
  0x19   :  { %s3411_s27 = sld [smem:[%s3869_s0 + %s3292_s22]]   ;;  %s3296_s22 = smov 20  }
  0x1a   :  { %s3416_s4 = sld [smem:[%s3869_s0 + %s3293_s28]]   ;;  %s3297_s28 = smov 21  }
  0x1c   :  { %3884 = sst [smem:[#allocation13_spill]] %s3396_s6 }
  0x1d   :  { %3885 = sst [smem:[#allocation14_spill]] %s3401_s12 }
  0x1e   :  { %3886 = sst [smem:[#allocation15_spill]] %s3406_s20 }
  0x1f   :  { %s3421_s12 = sld [smem:[%s3869_s0 + %s3294_s7]]   ;;  %s3298_s7 = smov 22  }
  0x20   :  { %3887 = sst [smem:[#allocation16_spill]] %s3416_s4 }
  0x21   :  { %s3426_s20 = sld [smem:[%s3869_s0 + %s3295_s15]]   ;;  %s3299_s15 = smov 23  }
  0x22   :  { %s3431_s6 = sld [smem:[%s3869_s0 + %s3296_s22]]   ;;  %s3300_s22 = smov 24  }
  0x23   :  { %s3436_s4 = sld [smem:[%s3869_s0 + %s3297_s28]]   ;;  %s3301_s28 = smov 25  }
  0x25   :  { %3888 = sst [smem:[#allocation17_spill]] %s3421_s12 }
  0x26   :  { %s3441_s12 = sld [smem:[%s3869_s0 + %s3298_s7]]   ;;  %s3302_s7 = smov 26  }
  0x27   :  { %3889 = sst [smem:[#allocation18_spill]] %s3426_s20 }
  0x28   :  { %3890 = sst [smem:[#allocation19_spill]] %s3431_s6 }
  0x29   :  { %3891 = sst [smem:[#allocation20_spill]] %s3436_s4 }
  0x2a   :  { %s3446_s20 = sld [smem:[%s3869_s0 + %s3299_s15]]   ;;  %s3303_s15 = smov 27  }
  0x2b   :  { %s3451_s6 = sld [smem:[%s3869_s0 + %s3300_s22]]   ;;  %s3304_s22 = smov 28  }
  0x2c   :  { %3892 = sst [smem:[#allocation21_spill]] %s3441_s12 }
  0x2d   :  { %s3456_s4 = sld [smem:[%s3869_s0 + %s3301_s28]]   ;;  %s3305_s28 = smov 29  }
  0x2e   :  { %s3461_s12 = sld [smem:[%s3869_s0 + %s3302_s7]]  }
  0x30   :  { %3893 = sst [smem:[#allocation22_spill]] %s3446_s20 }
  0x31   :  { %3894 = sst [smem:[#allocation23_spill]] %s3451_s6 }
  0x32   :  { %s3466_s20 = sld [smem:[%s3869_s0 + %s3303_s15]]  }
  0x33   :  { %3895 = sst [smem:[#allocation24_spill]] %s3456_s4 }
  0x34   :  { %s3471_s6 = sld [smem:[%s3869_s0 + %s3304_s22]]  }
  0x35   :  { %s3476_s4 = sld [smem:[%s3869_s0 + %s3305_s28]]  }
  0x36   :  { %65 = vsyncpa [#allocation3], 0 }
  0x37   :  { %67 = vsyncpa [#allocation3 + $0x1], 0  ;;  %s3478_s7 = smov 0   ;;  %s3480_s10 = smov 0  }
  0x38   :  { %s3482_s11 = smov 0   ;;  %s3484_s15 = smov 0  }
  0x39 LB: > { %s3896_s8 = sld [smem:[#allocation11_spill]]  ;;  %s3897_s21 = sld [smem:[#allocation8_spill]]  ;;  %s3267_s10 = sphi %s3480_s10, %s3919_s10   ;;  %s3263_s7 = sphi %s3478_s7, %s3918_s7   ;;  %s3275_s15 = sphi %s3484_s15, %s3921_s15   ;;  %s3271_s11 = sphi %s3482_s11, %s3920_s11  }
  0x3a   : > { %s3499_s0 = sadd.s32 4294967295, %s3275_s15   ;;  %s2763_s16 = sadd.s32 4294967294, %s3275_s15  }
  0x3b   : > { %s3503_s18 = sadd.s32 1, %s3275_s15   ;;  %s688_s22 = sadd.s32 1, %s3271_s11 }
  0x3c   : > { %s685_s23 = ssub.s32 %s3275_s15, %s3503_s18  ;;  %p698_p0 = scmp.ne.s32.totalorder %s3271_s11, %s3267_s10 }
  0x3d   : > { %p686_p1 = scmp.eq.s32.totalorder %s685_s23, 0  ;;  %p699_p2 = scmp.eq.s32.totalorder %s3499_s0, 1 }
  0x3e   : > { %p704_p3 = scmp.ne.s32.totalorder %s3267_s10, %s3263_s7  ;;  %p705_p4 = scmp.eq.s32.totalorder %s2763_s16, 1 }
  0x3f   : > { %s3514_s26 = scalar_select %p686_p1, %s3271_s11, %s688_s22  }
  0x40   : > { %p3516_p5 = por %p699_p2, %p698_p0  ;;  %p3520_p6 = por %p705_p4, %p704_p3 }
  0x41   : > { %p2766_p7 = scmp.ge.s32.totalorder %s3275_s15, 1  ;;  %p847_p8 = scmp.lt.s32.totalorder %s3275_s15, 3 }
  0x43   : > { %p848_p9 = pnand %p2766_p7, %p847_p8 }
  0x44   : > { %s3900_s5 = sld [smem:[#allocation5_spill]] (!%p848_p9)  ;;  %v3149_v0 = vld [vmem:[%s3897_s21] sm:$0xff] (!%p848_p9)   ;;  %v3306_v1 = vmov (!%p848_p9), 0.0   ;;  %s3901_s9 = sld [smem:[#allocation6_spill]] (!%p848_p9)  ;;  %v3150_v2 = vld [vmem:[%s3897_s21 + $0x8] sm:$0xff] (!%p848_p9)   ;;  %vm3307_vm0 = vmmov (!%p848_p9), 0  }
  0x45   : > { %851 = sbr.rel (%p848_p9) target bundleno = 2714 (0xa9a), region = 132  ;;  %2897 = vmatprep.subr.bf16.mxu1 (!%p848_p9), %v3306_v1  ;;  %2913 = vmatprep.subr.bf16.mxu0 (!%p848_p9), %v3306_v1  ;;  %p936_p10 = scmp.lt.s32.totalorder (!%p848_p9), %s3499_s0, 1  ;;  %v3151_v3 = vld [vmem:[%s3361_s29] sm:$0xff] (!%p848_p9)   ;;  %vm983_vm1 = vcmask (!%p848_p9), 261120   ;;  %v3152_v6 = vld [vmem:[%s3361_s29 + $0x8] sm:$0xff] (!%p848_p9)   ;;  %vm1111_vm2 = vcmask (!%p848_p9), 64512  }
  0x46   : > { %2898 = vmatpush3.bf16.msra.mxu1 (!%p848_p9), %v3149_v0  ;;  %2901 = vmatprep.mubr.msk.bf16.mxu1 (!%p848_p9), %vm3307_vm0, %v3306_v1  ;;  %s3902_s25 = sld [smem:[#allocation9_spill]] (!%p848_p9)  ;;  %s3903_s3 = sld [smem:[#allocation10_spill]] (!%p848_p9)  ;;  %vm1158_vm3 = vcmask (!%p848_p9), 62464   ;;  %vm1269_vm4 = vcmask (!%p848_p9), 48128   ;;  %vm1176_vm5 = vcmask (!%p848_p9), 1043456   ;;  %vm1287_vm6 = vcmask (!%p848_p9), 1042432  }
  0x47   : > { %2899 = vmatprep.subr.bf16.mxu1 (!%p848_p9), %v3306_v1  ;;  %2915 = vmatprep.mubr.msk.bf16.mxu0 (!%p848_p9), %vm3307_vm0, %v3306_v1  ;;  %s3313_s21 = smov (!%p848_p9), 104   ;;  %s3904_s13 = sld [smem:[#allocation7_spill]] (!%p848_p9)  ;;  %vm2004_vm7 = vcmask (!%p848_p9), 130048   ;;  %vm2006_vm8 = vcmask (!%p848_p9), 195584   ;;  %vm2191_vm9 = vcmask (!%p848_p9), 259072   ;;  %vm2335_vm10 = vcmask (!%p848_p9), 523264  }
  0x48   : > { %s3905_s14 = sld [smem:[#allocation12_spill]] (!%p848_p9) }
  0x4a   : > { %2900 = vmatpush3.bf16.msra.mxu1 (!%p848_p9), %v3150_v2 }
  0x4b   : > { %2905 = vmatprep.subr.bf16.mxu1 (!%p848_p9), %v3306_v1 }
  0x4c   : > { %s3537_s2 = scalar_select %p936_p10, %s3499_s0, 1  ;;  %v2771_v9 = vld [vmem:[%s3902_s25] ss:$0 sm:$0xff] }
  0x4d   : > { %v2775_v16 = vld [vmem:[%s3903_s3] ss:$0 sm:$0xff]  ;;  %s3312_s3 = smov 80   ;;  %s3314_s25 = smov 72  }
  0x4e   : > { %s3540_s16 = sshll.u32 %s3537_s2, 3 }
  0x4f   : > { %s939_s22 = scalar_lea.vmem %s3900_s5, %s3540_s16  ;;  %s943_s23 = scalar_lea.vmem %s3901_s9, %s3540_s16 }
  0x50   : > { %v3546_v4 = vld [vmem:[%s939_s22] sm:$0xff]  ;;  %s3308_s22 = smov 88   ;;  %s3310_s5 = smov 120  }
  0x51   : > { %v963_v5 = vpack.c.bf16 %v3546_v4, %v3546_v4  ;;  %v3553_v7 = vld [vmem:[%s943_s23] sm:$0x3f]  ;;  %s3309_s23 = smov 96   ;;  %s3311_s9 = smov 112  }
  0x52   : > { %v1031_v8 = vpack.c.bf16 %v3553_v7, %v3553_v7 }
  0x53   : > { %2902 = vmatmul.mubr.msk.bf16.vlgmr.msra.gmra.mrb[0].mxu1 %vm983_vm1, %v963_v5 }
  0x54   : > { %2906 = vmatpush3.bf16.msra.mxu1 %v3151_v3  ;;  %2909 = vmatprep.mubr.msk.bf16.mxu1 %vm3307_vm0, %v3306_v1 }
  0x55   : > { %2907 = vmatprep.subr.bf16.mxu1 %v3306_v1 }
  0x58   : > { %2908 = vmatpush3.bf16.msra.mxu1 %v3152_v6 }
  0x59   : > { %2919 = vmatprep.subr.bf16.mxu1 %v3306_v1 }
  0x5b   : > { %2910 = vmatmul.mubr.msk.bf16.vlgmr.msra.gmra.mrb[4].mxu1 %vm983_vm1, %v1031_v8 }
  0x5c   : > { %2921 = vmatprep.mubr.msk.bf16.mxu1 %vm3307_vm0, %v3306_v1 }
 0x126   : > { %v1021_v10 = vpop.f32.mrb[0].mxu1 }
 0x127   : > { %v1022_v11 = vadd.f32 %v2771_v9, %v1021_v10  ;;  %v2903_v12 = vpop.f32.mrb[1].mxu1 }
 0x128   : > { %v1024_v13 = vpop.f32.mrb[2].mxu1 }
 0x129   : > { %v3566_v14 = vpack.c.bf16 %v1022_v11, %v1022_v11  ;;  %v2904_v15 = vpop.f32.mrb[3].mxu1 }
 0x12b   : > { %1333 = vrot.lane.b32.xlu1 %v3566_v14, %s3308_s22  ;;  %1109 = vrot.lane.b32.xlu0 %v3566_v14, %s3309_s23 }
 0x12e   : > { %v1088_v17 = vpop.f32.mrb[4].mxu1 }
 0x12f   : > { %v1089_v18 = vadd.f32 %v2775_v16, %v1088_v17  ;;  %v2911_v19 = vpop.f32.mrb[5].mxu1 }
 0x130   : > { %v1091_v20 = vpop.f32.mrb[6].mxu1 }
 0x131   : > { %v3571_v21 = vpack.c.bf16 %v1089_v18, %v1089_v18  ;;  %v2912_v22 = vpop.f32.mrb[7].mxu1 }
 0x133   : > { %1331 = vrot.lane.b32.xlu1 %v3571_v21, %s3310_s5  ;;  %1221 = vrot.lane.b32.xlu0 %v3571_v21, %s3309_s23  ;;  %s3320_s23 = smov 16  }
 0x137   : > { %1441 = vrot.lane.b32.xlu1 %v3566_v14, %s3310_s5  ;;  %1443 = vrot.lane.b32.xlu0 %v3571_v21, %s3308_s22  ;;  %s946_s5 = scalar_lea.vmem %s3904_s13, %s3537_s2  ;;  %s3319_s22 = smov 8  }
 0x138   : > { %v2779_v45 = vld [vmem:[%s946_s5] ss:$0 sm:$0xff]  ;;  %s3321_s5 = smov 24  }
 0x13b   : > { %1551 = vrot.lane.b32.xlu1 %v3571_v21, %s3311_s9  ;;  %1553 = vrot.lane.b32.xlu0 %v3566_v14, %s3312_s3 }
 0x13f   : > { %1661 = vrot.lane.b32.xlu1 %v3566_v14, %s3311_s9  ;;  %1663 = vrot.lane.b32.xlu0 %v3571_v21, %s3312_s3  ;;  %s949_s9 = scalar_lea.vmem %s3346_s17, %s3537_s2  ;;  %s3317_s3 = smov 48  }
 0x140   : > { %v2780_v52 = vld [vmem:[%s949_s9] ss:$0 sm:$0xff]  ;;  %s3318_s2 = smov 40   ;;  %s3906_s9 = sld [smem:[#allocation13_spill]] }
 0x143   : > { %1771 = vrot.lane.b32.xlu1 %v3571_v21, %s3313_s21  ;;  %1773 = vrot.lane.b32.xlu0 %v3566_v14, %s3314_s25 }
 0x147   : > { %1881 = vrot.lane.b32.xlu1 %v3566_v14, %s3313_s21  ;;  %1883 = vrot.lane.b32.xlu0 %v3571_v21, %s3314_s25  ;;  %s3315_s21 = smov 64   ;;  %s3316_s25 = smov 56  }
 0x19d   : > { %v1110_v23 = vpop.permute.xlu0 %1109  ;;  %v1334_v27 = vpop.permute.xlu1 %1333 }
 0x19e   : > { %v1116_v24 = vsel %vm1111_vm2, %v1110_v23, 0  ;;  %v1339_v28 = vsel %vm1111_vm2, %v1334_v27, 0 }
 0x19f   : > { %2914 = vmatpush3.bf16.xpose.msra.mxu0 %v1116_v24 }
 0x1a0   : > { %2925 = vmatprep.subr.bf16.mxu0 %v3306_v1 }
 0x1a5   : > { %v1222_v25 = vpop.permute.xlu0 %1221  ;;  %v1332_v30 = vpop.permute.xlu1 %1331 }
 0x1a6   : > { %v1227_v26 = vsel %vm1111_vm2, %v1222_v25, 0  ;;  %2916 = vmatmul.mubr.msk.bf16.vlgmr.msra.gmra.mrb[0].mxu0 %vm1111_vm2, %v3571_v21 }
 0x1a7   : > { %2926 = vmatpush3.bf16.xpose.msra.mxu0 %v1227_v26  ;;  %2927 = vmatprep.mubr.msk.bf16.mxu0 %vm3307_vm0, %v3306_v1 }
 0x1a8   : > { %2937 = vmatprep.subr.bf16.mxu0 %v3306_v1 }
 0x1a9   : > { %v1444_v29 = vpop.permute.xlu0 %1443  ;;  %v1442_v33 = vpop.permute.xlu1 %1441 }
 0x1aa   : > { %v1449_v31 = vsel %vm1111_vm2, %v1444_v29, 0 }
 0x1ad   : > { %v1554_v32 = vpop.permute.xlu0 %1553  ;;  %v1552_v36 = vpop.permute.xlu1 %1551 }
 0x1ae   : > { %2928 = vmatmul.mubr.msk.bf16.vlgmr.msra.gmra.mrb[4].mxu0 %vm1111_vm2, %v3566_v14  ;;  %v1559_v34 = vsel %vm1111_vm2, %v1554_v32, 0 }
 0x1af   : > { %2938 = vmatpush3.bf16.xpose.msra.mxu0 %v1339_v28  ;;  %2939 = vmatprep.mubr.msk.bf16.mxu0 %vm3307_vm0, %v3306_v1 }
 0x1b0   : > { %2949 = vmatprep.subr.bf16.mxu0 %v3306_v1 }
 0x1b1   : > { %v1664_v35 = vpop.permute.xlu0 %1663  ;;  %v1662_v39 = vpop.permute.xlu1 %1661 }
 0x1b2   : > { %v1669_v37 = vsel %vm1111_vm2, %v1664_v35, 0 }
 0x1b5   : > { %v1774_v38 = vpop.permute.xlu0 %1773  ;;  %v1772_v42 = vpop.permute.xlu1 %1771 }
 0x1b6   : > { %2940 = vmatmul.mubr.msk.bf16.vlgmr.msra.gmra.mrb[8].mxu0 %vm1111_vm2, %v1332_v30  ;;  %v1779_v40 = vsel %vm1111_vm2, %v1774_v38, 0 }
 0x1b7   : > { %2950 = vmatpush3.bf16.xpose.msra.mxu0 %v1449_v31  ;;  %2951 = vmatprep.mubr.msk.bf16.mxu0 %vm3307_vm0, %v3306_v1 }
 0x1b8   : > { %2961 = vmatprep.subr.bf16.mxu0 %v3306_v1 }
 0x1b9   : > { %v1884_v41 = vpop.permute.xlu0 %1883  ;;  %v1882_v44 = vpop.permute.xlu1 %1881 }
 0x1ba   : > { %v1889_v43 = vsel %vm1111_vm2, %v1884_v41, 0 }
 0x1be   : > { %2952 = vmatmul.mubr.msk.bf16.vlgmr.msra.gmra.mrb[12].mxu0 %vm1111_vm2, %v1442_v33 }
 0x1bf   : > { %2962 = vmatpush3.bf16.xpose.msra.mxu0 %v1559_v34  ;;  %2963 = vmatprep.mubr.msk.bf16.mxu0 %vm3307_vm0, %v3306_v1 }
 0x1c0   : > { %2973 = vmatprep.subr.bf16.mxu0 %v3306_v1 }
 0x1c6   : > { %2964 = vmatmul.mubr.msk.bf16.vlgmr.msra.gmra.mrb[16].mxu0 %vm1111_vm2, %v1552_v36 }
 0x1c7   : > { %2974 = vmatpush3.bf16.xpose.msra.mxu0 %v1669_v37  ;;  %2975 = vmatprep.mubr.msk.bf16.mxu0 %vm3307_vm0, %v3306_v1 }
 0x1c8   : > { %2985 = vmatprep.subr.bf16.mxu0 %v3306_v1 }
 0x1ce   : > { %2976 = vmatmul.mubr.msk.bf16.vlgmr.msra.gmra.mrb[20].mxu0 %vm1111_vm2, %v1662_v39 }
 0x1cf   : > { %2986 = vmatpush3.bf16.xpose.msra.mxu0 %v1779_v40  ;;  %2987 = vmatprep.mubr.msk.bf16.mxu0 %vm3307_vm0, %v3306_v1 }
 0x1d0   : > { %2997 = vmatprep.subr.bf16.mxu0 %v3306_v1 }
 0x1d6   : > { %2988 = vmatmul.mubr.msk.bf16.vlgmr.msra.gmra.mrb[24].mxu0 %vm1111_vm2, %v1772_v42 }
 0x1d7   : > { %2998 = vmatpush3.bf16.xpose.msra.mxu0 %v1889_v43  ;;  %2999 = vmatprep.mubr.msk.bf16.mxu0 %vm3307_vm0, %v3306_v1 }
 0x1d8   : > { %3009 = vmatprep.subr.bf16.mxu0 %v3306_v1 }
 0x1de   : > { %3000 = vmatmul.mubr.msk.bf16.vlgmr.msra.gmra.mrb[28].mxu0 %vm1111_vm2, %v1882_v44 }
 0x1df   : > { %3013 = vmatprep.mubr.msk.bf16.mxu0 %vm3307_vm0, %v3306_v1 }
 0x279   : > { %v1152_v46 = vpop.f32.mrb[0].mxu0 }
 0x27a   : > { %v3629_v47 = vadd.f32 %v2779_v45, %v1152_v46  ;;  %v2917_v48 = vpop.f32.mrb[1].mxu0 }
 0x27b   : > { %v1155_v49 = vpop.f32.mrb[2].mxu0 }
 0x27c   : > { %v2918_v50 = vpop.f32.mrb[3].mxu0  ;;  %v1159_v51 = vsel %vm1158_vm3, %v3629_v47, -inf }
 0x27d   : > { %1160 = vmax.xlane.f32.xlu0 %v1159_v51 }
 0x281   : > { %v1263_v53 = vpop.f32.mrb[4].mxu0 }
 0x282   : > { %v1264_v54 = vadd.f32 %v2780_v52, %v1263_v53  ;;  %v2929_v55 = vpop.f32.mrb[5].mxu0 }
 0x283   : > { %v1266_v56 = vpop.f32.mrb[6].mxu0 }
 0x284   : > { %v2930_v57 = vpop.f32.mrb[7].mxu0  ;;  %v1270_v58 = vsel %vm1269_vm4, %v1264_v54, -inf }
 0x285   : > { %1271 = vmax.xlane.f32.xlu1 %v1270_v58 }
 0x289   : > { %v1375_v59 = vpop.f32.mrb[8].mxu0 }
 0x28a   : > { %v1376_v60 = vadd.f32 %v2779_v45, %v1375_v59  ;;  %v2941_v61 = vpop.f32.mrb[9].mxu0 }
 0x28b   : > { %v1378_v62 = vpop.f32.mrb[10].mxu0 }
 0x28c   : > { %v2942_v63 = vpop.f32.mrb[11].mxu0  ;;  %v1381_v0 = vsel %vm1158_vm3, %v1376_v60, -inf }
 0x28d   : > { %1382 = vmax.xlane.f32.xlu0 %v1381_v0 }
 0x291   : > { %v1485_v2 = vpop.f32.mrb[12].mxu0 }
 0x292   : > { %v3637_v3 = vadd.f32 %v2780_v52, %v1485_v2  ;;  %v2953_v5 = vpop.f32.mrb[13].mxu0 }
 0x293   : > { %v1488_v6 = vpop.f32.mrb[14].mxu0 }
 0x294   : > { %v2954_v8 = vpop.f32.mrb[15].mxu0  ;;  %v1491_v9 = vsel %vm1269_vm4, %v3637_v3, -inf }
 0x295   : > { %1492 = vmax.xlane.f32.xlu0 %v1491_v9 }
 0x299   : > { %v1595_v10 = vpop.f32.mrb[16].mxu0 }
 0x29a   : > { %v3641_v11 = vadd.f32 %v2779_v45, %v1595_v10  ;;  %v2965_v12 = vpop.f32.mrb[17].mxu0 }
 0x29b   : > { %v1598_v13 = vpop.f32.mrb[18].mxu0 }
 0x29c   : > { %v2966_v15 = vpop.f32.mrb[19].mxu0  ;;  %v1601_v16 = vsel %vm1158_vm3, %v3641_v11, -inf }
 0x29d   : > { %1602 = vmax.xlane.f32.xlu1 %v1601_v16 }
 0x2a1   : > { %v1705_v17 = vpop.f32.mrb[20].mxu0 }
 0x2a2   : > { %v3645_v18 = vadd.f32 %v2780_v52, %v1705_v17  ;;  %v2977_v19 = vpop.f32.mrb[21].mxu0 }
 0x2a3   : > { %v1708_v20 = vpop.f32.mrb[22].mxu0 }
 0x2a4   : > { %v2978_v22 = vpop.f32.mrb[23].mxu0  ;;  %v1711_v23 = vsel %vm1269_vm4, %v3645_v18, -inf }
 0x2a5   : > { %1712 = vmax.xlane.f32.xlu0 %v1711_v23 }
 0x2a9   : > { %v1815_v24 = vpop.f32.mrb[24].mxu0 }
 0x2aa   : > { %v1816_v25 = vadd.f32 %v2779_v45, %v1815_v24  ;;  %v2989_v26 = vpop.f32.mrb[25].mxu0 }
 0x2ab   : > { %v1818_v27 = vpop.f32.mrb[26].mxu0 }
 0x2ac   : > { %v2990_v28 = vpop.f32.mrb[27].mxu0  ;;  %v1821_v29 = vsel %vm1158_vm3, %v1816_v25, -inf }
 0x2ad   : > { %1822 = vmax.xlane.f32.xlu1 %v1821_v29 }
 0x2b1   : > { %v1925_v30 = vpop.f32.mrb[28].mxu0 }
 0x2b2   : > { %v3650_v31 = vadd.f32 %v2780_v52, %v1925_v30  ;;  %v3001_v32 = vpop.f32.mrb[29].mxu0 }
 0x2b3   : > { %v1928_v33 = vpop.f32.mrb[30].mxu0 }
 0x2b4   : > { %v3002_v34 = vpop.f32.mrb[31].mxu0  ;;  %v1931_v35 = vsel %vm1269_vm4, %v3650_v31, -inf }
 0x2bb   : > { %1282 = vrot.lane.b32.xlu0 %v3571_v21, %s3315_s21 }
 0x2be   : > { %1171 = vrot.lane.b32.xlu1 %v3566_v14, %s3315_s21  ;;  %s3907_s21 = sld [smem:[#allocation14_spill]] }
 0x2da   : > { %1932 = vmax.xlane.f32.xlu0 %v1931_v35 }
 0x30a   : > { %v1161_v36 = vpop.xlane.xlu0 %1160 }
 0x30b   : > { %v1162_v37 = vsub.f32 %v3629_v47, %v1161_v36 }
 0x30d   : > { %v1163_v38 = vmul.f32 1.442695, %v1162_v37 }
 0x30f   : > { %3169 = vpow2.f32 %v1163_v38 }
 0x312   : > { %v1272_v39 = vpop.xlane.xlu1 %1271 }
 0x313   : > { %v1273_v40 = vsub.f32 %v1264_v54, %v1272_v39 }
 0x315   : > { %v1274_v41 = vmul.f32 1.442695, %v1273_v40 }
 0x317   : > { %3171 = vpow2.f32 %v1274_v41 }
 0x319   : > { %v3657_v42 = vpop.eup %3169 }
 0x31a   : > { %v1383_v43 = vpop.xlane.xlu0 %1382  ;;  %v1165_v44 = vsel %vm1158_vm3, %v3657_v42, 0.0 }
 0x31b   : > { %v1384_v45 = vsub.f32 %v1376_v60, %v1383_v43  ;;  %1166 = vadd.xlane.f32.xlu1 %v1165_v44 }
 0x31d   : > { %v1385_v46 = vmul.f32 1.442695, %v1384_v45 }
 0x31f   : > { %3173 = vpow2.f32 %v1385_v46 }
 0x321   : > { %v3661_v48 = vpop.eup %3171 }
 0x322   : > { %v1276_v47 = vsel %vm1269_vm4, %v3661_v48, 0.0  ;;  %v1493_v54 = vpop.xlane.xlu0 %1492 }
 0x323   : > { %1277 = vadd.xlane.f32.xlu0 %v1276_v47  ;;  %v1494_v56 = vsub.f32 %v3637_v3, %v1493_v54 }
 0x325   : > { %v1495_v57 = vmul.f32 1.442695, %v1494_v56 }
 0x327   : > { %3175 = vpow2.f32 %v1495_v57 }
 0x329   : > { %v3665_v49 = vpop.eup %3173 }
 0x32a   : > { %v1387_v50 = vsel %vm1158_vm3, %v3665_v49, 0.0  ;;  %v1603_v51 = vpop.xlane.xlu1 %1602 }
 0x32b   : > { %1388 = vadd.xlane.f32.xlu1 %v1387_v50  ;;  %v1604_v58 = vsub.f32 %v3641_v11, %v1603_v51 }
 0x32d   : > { %v1605_v61 = vmul.f32 1.442695, %v1604_v58 }
 0x32f   : > { %3177 = vpow2.f32 %v1605_v61 }
 0x331   : > { %v3176_v2 = vpop.eup %3175 }
 0x332   : > { %v1713_v59 = vpop.xlane.xlu0 %1712  ;;  %v1497_v5 = vsel %vm1269_vm4, %v3176_v2, 0.0 }
 0x333   : > { %v1714_v60 = vsub.f32 %v3645_v18, %v1713_v59 }
 0x335   : > { %v1715_v63 = vmul.f32 1.442695, %v1714_v60 }
 0x336   : > { %v1283_v12 = vpop.permute.xlu0 %1282 }
 0x337   : > { %3179 = vpow2.f32 %v1715_v63 }
 0x339   : > { %1393 = vrot.lane.b32.xlu0 %v3566_v14, %s3316_s25  ;;  %v3677_v6 = vpop.eup %3177 }
 0x33a   : > { %v1823_v52 = vpop.xlane.xlu1 %1822  ;;  %v1607_v8 = vsel %vm1158_vm3, %v3677_v6, 0.0 }
 0x33b   : > { %v1824_v62 = vsub.f32 %v1816_v25, %v1823_v52  ;;  %v1289_v25 = vsel %vm1287_vm6, %v1283_v12, 0 }
 0x33c   : > { %1503 = vrot.lane.b32.xlu1 %v3571_v21, %s3316_s25  ;;  %s3908_s25 = sld [smem:[#allocation21_spill]] }
 0x33d   : > { %v1825_v0 = vmul.f32 1.442695, %v1824_v62 }
 0x33e   : > { %v1172_v53 = vpop.permute.xlu1 %1171 }
 0x33f   : > { %v1178_v55 = vsel %vm1176_vm5, %v1172_v53, 0  ;;  %3181 = vpow2.f32 %v1825_v0 }
 0x340   : > { %2920 = vmatpush3.bf16.msra.mxu1 %v1178_v55 }
 0x341   : > { %2931 = vmatprep.subr.bf16.mxu1 %v3306_v1  ;;  %v3679_v3 = vpop.eup %3179 }
 0x342   : > { %v1717_v10 = vsel %vm1269_vm4, %v3679_v3, 0.0 }
 0x349   : > { %v3683_v9 = vpop.eup %3181 }
 0x34a   : > { %v1827_v11 = vsel %vm1158_vm3, %v3683_v9, 0.0 }
 0x358   : > { %1498 = vadd.xlane.f32.xlu0 %v1497_v5 }
 0x35c   : > { %1608 = vadd.xlane.f32.xlu0 %v1607_v8 }
 0x360   : > { %1718 = vadd.xlane.f32.xlu1 %v1717_v10  ;;  %1828 = vadd.xlane.f32.xlu0 %v1827_v11 }
 0x367   : > { %v1933_v13 = vpop.xlane.xlu0 %1932 }
 0x368   : > { %v1934_v15 = vsub.f32 %v3650_v31, %v1933_v13 }
 0x36a   : > { %v1935_v16 = vmul.f32 1.442695, %v1934_v15 }
 0x36c   : > { %3183 = vpow2.f32 %v1935_v16 }
 0x371   : > { %1723 = vrot.lane.b32.xlu1 %v3571_v21, %s3317_s3 }
 0x375   : > { %1833 = vrot.lane.b32.xlu1 %v3566_v14, %s3318_s2 }
 0x376   : > { %v3692_v17 = vpop.eup %3183 }
 0x377   : > { %v1937_v18 = vsel %vm1269_vm4, %v3692_v17, 0.0 }
 0x378   : > { %1938 = vadd.xlane.f32.xlu0 %v1937_v18 }
 0x379   : > { %1943 = vrot.lane.b32.xlu1 %v3571_v21, %s3318_s2  ;;  %s3910_s2 = sld [smem:[#allocation17_spill]] }
 0x38e   : > { %1613 = vrot.lane.b32.xlu0 %v3566_v14, %s3317_s3  ;;  %s3909_s3 = sld [smem:[#allocation15_spill]] }
 0x3a8   : > { %v1167_v19 = vpop.xlane.xlu1 %1166 }
 0x3a9   : > { %3185 = vrcp.f32 %v1167_v19 }
 0x3b0   : > { %v1278_v20 = vpop.xlane.xlu0 %1277 }
 0x3b1   : > { %3187 = vrcp.f32 %v1278_v20 }
 0x3b3   : > { %v3186_v22 = vpop.eup %3185 }
 0x3b4   : > { %v1169_v23 = vmul.f32 %v3186_v22, %v3657_v42  ;;  %v1394_v27 = vpop.permute.xlu0 %1393 }
 0x3b5   : > { %v1399_v29 = vsel %vm1176_vm5, %v1394_v27, 0  ;;  %v3154_v27 = vld [vmem:[%s3896_s8 + $0x8] sm:$0xff]  }
 0x3b6   : > { %v1170_v24 = vpack.c.bf16 %v1169_v23, %v1169_v23 }
 0x3b8   : > { %2922 = vmatmul.mubr.msk.bf16.vlgmr.msra.gmra.mrb[8].mxu1 %vm1111_vm2, %v1170_v24  ;;  %v1389_v26 = vpop.xlane.xlu1 %1388  ;;  %v3153_v24 = vld [vmem:[%s3896_s8] sm:$0xff]  }
 0x3b9   : > { %2932 = vmatpush3.bf16.msra.mxu1 %v1289_v25  ;;  %3189 = vrcp.f32 %v1389_v26  ;;  %2933 = vmatprep.mubr.msk.bf16.mxu1 %vm3307_vm0, %v3306_v1 }
 0x3ba   : > { %2943 = vmatprep.subr.bf16.mxu1 %v3306_v1  ;;  %3010 = vmatpush3.bf16.msra.mxu0 %v3153_v24 }
 0x3bb   : > { %v3188_v14 = vpop.eup %3187  ;;  %3011 = vmatprep.subr.bf16.mxu0 %v3306_v1 }
 0x3bc   : > { %v1280_v21 = vmul.f32 %v3188_v14, %v3661_v48  ;;  %v1504_v32 = vpop.permute.xlu1 %1503 }
 0x3bd   : > { %v1509_v34 = vsel %vm1287_vm6, %v1504_v32, 0 }
 0x3be   : > { %v1281_v28 = vpack.c.bf16 %v1280_v21, %v1280_v21  ;;  %3012 = vmatpush3.bf16.msra.mxu0 %v3154_v27 }
 0x3bf   : > { %3025 = vmatprep.subr.bf16.mxu0 %v3306_v1 }
 0x3c0   : > { %2934 = vmatmul.mubr.msk.bf16.vlgmr.msra.gmra.mrb[12].mxu1 %vm1269_vm4, %v1281_v28  ;;  %v3155_v28 = vld [vmem:[%s3381_s19] sm:$0xff]  }
 0x3c1   : > { %2944 = vmatpush3.bf16.msra.mxu1 %v1399_v29  ;;  %2945 = vmatprep.mubr.msk.bf16.mxu1 %vm3307_vm0, %v3306_v1 }
 0x3c2   : > { %2955 = vmatprep.subr.bf16.mxu1 %v3306_v1 }
 0x3c3   : > { %v3190_v30 = vpop.eup %3189 }
 0x3c4   : > { %v1391_v31 = vmul.f32 %v3190_v30, %v3665_v49  ;;  %v3156_v30 = vld [vmem:[%s3381_s19 + $0x8] sm:$0xff]  }
 0x3c6   : > { %v1392_v33 = vpack.c.bf16 %v1391_v31, %v1391_v31 }
 0x3c8   : > { %2946 = vmatmul.mubr.msk.bf16.vlgmr.msra.gmra.mrb[16].mxu1 %vm1111_vm2, %v1392_v33 }
 0x3c9   : > { %2956 = vmatpush3.bf16.msra.mxu1 %v1509_v34  ;;  %2957 = vmatprep.mubr.msk.bf16.mxu1 %vm3307_vm0, %v3306_v1 }
 0x3ca   : > { %2967 = vmatprep.subr.bf16.mxu1 %v3306_v1 }
 0x3e5   : > { %v1499_v35 = vpop.xlane.xlu0 %1498 }
 0x3e6   : > { %3191 = vrcp.f32 %v1499_v35 }
 0x3e9   : > { %v1609_v39 = vpop.xlane.xlu0 %1608 }
 0x3ea   : > { %3193 = vrcp.f32 %v1609_v39 }
 0x3ed   : > { %v1719_v40 = vpop.xlane.xlu1 %1718  ;;  %v1829_v41 = vpop.xlane.xlu0 %1828 }
 0x3ee   : > { %3195 = vrcp.f32 %v1719_v40 }
 0x3ef   : > { %3197 = vrcp.f32 %v1829_v41 }
 0x3f0   : > { %v3192_v36 = vpop.eup %3191 }
 0x3f1   : > { %v1501_v37 = vmul.f32 %v3192_v36, %v3176_v2  ;;  %v1724_v48 = vpop.permute.xlu1 %1723 }
 0x3f2   : > { %v1729_v50 = vsel %vm1287_vm6, %v1724_v48, 0 }
 0x3f3   : > { %v1502_v38 = vpack.c.bf16 %v1501_v37, %v1501_v37 }
 0x3f4   : > { %v3194_v42 = vpop.eup %3193 }
 0x3f5   : > { %2958 = vmatmul.mubr.msk.bf16.vlgmr.msra.gmra.mrb[20].mxu1 %vm1269_vm4, %v1502_v38  ;;  %v1611_v44 = vmul.f32 %v3194_v42, %v3677_v6  ;;  %v1834_v52 = vpop.permute.xlu1 %1833 }
 0x3f6   : > { %2969 = vmatprep.mubr.msk.bf16.mxu1 %vm3307_vm0, %v3306_v1  ;;  %v1839_v55 = vsel %vm1176_vm5, %v1834_v52, 0  ;;  %v2797_v52 = vld [vmem:[%s3905_s14] ss:$0 sm:$0xff] }
 0x3f7   : > { %v1612_v47 = vpack.c.bf16 %v1611_v44, %v1611_v44 }
 0x3f8   : > { %v3196_v49 = vpop.eup %3195 }
 0x3f9   : > { %v1721_v51 = vmul.f32 %v3196_v49, %v3679_v3  ;;  %v3198_v54 = vpop.eup %3197  ;;  %v1944_v57 = vpop.permute.xlu1 %1943 }
 0x3fa   : > { %v1831_v56 = vmul.f32 %v3198_v54, %v3683_v9  ;;  %v1949_v60 = vsel %vm1287_vm6, %v1944_v57, 0 }
 0x3fb   : > { %v1722_v53 = vpack.c.bf16 %v1721_v51, %v1721_v51 }
 0x3fc   : > { %v1832_v58 = vpack.c.bf16 %v1831_v56, %v1831_v56 }
 0x405   : > { %v1939_v43 = vpop.xlane.xlu0 %1938 }
 0x406   : > { %3199 = vrcp.f32 %v1939_v43 }
 0x409   : > { %v1614_v45 = vpop.permute.xlu0 %1613 }
 0x40a   : > { %v1619_v46 = vsel %vm1176_vm5, %v1614_v45, 0 }
 0x40b   : > { %2968 = vmatpush3.bf16.msra.mxu1 %v1619_v46 }
 0x40c   : > { %2979 = vmatprep.subr.bf16.mxu1 %v3306_v1 }
 0x40e   : > { %2970 = vmatmul.mubr.msk.bf16.vlgmr.msra.gmra.mrb[24].mxu1 %vm1111_vm2, %v1612_v47 }
 0x40f   : > { %2980 = vmatpush3.bf16.msra.mxu1 %v1729_v50  ;;  %2981 = vmatprep.mubr.msk.bf16.mxu1 %vm3307_vm0, %v3306_v1 }
 0x410   : > { %2991 = vmatprep.subr.bf16.mxu1 %v3306_v1  ;;  %v3200_v59 = vpop.eup %3199 }
 0x411   : > { %v1941_v61 = vmul.f32 %v3200_v59, %v3692_v17 }
 0x413   : > { %v1942_v62 = vpack.c.bf16 %v1941_v61, %v1941_v61 }
 0x416   : > { %2982 = vmatmul.mubr.msk.bf16.vlgmr.msra.gmra.mrb[28].mxu1 %vm1269_vm4, %v1722_v53 }
 0x417   : > { %2992 = vmatpush3.bf16.msra.mxu1 %v1839_v55  ;;  %2993 = vmatprep.mubr.msk.bf16.mxu1 %vm3307_vm0, %v3306_v1 }
 0x418   : > { %3003 = vmatprep.subr.bf16.mxu1 %v3306_v1 }
 0x41e   : > { %2994 = vmatmul.mubr.msk.bf16.vlgmr.msra.gmra.mrb[32].mxu1 %vm1111_vm2, %v1832_v58  ;;  %v2803_v58 = vld [vmem:[%s3386_s24] ss:$0 sm:$0xff] }
 0x41f   : > { %3004 = vmatpush3.bf16.msra.mxu1 %v1949_v60  ;;  %3005 = vmatprep.mubr.msk.bf16.mxu1 %vm3307_vm0, %v3306_v1 }
 0x420   : > { %3017 = vmatprep.subr.bf16.mxu1 %v3306_v1 }
 0x426   : > { %3006 = vmatmul.mubr.msk.bf16.vlgmr.msra.gmra.mrb[36].mxu1 %vm1269_vm4, %v1942_v62 }
 0x427   : > { %3021 = vmatprep.mubr.msk.bf16.mxu1 %vm3307_vm0, %v3306_v1  ;;  %3018 = vmatpush3.bf16.msra.mxu1 %v3155_v28 }
 0x428   : > { %3019 = vmatprep.subr.bf16.mxu1 %v3306_v1 }
 0x42b   : > { %3020 = vmatpush3.bf16.msra.mxu1 %v3156_v30 }
 0x42c   : > { %3033 = vmatprep.subr.bf16.mxu1 %v3306_v1 }
 0x48b   : > { %v3743_v63 = vpop.f32.mrb[8].mxu1 }
 0x48c   : > { %v2923_v0 = vpop.f32.mrb[9].mxu1 }
 0x48d   : > { %v1217_v2 = vpop.f32.mrb[10].mxu1 }
 0x48e   : > { %v2924_v5 = vpop.f32.mrb[11].mxu1 }
 0x493   : > { %v1325_v6 = vpop.f32.mrb[12].mxu1 }
 0x494   : > { %v2935_v3 = vpop.f32.mrb[13].mxu1 }
 0x495   : > { %v1328_v8 = vpop.f32.mrb[14].mxu1 }
 0x496   : > { %v2936_v9 = vpop.f32.mrb[15].mxu1 }
 0x49b   : > { %v1435_v10 = vpop.f32.mrb[16].mxu1 }
 0x49c   : > { %v2947_v11 = vpop.f32.mrb[17].mxu1 }
 0x49d   : > { %v1438_v12 = vpop.f32.mrb[18].mxu1 }
 0x49e   : > { %v2948_v13 = vpop.f32.mrb[19].mxu1 }
 0x4c8   : > { %v1545_v15 = vpop.f32.mrb[20].mxu1 }
 0x4c9   : > { %2009 = vrot.lane.b32.xlu1 %v1545_v15, %s3319_s22  ;;  %v2959_v16 = vpop.f32.mrb[21].mxu1 }
 0x4ca   : > { %v1548_v17 = vpop.f32.mrb[22].mxu1 }
 0x4cb   : > { %v2960_v18 = vpop.f32.mrb[23].mxu1  ;;  %v3158_v17 = vld [vmem:[%s3411_s27 + $0x8] sm:$0xff]  }
 0x4e1   : > { %v1655_v19 = vpop.f32.mrb[24].mxu1 }
 0x4e2   : > { %v2971_v20 = vpop.f32.mrb[25].mxu1 }
 0x4e3   : > { %v1658_v22 = vpop.f32.mrb[26].mxu1 }
 0x4e4   : > { %v2972_v23 = vpop.f32.mrb[27].mxu1 }
 0x4e9   : > { %v1765_v25 = vpop.f32.mrb[28].mxu1 }
 0x4ea   : > { %2013 = vrot.lane.b32.xlu1 %v1765_v25, %s3320_s23  ;;  %v2983_v26 = vpop.f32.mrb[29].mxu1 }
 0x4eb   : > { %v1768_v14 = vpop.f32.mrb[30].mxu1  ;;  %v2801_v26 = vld [vmem:[%s3391_s30] ss:$0 sm:$0xff] }
 0x4ec   : > { %v2984_v21 = vpop.f32.mrb[31].mxu1 }
 0x4ed   : > { %v2802_v21 = vld [vmem:[%s3906_s9] ss:$0 sm:$0xff]  ;;  %s3914_s9 = sld [smem:[#allocation18_spill]] }
 0x4ee   : > { %1992 = vrot.lane.b32.xlu1 %v1435_v10, %s3319_s22  ;;  %s3911_s22 = sld [smem:[#allocation23_spill]] }
 0x4f1   : > { %v1875_v29 = vpop.f32.mrb[32].mxu1 }
 0x4f2   : > { %2000 = vrot.lane.b32.xlu1 %v1875_v29, %s3321_s5  ;;  %v2995_v31 = vpop.f32.mrb[33].mxu1  ;;  %v2807_v29 = vld [vmem:[%s3907_s21] ss:$0 sm:$0xff]  ;;  %s3915_s21 = sld [smem:[#allocation24_spill]] }
 0x4f3   : > { %v1878_v32 = vpop.f32.mrb[34].mxu1 }
 0x4f4   : > { %v2996_v33 = vpop.f32.mrb[35].mxu1  ;;  %v3159_v32 = vld [vmem:[%s3908_s25] sm:$0xff]  }
 0x4f9   : > { %v1985_v34 = vpop.f32.mrb[36].mxu1 }
 0x4fa   : > { %2017 = vrot.lane.b32.xlu0 %v1985_v34, %s3321_s5  ;;  %v3007_v35 = vpop.f32.mrb[37].mxu1  ;;  %s3913_s5 = sld [smem:[#allocation22_spill]] }
 0x4fb   : > { %v1988_v36 = vpop.f32.mrb[38].mxu1  ;;  %v2808_v35 = vld [vmem:[%s3909_s3] ss:$0 sm:$0xff]  ;;  %s3916_s3 = sld [smem:[#allocation19_spill]] }
 0x4fc   : > { %v3008_v37 = vpop.f32.mrb[39].mxu1  ;;  %v3160_v36 = vld [vmem:[%s3908_s25 + $0x8] sm:$0xff]  }
 0x4fe   : > { %1996 = vrot.lane.b32.xlu0 %v1655_v19, %s3320_s23  ;;  %s3912_s23 = sld [smem:[#allocation16_spill]] }
 0x53b   : > { %v2010_v38 = vpop.permute.xlu1 %2009 }
 0x53c   : > { %v2020_v40 = vsel %vm1111_vm2, %v1325_v6, %v2010_v38 }
 0x55c   : > { %v2014_v39 = vpop.permute.xlu1 %2013 }
 0x55d   : > { %v2021_v42 = vsel %vm2004_vm7, %v2020_v40, %v2014_v39  ;;  %v3161_v39 = vld [vmem:[%s3910_s2] sm:$0xff]   ;;  %v3162_v40 = vld [vmem:[%s3910_s2 + $0x8] sm:$0xff]  }
 0x560   : > { %v1993_v41 = vpop.permute.xlu1 %1992 }
 0x561   : > { %v2003_v46 = vsel %vm1111_vm2, %v3743_v63, %v1993_v41  ;;  %v3163_v41 = vld [vmem:[%s3910_s2 + $0x10] sm:$0xff]  }
 0x564   : > { %v2001_v47 = vpop.permute.xlu1 %2000 }
 0x56c   : > { %v2018_v43 = vpop.permute.xlu0 %2017 }
 0x56d   : > { %v2022_v44 = vsel %vm2006_vm8, %v2021_v42, %v2018_v43  ;;  %v3164_v42 = vld [vmem:[%s3911_s22] sm:$0xff]   ;;  %v3166_v43 = vld [vmem:[%s3911_s22 + $0x8] sm:$0xff]  }
 0x56e   : > { %v2027_v45 = vpack.c.bf16 %v2022_v44, %v2022_v44  ;;  %v3165_v44 = vld [vmem:[%s3910_s2 + $0x18] sm:$0xff]  }
 0x570   : > { %3014 = vmatmul.mubr.msk.bf16.vlgmr.msra.gmra.mrb[32].mxu0 %vm983_vm1, %v2027_v45  ;;  %v1997_v48 = vpop.permute.xlu0 %1996  ;;  %v3167_v45 = vld [vmem:[%s3911_s22 + $0x10] sm:$0xff]  }
 0x571   : > { %v2005_v49 = vsel %vm2004_vm7, %v2003_v46, %v1997_v48  ;;  %3029 = vmatprep.mubr.msk.bf16.mxu0 %vm3307_vm0, %v3306_v1  ;;  %v3168_v46 = vld [vmem:[%s3911_s22 + $0x18] sm:$0xff]   ;;  %v2809_v48 = vld [vmem:[%s3912_s23] ss:$0 sm:$0xff]  ;;  %s3917_s23 = sld [smem:[#allocation20_spill]] }
 0x572   : > { %v2007_v50 = vsel %vm2006_vm8, %v2005_v49, %v2001_v47 }
 0x573   : > { %v2125_v51 = vpack.c.bf16 %v2007_v50, %v2007_v50 }
 0x575   : > { %3022 = vmatmul.mubr.msk.bf16.vlgmr.msra.gmra.mrb[40].mxu1 %vm983_vm1, %v2125_v51 }
 0x576   : > { %3041 = vmatprep.mubr.msk.bf16.mxu1 %vm3307_vm0, %v3306_v1  ;;  %3034 = vmatpush3.bf16.msra.mxu1 %v3161_v39 }
 0x577   : > { %3035 = vmatprep.subr.bf16.mxu1 %v3306_v1 }
 0x57a   : > { %3036 = vmatpush3.bf16.msra.mxu1 %v3162_v40 }
 0x57b   : > { %3037 = vmatprep.subr.bf16.mxu1 %v3306_v1 }
 0x57e   : > { %3038 = vmatpush3.bf16.msra.mxu1 %v3163_v41 }
 0x57f   : > { %3039 = vmatprep.subr.bf16.mxu1 %v3306_v1 }
 0x582   : > { %3040 = vmatpush3.bf16.msra.mxu1 %v3165_v44 }
 0x643   : > { %v2084_v53 = vpop.f32.mrb[32].mxu0 }
 0x644   : > { %v2085_v54 = vadd.f32 %v2797_v52, %v2084_v53  ;;  %v3015_v55 = vpop.f32.mrb[33].mxu0 }
 0x645   : > { %v2087_v56 = vpop.f32.mrb[34].mxu0  ;;  %v2821_v55 = vld [vmem:[%s3913_s5] ss:$0 sm:$0xff]  ;;  %s927_s5 = sand.u32 1, %s3267_s10  }
 0x646   : > { %v3016_v57 = vpop.f32.mrb[35].mxu0  ;;  %v2090_v59 = vadd.f32 %v2085_v54, %v3546_v4 }
 0x648   : > { %v2182_v60 = vpop.f32.mrb[40].mxu1  ;;  %v2093_v61 = vsel %vm983_vm1, %v2090_v59, 0.0 }
 0x649   : > { %v2183_v62 = vadd.f32 %v2803_v58, %v2182_v60  ;;  %2094 = vadd.xlane.f32.xlu0 %v2093_v61  ;;  %v3023_v63 = vpop.f32.mrb[41].mxu1 }
 0x64a   : > { %v2185_v0 = vpop.f32.mrb[42].mxu1 }
 0x64b   : > { %v3024_v2 = vpop.f32.mrb[43].mxu1  ;;  %v2188_v5 = vadd.f32 %v2183_v62, %v3553_v7  ;;  %v3157_v7 = vld [vmem:[%s3411_s27] sm:$0xff]  }
 0x64c   : > { %3026 = vmatpush3.bf16.msra.mxu0 %v3157_v7  ;;  %v2813_v7 = vld [vmem:[%s3914_s9] ss:$0 sm:$0xff]  ;;  %s2767_s9 = sshll.u32 %s927_s5, 3 }
 0x64d   : > { %v2192_v6 = vsel %vm2191_vm9, %v2188_v5, 0.0  ;;  %3027 = vmatprep.subr.bf16.mxu0 %v3306_v1  ;;  %s929_s2 = scalar_lea.vmem [#allocation2], %s2767_s9 }
 0x64e   : > { %2193 = vadd.xlane.f32.xlu1 %v2192_v6  ;;  %s2618_s8 = sshll.u32 %s929_s2, 4  ;;  %s3827_s8 = int_to_ptr.vmem [resolvable:$true] %s2618_s8 }
 0x64f   : > { %s3213_s14 = scalar_lea.vmem %s3827_s8, 128 }
 0x650   : > { %3028 = vmatpush3.bf16.msra.mxu0 %v3158_v17  ;;  %p3214_p11 = scmp.ne.s32.totalorder %s3827_s8, %s3213_s14 }
 0x651   : > { %3045 = vmatprep.subr.bf16.mxu0 %v3306_v1 }
 0x652   : > { %p3215_p12 = pnand %p3214_p11, %p3516_p5 }
 0x654   : > { %p3216_p13 = pneg %p3215_p12 }
 0x6d6   : > { %v2095_v3 = vpop.xlane.xlu0 %2094 }
 0x6d7   : > { %v2097_v8 = vmul.f32 0.03125, %v2095_v3 }
 0x6d9   : > { %v2098_v9 = vsub.f32 %v2090_v59, %v2097_v8 }
 0x6db   : > { %v2194_v4 = vpop.xlane.xlu1 %2193  ;;  %v2099_v10 = vmul.f32 %v2098_v9, %v2098_v9 }
 0x6dc   : > { %v2195_v11 = vmul.f32 0.03125, %v2194_v4 }
 0x6dd   : > { %v2100_v12 = vsel %vm983_vm1, %v2099_v10, 0.0 }
 0x6de   : > { %v2196_v13 = vsub.f32 %v2188_v5, %v2195_v11  ;;  %2101 = vadd.xlane.f32.xlu0 %v2100_v12 }
 0x6e0   : > { %v2197_v15 = vmul.f32 %v2196_v13, %v2196_v13 }
 0x6e2   : > { %v2198_v16 = vsel %vm2191_vm9, %v2197_v15, 0.0 }
 0x6e3   : > { %2199 = vadd.xlane.f32.xlu0 %v2198_v16 }
 0x76b   : > { %v2102_v18 = vpop.xlane.xlu0 %2101 }
 0x76c   : > { %v2103_v19 = vmul.f32 0.03125, %v2102_v18 }
 0x76e   : > { %v2104_v20 = vadd.f32 1e-12, %v2103_v19 }
 0x770   : > { %3201 = vrsqrt.f32 %v2104_v20  ;;  %v2200_v22 = vpop.xlane.xlu0 %2199 }
 0x771   : > { %v2201_v23 = vmul.f32 0.03125, %v2200_v22 }
 0x773   : > { %v2202_v24 = vadd.f32 1e-12, %v2201_v23 }
 0x775   : > { %3203 = vrsqrt.f32 %v2202_v24 }
 0x77a   : > { %v3202_v25 = vpop.eup %3201 }
 0x77b   : > { %v2106_v14 = vmul.f32 %v3202_v25, %v2098_v9  ;;  %v2825_v25 = vld [vmem:[%s3915_s21] ss:$0 sm:$0xff]  ;;  %s2834_s21 = sshll.u32 %s3499_s0, 7  ;;  %s3322_s0 = smov [#allocation2]  }
 0x77c   : > { %s3825_s13 = scalar_lea.hbm %s3471_s6, %s2834_s21 }
 0x77d   : > { %v2113_v27 = vmul.f32 %v2801_v26, %v2106_v14 }
 0x77f   : > { %v3204_v28 = vpop.eup %3203  ;;  %v3777_v30 = vadd.f32 %v2802_v21, %v2113_v27 }
 0x780   : > { %v2204_v31 = vmul.f32 %v3204_v28, %v2196_v13 }
 0x781   : > { %v2223_v33 = vpack.c.bf16 %v3777_v30, %v3777_v30 }
 0x782   : > { %v2211_v34 = vmul.f32 %v2807_v29, %v2204_v31 }
 0x783   : > { %3030 = vmatmul.mubr.msk.bf16.vlgmr.msra.gmra.mrb[36].mxu0 %vm983_vm1, %v2223_v33 }
 0x784   : > { %3046 = vmatpush3.bf16.msra.mxu0 %v3159_v32  ;;  %3049 = vmatprep.mubr.msk.bf16.mxu0 %vm3307_vm0, %v3306_v1  ;;  %v3788_v37 = vadd.f32 %v2808_v35, %v2211_v34 }
 0x785   : > { %3047 = vmatprep.subr.bf16.mxu0 %v3306_v1 }
 0x786   : > { %v2414_v38 = vpack.c.bf16 %v3788_v37, %v3788_v37 }
 0x788   : > { %3048 = vmatpush3.bf16.msra.mxu0 %v3160_v36 }
 0x789   : > { %3053 = vmatprep.subr.bf16.mxu0 %v3306_v1 }
 0x78b   : > { %3050 = vmatmul.mubr.msk.bf16.vlgmr.msra.gmra.mrb[40].mxu0 %vm983_vm1, %v2414_v38 }
 0x78c   : > { %3061 = vmatprep.mubr.msk.bf16.mxu0 %vm3307_vm0, %v3306_v1  ;;  %3054 = vmatpush3.bf16.msra.mxu0 %v3164_v42 }
 0x78d   : > { %3055 = vmatprep.subr.bf16.mxu0 %v3306_v1 }
 0x790   : > { %3056 = vmatpush3.bf16.msra.mxu0 %v3166_v43 }
 0x791   : > { %3057 = vmatprep.subr.bf16.mxu0 %v3306_v1 }
 0x794   : > { %3058 = vmatpush3.bf16.msra.mxu0 %v3167_v45 }
 0x795   : > { %3059 = vmatprep.subr.bf16.mxu0 %v3306_v1 }
 0x798   : > { %3060 = vmatpush3.bf16.msra.mxu0 %v3168_v46 }
 0x856   : > { %v2280_v47 = vpop.f32.mrb[36].mxu0 }
 0x857   : > { %v2281_v49 = vadd.f32 %v2809_v48, %v2280_v47  ;;  %v3031_v50 = vpop.f32.mrb[37].mxu0  ;;  %v2819_v47 = vld [vmem:[%s3916_s3] ss:$0 sm:$0xff]  ;;  %s2601_s3 = scalar_lea.sflag [#allocation3], %s927_s5 }
 0x858   : > { %v2283_v51 = vpop.f32.mrb[38].mxu0  ;;  %v2820_v50 = vld [vmem:[%s3917_s23] ss:$0 sm:$0xff]  ;;  %s3217_s23 = sshll.u32 %s3322_s0, 4  ;;  %s3218_s23 = int_to_ptr.vmem [resolvable:$false] %s3217_s23 }
 0x859   : > { %v2287_v52 = vmul.f32 0.044715, %v2281_v49  ;;  %v3032_v53 = vpop.f32.mrb[39].mxu0  ;;  %v2286_v8 = vmul.f32 0.5, %v2281_v49  ;;  %s3219_s9 = scalar_lea.vmem %s3218_s23, 256  ;;  %p3220_p0 = scmp.lt.s32.totalorder %s3827_s8, %s3218_s23 }
 0x85a   : > { %p3221_p1 = scmp.lt.s32.totalorder %s3219_s9, %s3213_s14 }
 0x85b   : > { %v2288_v54 = vmul.f32 %v2287_v52, %v2281_v49 }
 0x85c   : > { %p3222_p2 = por %p3221_p1, %p3220_p0 }
 0x85d   : > { %v2289_v56 = vmul.f32 %v2288_v54, %v2281_v49  ;;  %v2831_v54 = vld [vmem:[%s3461_s12] ss:$0 sm:$0xff] }
 0x85e   : > { %v2471_v57 = vpop.f32.mrb[40].mxu0  ;;  %p3223_p3 = pnand %p3222_p2, %p3216_p13 }
 0x85f   : > { %v2290_v58 = vadd.f32 %v2289_v56, %v2281_v49  ;;  %v2472_v59 = vadd.f32 %v2821_v55, %v2471_v57  ;;  %v3051_v60 = vpop.f32.mrb[41].mxu0 }
 0x860   : > { %v2474_v61 = vpop.f32.mrb[42].mxu0 }
 0x861   : > { %v2291_v62 = vmul.f32 0.7978846, %v2290_v58  ;;  %v2478_v63 = vmul.f32 0.044715, %v2472_v59  ;;  %v3052_v0 = vpop.f32.mrb[43].mxu0  ;;  %v2477_v12 = vmul.f32 0.5, %v2472_v59 }
 0x863   : > { %3205 = vtanh.f32 %v2291_v62  ;;  %v2479_v1 = vmul.f32 %v2478_v63, %v2472_v59 }
 0x865   : > { %v2480_v2 = vmul.f32 %v2479_v1, %v2472_v59 }
 0x867   : > { %v2481_v5 = vadd.f32 %v2480_v2, %v2472_v59 }
 0x869   : > { %v2482_v6 = vmul.f32 0.7978846, %v2481_v5 }
 0x86b   : > { %3207 = vtanh.f32 %v2482_v6 }
 0x86d   : > { %v3206_v3 = vpop.eup %3205 }
 0x86e   : > { %v2293_v9 = vadd.f32 1.0, %v3206_v3 }
 0x870   : > { %v2294_v4 = vmul.f32 %v2293_v9, %v2286_v8 }
 0x872   : > { %v2303_v10 = vpack.c.bf16 %v2294_v4, %v2294_v4 }
 0x874   : > { %3042 = vmatmul.mubr.msk.bf16.vlgmr.msra.gmra.mrb[44].mxu1 %vm2335_vm10, %v2303_v10 }
 0x875   : > { %v3208_v11 = vpop.eup %3207 }
 0x876   : > { %v2484_v13 = vadd.f32 1.0, %v3208_v11 }
 0x878   : > { %v2485_v15 = vmul.f32 %v2484_v13, %v2477_v12 }
 0x87a   : > { %v2494_v16 = vpack.c.bf16 %v2485_v15, %v2485_v15 }
 0x87c   : > { %3062 = vmatmul.mubr.msk.bf16.vlgmr.msra.gmra.mrb[44].mxu0 %vm2335_vm10, %v2494_v16 }
 0x947   : > { %v2373_v17 = vpop.f32.mrb[44].mxu1 }
 0x948   : > { %v2374_v18 = vadd.f32 %v2813_v7, %v2373_v17  ;;  %v3043_v19 = vpop.f32.mrb[45].mxu1 }
 0x949   : > { %v2376_v20 = vpop.f32.mrb[46].mxu1 }
 0x94a   : > { %v3044_v22 = vpop.f32.mrb[47].mxu1  ;;  %v2379_v23 = vadd.f32 %v2374_v18, %v3777_v30 }
 0x94c   : > { %v2382_v24 = vsel %vm983_vm1, %v2379_v23, 0.0 }
 0x94d   : > { %2383 = vadd.xlane.f32.xlu1 %v2382_v24 }
 0x94f   : > { %v2563_v26 = vpop.f32.mrb[44].mxu0 }
 0x950   : > { %v2564_v14 = vadd.f32 %v2825_v25, %v2563_v26  ;;  %v3063_v21 = vpop.f32.mrb[45].mxu0 }
 0x951   : > { %v2566_v27 = vpop.f32.mrb[46].mxu0 }
 0x952   : > { %v3064_v28 = vpop.f32.mrb[47].mxu0  ;;  %v2569_v29 = vadd.f32 %v2564_v14, %v3788_v37 }
 0x954   : > { %v2572_v31 = vsel %vm2191_vm9, %v2569_v29, 0.0 }
 0x955   : > { %2573 = vadd.xlane.f32.xlu0 %v2572_v31 }
 0x9da   : > { %v2384_v32 = vpop.xlane.xlu1 %2383 }
 0x9db   : > { %v2385_v33 = vmul.f32 0.03125, %v2384_v32 }
 0x9dd   : > { %v2386_v34 = vsub.f32 %v2379_v23, %v2385_v33 }
 0x9df   : > { %v2387_v35 = vmul.f32 %v2386_v34, %v2386_v34 }
 0x9e1   : > { %v2388_v30 = vsel %vm983_vm1, %v2387_v35, 0.0 }
 0x9e2   : > { %v2574_v36 = vpop.xlane.xlu0 %2573  ;;  %2389 = vadd.xlane.f32.xlu1 %v2388_v30 }
 0x9e3   : > { %v2575_v38 = vmul.f32 0.03125, %v2574_v36 }
 0x9e5   : > { %v2576_v39 = vsub.f32 %v2569_v29, %v2575_v38 }
 0x9e7   : > { %v2577_v40 = vmul.f32 %v2576_v39, %v2576_v39 }
 0x9e9   : > { %v2578_v41 = vsel %vm2191_vm9, %v2577_v40, 0.0 }
 0x9ea   : > { %2579 = vadd.xlane.f32.xlu0 %v2578_v41 }
 0xa6f   : > { %v2390_v37 = vpop.xlane.xlu1 %2389 }
 0xa70   : > { %v2391_v42 = vmul.f32 0.03125, %v2390_v37 }
 0xa72   : > { %v2392_v43 = vadd.f32 1e-12, %v2391_v42 }
 0xa74   : > { %3209 = vrsqrt.f32 %v2392_v43 }
 0xa77   : > { %v2580_v44 = vpop.xlane.xlu0 %2579 }
 0xa78   : > { %v2581_v45 = vmul.f32 0.03125, %v2580_v44 }
 0xa7a   : > { %v2582_v46 = vadd.f32 1e-12, %v2581_v45 }
 0xa7c   : > { %3211 = vrsqrt.f32 %v2582_v46 }
 0xa7e   : > { %v3210_v48 = vpop.eup %3209 }
 0xa7f   : > { %v2394_v49 = vmul.f32 %v3210_v48, %v2386_v34 }
 0xa81   : > { %v2401_v51 = vmul.f32 %v2819_v47, %v2394_v49 }
 0xa83   : > { %v2408_v52 = vadd.f32 %v2820_v50, %v2401_v51 }
 0xa85   : > { %2409 = vst.msk [vmem:[%s929_s2] sm:$0xff] %vm983_vm1, %v2408_v52 }
 0xa86   : > { %v3212_v53 = vpop.eup %3211 }
 0xa87   : > { %3226 = shalt.err (!%p3223_p3)
}
 0xa88   : > { %s3227_s2 = scalar_lea.hbm %s3825_s13, 128  ;;  %s3231_s5 = scalar_lea.hbm %s3471_s6, 256 }
 0xa89   : > { %p3228_p4 = scmp.ne.s32.totalorder %s3825_s13, %s3227_s2  ;;  %p3232_p9 = scmp.lt.u32.totalorder %s3825_s13, %s3471_s6 }
 0xa8a   : > { %p3233_p10 = scmp.lt.u32.totalorder %s3231_s5, %s3227_s2  ;;  %p3235_p12 = scmp.lt.u32.totalorder %s3227_s2, %s3825_s13 }
 0xa8b   : > { %p3229_p7 = pnand %p3228_p4, %p3516_p5 }
 0xa8c   : > { %p3234_p11 = por %p3233_p10, %p3232_p9 }
 0xa8d   : > { %p3230_p8 = pneg %p3229_p7 }
 0xa8e   : > { %p3236_p0 = por %p3235_p12, %p3234_p11 }
 0xa90   : > { %p3237_p13 = pnand %p3236_p0, %p3230_p8 }
 0xa92   : > { %3240 = shalt.err (!%p3237_p13)
}
 0xa93   : > { %3065 = dma.vmem_to_hbm [thread:$0]  (%p3516_p5), %s3827_s8, 128, %s3825_s13, %s2601_s3   ;;  %v2584_v55 = vmul.f32 %v3212_v53, %v2576_v39  ;;  %v2832_v56 = vld [vmem:[%s3466_s20] ss:$0 sm:$0xff] }
 0xa94   : > { %s953_s14 = scalar_lea.vmem %s3476_s4, %s3540_s16 }
 0xa95   : > { %v2591_v57 = vmul.f32 %v2831_v54, %v2584_v55 }
 0xa97   : > { %v2598_v58 = vadd.f32 %v2832_v56, %v2591_v57 }
 0xa99   : > { %2599 = vst.msk [vmem:[%s953_s14] sm:$0x3f] %vm2191_vm9, %v2598_v58 }
 0xa9a PF: > { %p3071_p1 = scmp.ge.s32.totalorder %s3275_s15, 2  ;;  %s2633_s21 = sand.u32 1, %s3263_s7  }
 0xa9b   : > { %s2634_s28 = scalar_lea.sflag [#allocation3], %s2633_s21 }
 0xa9c   : > { %p3068_p2 = pnand %p3071_p1, %p3520_p6 }
 0xa9e   : > { %3258 = dma.done.wait (!%p3068_p2), %s2634_s28, 128  }
 0xa9f   : > { %3260 = vsyncadd (!%p3068_p2), %s2634_s28, 4294967168  ;;  %p70_p5 = scmp.ge.s32.totalorder %s3503_s18, 4   ;;  %s3918_s7 = smov %s3267_s10 }
 0xaa0   : > { %s3919_s10 = smov %s3271_s11  ;;  %s3920_s11 = smov %s3514_s26 }
 0xaa1   : > { %s3921_s15 = smov %s3503_s18  ;;  %72 = sbr.rel (!%p70_p5) target bundleno = 57 (0x39), region = 217 }
 0xaa8   :  { %2646 = vsyncpa [#allocation3], 1 }
 0xaa9   :  { %2648 = vsyncpa [#allocation3 + $0x1], 1 }

// kernel: cross_self_attention_fixcross_forward.6
= control target key start
LH: loop header
LB: loop body
LE: loop exit
PB: predicated region body
PF: predicated region fallthrough
CT: control target
= control target key end

     0   :  { %s3169_s6 = smov 1   ;;  %s3170_s10 = smov 2   ;;  %s3682_s0 = inlined_call_operand.smem [shape: u32[30], index: -1, kind: input, shape index: {}] }
   0x1   :  { %s3222_s5 = sld [smem:[%s3682_s0]]   ;;  %s3171_s14 = smov 3  }
   0x2   :  { %s3227_s9 = sld [smem:[%s3682_s0 + %s3169_s6]]   ;;  %s3172_s18 = smov 4  }
   0x3   :  { %s3232_s13 = sld [smem:[%s3682_s0 + %s3170_s10]]   ;;  %s3173_s22 = smov 5  }
   0x4   :  { %s3237_s17 = sld [smem:[%s3682_s0 + %s3171_s14]]   ;;  %s3174_s26 = smov 6  }
   0x5   :  { %s3242_s21 = sld [smem:[%s3682_s0 + %s3172_s18]]   ;;  %s3175_s30 = smov 7  }
   0x6   :  { %s3247_s25 = sld [smem:[%s3682_s0 + %s3173_s22]]   ;;  %s3176_s4 = smov 8  }
   0x7   :  { %s3252_s29 = sld [smem:[%s3682_s0 + %s3174_s26]]   ;;  %s3177_s10 = smov 9  }
   0x8   :  { %s3257_s3 = sld [smem:[%s3682_s0 + %s3175_s30]]   ;;  %s3178_s15 = smov 10  }
   0x9   :  { %s3262_s8 = sld [smem:[%s3682_s0 + %s3176_s4]]   ;;  %s3179_s20 = smov 11  }
   0xa   :  { %s3267_s14 = sld [smem:[%s3682_s0 + %s3177_s10]]   ;;  %s3180_s26 = smov 12  }
   0xb   :  { %s3272_s19 = sld [smem:[%s3682_s0 + %s3178_s15]]   ;;  %s3181_s1 = smov 13  }
   0xc   :  { %s3277_s24 = sld [smem:[%s3682_s0 + %s3179_s20]]   ;;  %s3182_s7 = smov 14  }
   0xd   :  { %s3282_s30 = sld [smem:[%s3682_s0 + %s3180_s26]]   ;;  %s3183_s15 = smov 15  }
   0xe   :  { %s3287_s6 = sld [smem:[%s3682_s0 + %s3181_s1]]   ;;  %s3184_s22 = smov 16  }
   0xf   :  { %s3292_s12 = sld [smem:[%s3682_s0 + %s3182_s7]]   ;;  %s3185_s28 = smov 17  }
  0x10   :  { %s3297_s20 = sld [smem:[%s3682_s0 + %s3183_s15]]   ;;  %s3186_s7 = smov 18  }
  0x11   :  { %s3302_s27 = sld [smem:[%s3682_s0 + %s3184_s22]]   ;;  %s3187_s15 = smov 19  }
  0x12   :  { %s3307_s4 = sld [smem:[%s3682_s0 + %s3185_s28]]   ;;  %s3188_s22 = smov 20  }
  0x13   :  { %s3189_s28 = smov 21  }
  0x14   :  { %3686 = sst [smem:[#allocation2_spill]] %s3287_s6 }
  0x15   :  { %3687 = sst [smem:[#allocation3_spill]] %s3292_s12 }
  0x16   :  { %3688 = sst [smem:[#allocation4_spill]] %s3297_s20 }
  0x17   :  { %s3312_s12 = sld [smem:[%s3682_s0 + %s3186_s7]]   ;;  %s3190_s7 = smov 22  }
  0x18   :  { %3689 = sst [smem:[#allocation5_spill]] %s3307_s4 }
  0x19   :  { %s3317_s20 = sld [smem:[%s3682_s0 + %s3187_s15]]   ;;  %s3191_s15 = smov 23  }
  0x1a   :  { %s3322_s6 = sld [smem:[%s3682_s0 + %s3188_s22]]   ;;  %s3192_s22 = smov 24  }
  0x1b   :  { %s3327_s4 = sld [smem:[%s3682_s0 + %s3189_s28]]   ;;  %s3193_s28 = smov 25  }
  0x1d   :  { %3690 = sst [smem:[#allocation6_spill]] %s3312_s12 }
  0x1e   :  { %s3332_s12 = sld [smem:[%s3682_s0 + %s3190_s7]]   ;;  %s3194_s7 = smov 26  }
  0x1f   :  { %3691 = sst [smem:[#allocation7_spill]] %s3317_s20 }
  0x20   :  { %3692 = sst [smem:[#allocation8_spill]] %s3322_s6 }
  0x21   :  { %3693 = sst [smem:[#allocation9_spill]] %s3327_s4 }
  0x22   :  { %s3337_s20 = sld [smem:[%s3682_s0 + %s3191_s15]]   ;;  %s3195_s15 = smov 27  }
  0x23   :  { %s3342_s6 = sld [smem:[%s3682_s0 + %s3192_s22]]   ;;  %s3196_s22 = smov 28  }
  0x24   :  { %3694 = sst [smem:[#allocation10_spill]] %s3332_s12 }
  0x25   :  { %s3347_s4 = sld [smem:[%s3682_s0 + %s3193_s28]]   ;;  %s3197_s28 = smov 29  }
  0x26   :  { %s3352_s12 = sld [smem:[%s3682_s0 + %s3194_s7]]   ;;  %s3369_s7 = smov 0  }
  0x28   :  { %3695 = sst [smem:[#allocation11_spill]] %s3337_s20 }
  0x29   :  { %3696 = sst [smem:[#allocation12_spill]] %s3342_s6 }
  0x2a   :  { %s3357_s20 = sld [smem:[%s3682_s0 + %s3195_s15]]  }
  0x2b   :  { %3697 = sst [smem:[#allocation13_spill]] %s3347_s4 }
  0x2c   :  { %s3362_s6 = sld [smem:[%s3682_s0 + %s3196_s22]]  }
  0x2d   :  { %s3367_s4 = sld [smem:[%s3682_s0 + %s3197_s28]]  }
  0x2e LB: > { %s2743_s10 = sadd.s32 4294967295, %s3167_s7   ;;  %p2747_p0 = scmp.ge.s32.totalorder %s3167_s7, 1  ;;  %s3167_s7 = sphi %s3369_s7, %s70_s7  }
  0x2f   : > { %p844_p1 = scmp.lt.s32.totalorder %s3167_s7, 3 }
  0x31   : > { %p845_p2 = pnand %p2747_p0, %p844_p1 }
  0x32   : > { %v3097_v0 = vld [vmem:[%s3242_s21] sm:$0xff] (!%p845_p2)   ;;  %v3198_v1 = vmov (!%p845_p2), 0.0   ;;  %v3098_v2 = vld [vmem:[%s3242_s21 + $0x8] sm:$0xff] (!%p845_p2)   ;;  %vm3199_vm0 = vmmov (!%p845_p2), 0   ;;  %p932_p3 = scmp.lt.s32.totalorder (!%p845_p2), %s2743_s10, 1  ;;  %vm983_vm1 = vcmask (!%p845_p2), 261120  }
  0x33   : > { %848 = sbr.rel (%p845_p2) target bundleno = 2683 (0xa7b), region = 132  ;;  %2876 = vmatprep.subr.bf16.mxu1 (!%p845_p2), %v3198_v1  ;;  %2892 = vmatprep.subr.bf16.mxu0 (!%p845_p2), %v3198_v1  ;;  %v3099_v3 = vld [vmem:[%s3252_s29] sm:$0xff] (!%p845_p2)   ;;  %v3100_v6 = vld [vmem:[%s3252_s29 + $0x8] sm:$0xff] (!%p845_p2)   ;;  %s3200_s16 = smov (!%p845_p2), 88   ;;  %vm1111_vm2 = vcmask (!%p845_p2), 64512   ;;  %vm1158_vm3 = vcmask (!%p845_p2), 62464  }
  0x34   : > { %2877 = vmatpush3.bf16.msra.mxu1 (!%p845_p2), %v3097_v0  ;;  %2880 = vmatprep.mubr.msk.bf16.mxu1 (!%p845_p2), %vm3199_vm0, %v3198_v1  ;;  %v2752_v9 = vld [vmem:[%s3247_s25] ss:$0 sm:$0xff] (!%p845_p2)  ;;  %s3201_s18 = smov (!%p845_p2), 96   ;;  %s3202_s22 = smov (!%p845_p2), 120   ;;  %vm1269_vm4 = vcmask (!%p845_p2), 48128   ;;  %vm1176_vm5 = vcmask (!%p845_p2), 1043456  }
  0x35   : > { %2878 = vmatprep.subr.bf16.mxu1 (!%p845_p2), %v3198_v1  ;;  %2894 = vmatprep.mubr.msk.bf16.mxu0 (!%p845_p2), %vm3199_vm0, %v3198_v1  ;;  %v2756_v16 = vld [vmem:[%s3257_s3] ss:$0 sm:$0xff] (!%p845_p2)  ;;  %s3203_s23 = smov (!%p845_p2), 112   ;;  %s3204_s26 = smov (!%p845_p2), 80   ;;  %vm1287_vm6 = vcmask (!%p845_p2), 1042432   ;;  %vm2004_vm7 = vcmask (!%p845_p2), 130048  }
  0x36   : > { %s3205_s28 = smov (!%p845_p2), 104   ;;  %s3206_s1 = smov (!%p845_p2), 72   ;;  %vm2006_vm8 = vcmask (!%p845_p2), 195584   ;;  %vm2191_vm9 = vcmask (!%p845_p2), 259072   ;;  %vm2335_vm10 = vcmask (!%p845_p2), 523264  }
  0x38   : > { %2879 = vmatpush3.bf16.msra.mxu1 (!%p845_p2), %v3098_v2 }
  0x39   : > { %2884 = vmatprep.subr.bf16.mxu1 (!%p845_p2), %v3198_v1 }
  0x3a   : > { %s3711_s10 = smov (!%p932_p3, %s2743_s10), 1 }
  0x3b   : > { %s3389_s0 = sshll.u32 %s3711_s10, 3  ;;  %s942_s2 = scalar_lea.vmem %s3232_s13, %s3711_s10 }
  0x3c   : > { %s935_s11 = scalar_lea.vmem %s3222_s5, %s3389_s0  ;;  %s939_s15 = scalar_lea.vmem %s3227_s9, %s3389_s0  ;;  %v2760_v45 = vld [vmem:[%s942_s2] ss:$0 sm:$0xff] }
  0x3d   : > { %v3395_v4 = vld [vmem:[%s935_s11] sm:$0xff]  ;;  %s945_s11 = scalar_lea.vmem %s3237_s17, %s3711_s10  ;;  %s3207_s10 = smov 64  }
  0x3e   : > { %v963_v5 = vpack.c.bf16 %v3395_v4, %v3395_v4  ;;  %v3402_v7 = vld [vmem:[%s939_s15] sm:$0x3f]  ;;  %s3208_s15 = smov 56   ;;  %s3700_s2 = sld [smem:[#allocation10_spill]] }
  0x3f   : > { %v1031_v8 = vpack.c.bf16 %v3402_v7, %v3402_v7  ;;  %v2761_v52 = vld [vmem:[%s945_s11] ss:$0 sm:$0xff]  ;;  %s3701_s11 = sld [smem:[#allocation4_spill]] }
  0x40   : > { %2881 = vmatmul.mubr.msk.bf16.vlgmr.msra.gmra.mrb[0].mxu1 %vm983_vm1, %v963_v5 }
  0x41   : > { %2885 = vmatpush3.bf16.msra.mxu1 %v3099_v3  ;;  %2888 = vmatprep.mubr.msk.bf16.mxu1 %vm3199_vm0, %v3198_v1 }
  0x42   : > { %2886 = vmatprep.subr.bf16.mxu1 %v3198_v1 }
  0x45   : > { %2887 = vmatpush3.bf16.msra.mxu1 %v3100_v6 }
  0x46   : > { %2898 = vmatprep.subr.bf16.mxu1 %v3198_v1 }
  0x48   : > { %2889 = vmatmul.mubr.msk.bf16.vlgmr.msra.gmra.mrb[4].mxu1 %vm983_vm1, %v1031_v8 }
  0x49   : > { %2900 = vmatprep.mubr.msk.bf16.mxu1 %vm3199_vm0, %v3198_v1 }
 0x113   : > { %v1021_v10 = vpop.f32.mrb[0].mxu1 }
 0x114   : > { %v1022_v11 = vadd.f32 %v2752_v9, %v1021_v10  ;;  %v2882_v12 = vpop.f32.mrb[1].mxu1 }
 0x115   : > { %v1024_v13 = vpop.f32.mrb[2].mxu1 }
 0x116   : > { %v3415_v14 = vpack.c.bf16 %v1022_v11, %v1022_v11  ;;  %v2883_v15 = vpop.f32.mrb[3].mxu1 }
 0x118   : > { %1333 = vrot.lane.b32.xlu1 %v3415_v14, %s3200_s16  ;;  %1109 = vrot.lane.b32.xlu0 %v3415_v14, %s3201_s18 }
 0x11b   : > { %v1088_v17 = vpop.f32.mrb[4].mxu1 }
 0x11c   : > { %v1089_v18 = vadd.f32 %v2756_v16, %v1088_v17  ;;  %v2890_v19 = vpop.f32.mrb[5].mxu1 }
 0x11d   : > { %v1091_v20 = vpop.f32.mrb[6].mxu1 }
 0x11e   : > { %v3420_v21 = vpack.c.bf16 %v1089_v18, %v1089_v18  ;;  %v2891_v22 = vpop.f32.mrb[7].mxu1 }
 0x120   : > { %1331 = vrot.lane.b32.xlu1 %v3420_v21, %s3202_s22  ;;  %1221 = vrot.lane.b32.xlu0 %v3420_v21, %s3201_s18  ;;  %s3210_s18 = smov 40  }
 0x124   : > { %1441 = vrot.lane.b32.xlu1 %v3415_v14, %s3202_s22  ;;  %1443 = vrot.lane.b32.xlu0 %v3420_v21, %s3200_s16  ;;  %s3209_s16 = smov 48   ;;  %s3211_s22 = smov 8  }
 0x128   : > { %1551 = vrot.lane.b32.xlu1 %v3420_v21, %s3203_s23  ;;  %1553 = vrot.lane.b32.xlu0 %v3415_v14, %s3204_s26 }
 0x12c   : > { %1661 = vrot.lane.b32.xlu1 %v3415_v14, %s3203_s23  ;;  %1663 = vrot.lane.b32.xlu0 %v3420_v21, %s3204_s26  ;;  %s3212_s23 = smov 16   ;;  %s3213_s26 = smov 24  }
 0x130   : > { %1771 = vrot.lane.b32.xlu1 %v3420_v21, %s3205_s28  ;;  %1773 = vrot.lane.b32.xlu0 %v3415_v14, %s3206_s1 }
 0x134   : > { %1881 = vrot.lane.b32.xlu1 %v3415_v14, %s3205_s28  ;;  %1883 = vrot.lane.b32.xlu0 %v3420_v21, %s3206_s1  ;;  %s3698_s28 = sld [smem:[#allocation2_spill]]  ;;  %s3699_s1 = sld [smem:[#allocation3_spill]] }
 0x18a   : > { %v1110_v23 = vpop.permute.xlu0 %1109  ;;  %v1334_v27 = vpop.permute.xlu1 %1333 }
 0x18b   : > { %v1116_v24 = vsel %vm1111_vm2, %v1110_v23, 0  ;;  %v1339_v28 = vsel %vm1111_vm2, %v1334_v27, 0 }
 0x18c   : > { %2893 = vmatpush3.bf16.xpose.msra.mxu0 %v1116_v24 }
 0x18d   : > { %2904 = vmatprep.subr.bf16.mxu0 %v3198_v1 }
 0x192   : > { %v1222_v25 = vpop.permute.xlu0 %1221  ;;  %v1332_v30 = vpop.permute.xlu1 %1331 }
 0x193   : > { %v1227_v26 = vsel %vm1111_vm2, %v1222_v25, 0  ;;  %2895 = vmatmul.mubr.msk.bf16.vlgmr.msra.gmra.mrb[0].mxu0 %vm1111_vm2, %v3420_v21 }
 0x194   : > { %2905 = vmatpush3.bf16.xpose.msra.mxu0 %v1227_v26  ;;  %2906 = vmatprep.mubr.msk.bf16.mxu0 %vm3199_vm0, %v3198_v1 }
 0x195   : > { %2916 = vmatprep.subr.bf16.mxu0 %v3198_v1 }
 0x196   : > { %v1444_v29 = vpop.permute.xlu0 %1443  ;;  %v1442_v33 = vpop.permute.xlu1 %1441 }
 0x197   : > { %v1449_v31 = vsel %vm1111_vm2, %v1444_v29, 0 }
 0x19a   : > { %v1554_v32 = vpop.permute.xlu0 %1553  ;;  %v1552_v36 = vpop.permute.xlu1 %1551 }
 0x19b   : > { %2907 = vmatmul.mubr.msk.bf16.vlgmr.msra.gmra.mrb[4].mxu0 %vm1111_vm2, %v3415_v14  ;;  %v1559_v34 = vsel %vm1111_vm2, %v1554_v32, 0 }
 0x19c   : > { %2917 = vmatpush3.bf16.xpose.msra.mxu0 %v1339_v28  ;;  %2918 = vmatprep.mubr.msk.bf16.mxu0 %vm3199_vm0, %v3198_v1 }
 0x19d   : > { %2928 = vmatprep.subr.bf16.mxu0 %v3198_v1 }
 0x19e   : > { %v1664_v35 = vpop.permute.xlu0 %1663  ;;  %v1662_v39 = vpop.permute.xlu1 %1661 }
 0x19f   : > { %v1669_v37 = vsel %vm1111_vm2, %v1664_v35, 0 }
 0x1a2   : > { %v1774_v38 = vpop.permute.xlu0 %1773  ;;  %v1772_v42 = vpop.permute.xlu1 %1771 }
 0x1a3   : > { %2919 = vmatmul.mubr.msk.bf16.vlgmr.msra.gmra.mrb[8].mxu0 %vm1111_vm2, %v1332_v30  ;;  %v1779_v40 = vsel %vm1111_vm2, %v1774_v38, 0 }
 0x1a4   : > { %2929 = vmatpush3.bf16.xpose.msra.mxu0 %v1449_v31  ;;  %2930 = vmatprep.mubr.msk.bf16.mxu0 %vm3199_vm0, %v3198_v1 }
 0x1a5   : > { %2940 = vmatprep.subr.bf16.mxu0 %v3198_v1 }
 0x1a6   : > { %v1884_v41 = vpop.permute.xlu0 %1883  ;;  %v1882_v44 = vpop.permute.xlu1 %1881 }
 0x1a7   : > { %v1889_v43 = vsel %vm1111_vm2, %v1884_v41, 0 }
 0x1ab   : > { %2931 = vmatmul.mubr.msk.bf16.vlgmr.msra.gmra.mrb[12].mxu0 %vm1111_vm2, %v1442_v33 }
 0x1ac   : > { %2941 = vmatpush3.bf16.xpose.msra.mxu0 %v1559_v34  ;;  %2942 = vmatprep.mubr.msk.bf16.mxu0 %vm3199_vm0, %v3198_v1 }
 0x1ad   : > { %2952 = vmatprep.subr.bf16.mxu0 %v3198_v1 }
 0x1b3   : > { %2943 = vmatmul.mubr.msk.bf16.vlgmr.msra.gmra.mrb[16].mxu0 %vm1111_vm2, %v1552_v36 }
 0x1b4   : > { %2953 = vmatpush3.bf16.xpose.msra.mxu0 %v1669_v37  ;;  %2954 = vmatprep.mubr.msk.bf16.mxu0 %vm3199_vm0, %v3198_v1 }
 0x1b5   : > { %2964 = vmatprep.subr.bf16.mxu0 %v3198_v1 }
 0x1bb   : > { %2955 = vmatmul.mubr.msk.bf16.vlgmr.msra.gmra.mrb[20].mxu0 %vm1111_vm2, %v1662_v39 }
 0x1bc   : > { %2965 = vmatpush3.bf16.xpose.msra.mxu0 %v1779_v40  ;;  %2966 = vmatprep.mubr.msk.bf16.mxu0 %vm3199_vm0, %v3198_v1 }
 0x1bd   : > { %2976 = vmatprep.subr.bf16.mxu0 %v3198_v1 }
 0x1c3   : > { %2967 = vmatmul.mubr.msk.bf16.vlgmr.msra.gmra.mrb[24].mxu0 %vm1111_vm2, %v1772_v42 }
 0x1c4   : > { %2977 = vmatpush3.bf16.xpose.msra.mxu0 %v1889_v43  ;;  %2978 = vmatprep.mubr.msk.bf16.mxu0 %vm3199_vm0, %v3198_v1 }
 0x1c5   : > { %2988 = vmatprep.subr.bf16.mxu0 %v3198_v1 }
 0x1cb   : > { %2979 = vmatmul.mubr.msk.bf16.vlgmr.msra.gmra.mrb[28].mxu0 %vm1111_vm2, %v1882_v44 }
 0x1cc   : > { %2992 = vmatprep.mubr.msk.bf16.mxu0 %vm3199_vm0, %v3198_v1 }
 0x266   : > { %v1152_v46 = vpop.f32.mrb[0].mxu0 }
 0x267   : > { %v3478_v47 = vadd.f32 %v2760_v45, %v1152_v46  ;;  %v2896_v48 = vpop.f32.mrb[1].mxu0 }
 0x268   : > { %v1155_v49 = vpop.f32.mrb[2].mxu0 }
 0x269   : > { %v2897_v50 = vpop.f32.mrb[3].mxu0  ;;  %v1159_v51 = vsel %vm1158_vm3, %v3478_v47, -inf }
 0x26a   : > { %1160 = vmax.xlane.f32.xlu0 %v1159_v51 }
 0x26e   : > { %v1263_v53 = vpop.f32.mrb[4].mxu0 }
 0x26f   : > { %v1264_v54 = vadd.f32 %v2761_v52, %v1263_v53  ;;  %v2908_v55 = vpop.f32.mrb[5].mxu0 }
 0x270   : > { %v1266_v56 = vpop.f32.mrb[6].mxu0 }
 0x271   : > { %v2909_v57 = vpop.f32.mrb[7].mxu0  ;;  %v1270_v58 = vsel %vm1269_vm4, %v1264_v54, -inf }
 0x272   : > { %1271 = vmax.xlane.f32.xlu1 %v1270_v58 }
 0x276   : > { %v1375_v59 = vpop.f32.mrb[8].mxu0 }
 0x277   : > { %v1376_v60 = vadd.f32 %v2760_v45, %v1375_v59  ;;  %v2920_v61 = vpop.f32.mrb[9].mxu0 }
 0x278   : > { %v1378_v62 = vpop.f32.mrb[10].mxu0 }
 0x279   : > { %v2921_v63 = vpop.f32.mrb[11].mxu0  ;;  %v1381_v0 = vsel %vm1158_vm3, %v1376_v60, -inf }
 0x27a   : > { %1382 = vmax.xlane.f32.xlu0 %v1381_v0 }
 0x27e   : > { %v1485_v2 = vpop.f32.mrb[12].mxu0 }
 0x27f   : > { %v3486_v3 = vadd.f32 %v2761_v52, %v1485_v2  ;;  %v2932_v5 = vpop.f32.mrb[13].mxu0 }
 0x280   : > { %v1488_v6 = vpop.f32.mrb[14].mxu0 }
 0x281   : > { %v2933_v8 = vpop.f32.mrb[15].mxu0  ;;  %v1491_v9 = vsel %vm1269_vm4, %v3486_v3, -inf }
 0x282   : > { %1492 = vmax.xlane.f32.xlu0 %v1491_v9 }
 0x286   : > { %v1595_v10 = vpop.f32.mrb[16].mxu0 }
 0x287   : > { %v3490_v11 = vadd.f32 %v2760_v45, %v1595_v10  ;;  %v2944_v12 = vpop.f32.mrb[17].mxu0 }
 0x288   : > { %v1598_v13 = vpop.f32.mrb[18].mxu0 }
 0x289   : > { %v2945_v15 = vpop.f32.mrb[19].mxu0  ;;  %v1601_v16 = vsel %vm1158_vm3, %v3490_v11, -inf }
 0x28a   : > { %1602 = vmax.xlane.f32.xlu1 %v1601_v16 }
 0x28e   : > { %v1705_v17 = vpop.f32.mrb[20].mxu0 }
 0x28f   : > { %v3494_v18 = vadd.f32 %v2761_v52, %v1705_v17  ;;  %v2956_v19 = vpop.f32.mrb[21].mxu0 }
 0x290   : > { %v1708_v20 = vpop.f32.mrb[22].mxu0 }
 0x291   : > { %v2957_v22 = vpop.f32.mrb[23].mxu0  ;;  %v1711_v23 = vsel %vm1269_vm4, %v3494_v18, -inf }
 0x292   : > { %1712 = vmax.xlane.f32.xlu0 %v1711_v23 }
 0x296   : > { %v1815_v24 = vpop.f32.mrb[24].mxu0 }
 0x297   : > { %v1816_v25 = vadd.f32 %v2760_v45, %v1815_v24  ;;  %v2968_v26 = vpop.f32.mrb[25].mxu0 }
 0x298   : > { %v1818_v27 = vpop.f32.mrb[26].mxu0 }
 0x299   : > { %v2969_v28 = vpop.f32.mrb[27].mxu0  ;;  %v1821_v29 = vsel %vm1158_vm3, %v1816_v25, -inf }
 0x29a   : > { %1822 = vmax.xlane.f32.xlu1 %v1821_v29 }
 0x29e   : > { %v1925_v30 = vpop.f32.mrb[28].mxu0 }
 0x29f   : > { %v3499_v31 = vadd.f32 %v2761_v52, %v1925_v30  ;;  %v2980_v32 = vpop.f32.mrb[29].mxu0 }
 0x2a0   : > { %v1928_v33 = vpop.f32.mrb[30].mxu0 }
 0x2a1   : > { %v2981_v34 = vpop.f32.mrb[31].mxu0  ;;  %v1931_v35 = vsel %vm1269_vm4, %v3499_v31, -inf }
 0x2a8   : > { %1282 = vrot.lane.b32.xlu0 %v3420_v21, %s3207_s10 }
 0x2ab   : > { %1171 = vrot.lane.b32.xlu1 %v3415_v14, %s3207_s10  ;;  %s3702_s10 = sld [smem:[#allocation6_spill]] }
 0x2c7   : > { %1932 = vmax.xlane.f32.xlu0 %v1931_v35 }
 0x2f7   : > { %v1161_v36 = vpop.xlane.xlu0 %1160 }
 0x2f8   : > { %v1162_v37 = vsub.f32 %v3478_v47, %v1161_v36 }
 0x2fa   : > { %v1163_v38 = vmul.f32 1.442695, %v1162_v37 }
 0x2fc   : > { %3117 = vpow2.f32 %v1163_v38 }
 0x2ff   : > { %v1272_v39 = vpop.xlane.xlu1 %1271 }
 0x300   : > { %v1273_v40 = vsub.f32 %v1264_v54, %v1272_v39 }
 0x302   : > { %v1274_v41 = vmul.f32 1.442695, %v1273_v40 }
 0x304   : > { %3119 = vpow2.f32 %v1274_v41 }
 0x306   : > { %v3506_v42 = vpop.eup %3117 }
 0x307   : > { %v1383_v43 = vpop.xlane.xlu0 %1382  ;;  %v1165_v44 = vsel %vm1158_vm3, %v3506_v42, 0.0 }
 0x308   : > { %v1384_v45 = vsub.f32 %v1376_v60, %v1383_v43  ;;  %1166 = vadd.xlane.f32.xlu1 %v1165_v44 }
 0x30a   : > { %v1385_v46 = vmul.f32 1.442695, %v1384_v45 }
 0x30c   : > { %3121 = vpow2.f32 %v1385_v46 }
 0x30e   : > { %v3510_v48 = vpop.eup %3119 }
 0x30f   : > { %v1276_v47 = vsel %vm1269_vm4, %v3510_v48, 0.0  ;;  %v1493_v54 = vpop.xlane.xlu0 %1492 }
 0x310   : > { %1277 = vadd.xlane.f32.xlu0 %v1276_v47  ;;  %v1494_v56 = vsub.f32 %v3486_v3, %v1493_v54 }
 0x312   : > { %v1495_v57 = vmul.f32 1.442695, %v1494_v56 }
 0x314   : > { %3123 = vpow2.f32 %v1495_v57 }
 0x316   : > { %v3514_v49 = vpop.eup %3121 }
 0x317   : > { %v1387_v50 = vsel %vm1158_vm3, %v3514_v49, 0.0  ;;  %v1603_v51 = vpop.xlane.xlu1 %1602 }
 0x318   : > { %1388 = vadd.xlane.f32.xlu1 %v1387_v50  ;;  %v1604_v58 = vsub.f32 %v3490_v11, %v1603_v51 }
 0x31a   : > { %v1605_v61 = vmul.f32 1.442695, %v1604_v58 }
 0x31c   : > { %3125 = vpow2.f32 %v1605_v61 }
 0x31e   : > { %v3124_v2 = vpop.eup %3123 }
 0x31f   : > { %v1713_v59 = vpop.xlane.xlu0 %1712  ;;  %v1497_v5 = vsel %vm1269_vm4, %v3124_v2, 0.0 }
 0x320   : > { %v1714_v60 = vsub.f32 %v3494_v18, %v1713_v59 }
 0x322   : > { %v1715_v63 = vmul.f32 1.442695, %v1714_v60 }
 0x323   : > { %v1283_v12 = vpop.permute.xlu0 %1282 }
 0x324   : > { %3127 = vpow2.f32 %v1715_v63 }
 0x326   : > { %1393 = vrot.lane.b32.xlu0 %v3415_v14, %s3208_s15  ;;  %v3526_v6 = vpop.eup %3125 }
 0x327   : > { %v1823_v52 = vpop.xlane.xlu1 %1822  ;;  %v1607_v8 = vsel %vm1158_vm3, %v3526_v6, 0.0 }
 0x328   : > { %v1824_v62 = vsub.f32 %v1816_v25, %v1823_v52  ;;  %v1289_v25 = vsel %vm1287_vm6, %v1283_v12, 0 }
 0x329   : > { %1503 = vrot.lane.b32.xlu1 %v3420_v21, %s3208_s15  ;;  %s3703_s15 = sld [smem:[#allocation12_spill]] }
 0x32a   : > { %v1825_v0 = vmul.f32 1.442695, %v1824_v62 }
 0x32b   : > { %v1172_v53 = vpop.permute.xlu1 %1171 }
 0x32c   : > { %v1178_v55 = vsel %vm1176_vm5, %v1172_v53, 0  ;;  %3129 = vpow2.f32 %v1825_v0 }
 0x32d   : > { %2899 = vmatpush3.bf16.msra.mxu1 %v1178_v55 }
 0x32e   : > { %2910 = vmatprep.subr.bf16.mxu1 %v3198_v1  ;;  %v3528_v3 = vpop.eup %3127 }
 0x32f   : > { %v1717_v10 = vsel %vm1269_vm4, %v3528_v3, 0.0 }
 0x336   : > { %v3532_v9 = vpop.eup %3129 }
 0x337   : > { %v1827_v11 = vsel %vm1158_vm3, %v3532_v9, 0.0 }
 0x345   : > { %1498 = vadd.xlane.f32.xlu0 %v1497_v5 }
 0x349   : > { %1608 = vadd.xlane.f32.xlu0 %v1607_v8 }
 0x34d   : > { %1718 = vadd.xlane.f32.xlu1 %v1717_v10  ;;  %1828 = vadd.xlane.f32.xlu0 %v1827_v11 }
 0x354   : > { %v1933_v13 = vpop.xlane.xlu0 %1932 }
 0x355   : > { %v1934_v15 = vsub.f32 %v3499_v31, %v1933_v13 }
 0x357   : > { %v1935_v16 = vmul.f32 1.442695, %v1934_v15 }
 0x359   : > { %3131 = vpow2.f32 %v1935_v16 }
 0x35e   : > { %1723 = vrot.lane.b32.xlu1 %v3420_v21, %s3209_s16 }
 0x362   : > { %1833 = vrot.lane.b32.xlu1 %v3415_v14, %s3210_s18 }
 0x363   : > { %v3541_v17 = vpop.eup %3131 }
 0x364   : > { %v1937_v18 = vsel %vm1269_vm4, %v3541_v17, 0.0 }
 0x365   : > { %1938 = vadd.xlane.f32.xlu0 %v1937_v18 }
 0x366   : > { %1943 = vrot.lane.b32.xlu1 %v3420_v21, %s3210_s18  ;;  %s3705_s18 = sld [smem:[#allocation11_spill]] }
 0x37b   : > { %1613 = vrot.lane.b32.xlu0 %v3415_v14, %s3209_s16  ;;  %s3704_s16 = sld [smem:[#allocation5_spill]] }
 0x395   : > { %v1167_v19 = vpop.xlane.xlu1 %1166 }
 0x396   : > { %3133 = vrcp.f32 %v1167_v19 }
 0x39d   : > { %v1278_v20 = vpop.xlane.xlu0 %1277 }
 0x39e   : > { %3135 = vrcp.f32 %v1278_v20 }
 0x3a0   : > { %v3134_v22 = vpop.eup %3133 }
 0x3a1   : > { %v1169_v23 = vmul.f32 %v3134_v22, %v3506_v42  ;;  %v1394_v27 = vpop.permute.xlu0 %1393 }
 0x3a2   : > { %v1399_v29 = vsel %vm1176_vm5, %v1394_v27, 0  ;;  %v3102_v27 = vld [vmem:[%s3262_s8 + $0x8] sm:$0xff]  }
 0x3a3   : > { %v1170_v24 = vpack.c.bf16 %v1169_v23, %v1169_v23 }
 0x3a5   : > { %2901 = vmatmul.mubr.msk.bf16.vlgmr.msra.gmra.mrb[8].mxu1 %vm1111_vm2, %v1170_v24  ;;  %v1389_v26 = vpop.xlane.xlu1 %1388  ;;  %v3101_v24 = vld [vmem:[%s3262_s8] sm:$0xff]  }
 0x3a6   : > { %2911 = vmatpush3.bf16.msra.mxu1 %v1289_v25  ;;  %3137 = vrcp.f32 %v1389_v26  ;;  %2912 = vmatprep.mubr.msk.bf16.mxu1 %vm3199_vm0, %v3198_v1 }
 0x3a7   : > { %2922 = vmatprep.subr.bf16.mxu1 %v3198_v1  ;;  %2989 = vmatpush3.bf16.msra.mxu0 %v3101_v24 }
 0x3a8   : > { %v3136_v14 = vpop.eup %3135  ;;  %2990 = vmatprep.subr.bf16.mxu0 %v3198_v1 }
 0x3a9   : > { %v1280_v21 = vmul.f32 %v3136_v14, %v3510_v48  ;;  %v1504_v32 = vpop.permute.xlu1 %1503 }
 0x3aa   : > { %v1509_v34 = vsel %vm1287_vm6, %v1504_v32, 0 }
 0x3ab   : > { %v1281_v28 = vpack.c.bf16 %v1280_v21, %v1280_v21  ;;  %2991 = vmatpush3.bf16.msra.mxu0 %v3102_v27 }
 0x3ac   : > { %3004 = vmatprep.subr.bf16.mxu0 %v3198_v1 }
 0x3ad   : > { %2913 = vmatmul.mubr.msk.bf16.vlgmr.msra.gmra.mrb[12].mxu1 %vm1269_vm4, %v1281_v28  ;;  %v3103_v28 = vld [vmem:[%s3272_s19] sm:$0xff]  }
 0x3ae   : > { %2923 = vmatpush3.bf16.msra.mxu1 %v1399_v29  ;;  %2924 = vmatprep.mubr.msk.bf16.mxu1 %vm3199_vm0, %v3198_v1 }
 0x3af   : > { %2934 = vmatprep.subr.bf16.mxu1 %v3198_v1 }
 0x3b0   : > { %v3138_v30 = vpop.eup %3137 }
 0x3b1   : > { %v1391_v31 = vmul.f32 %v3138_v30, %v3514_v49  ;;  %v3104_v30 = vld [vmem:[%s3272_s19 + $0x8] sm:$0xff]  }
 0x3b3   : > { %v1392_v33 = vpack.c.bf16 %v1391_v31, %v1391_v31 }
 0x3b5   : > { %2925 = vmatmul.mubr.msk.bf16.vlgmr.msra.gmra.mrb[16].mxu1 %vm1111_vm2, %v1392_v33 }
 0x3b6   : > { %2935 = vmatpush3.bf16.msra.mxu1 %v1509_v34  ;;  %2936 = vmatprep.mubr.msk.bf16.mxu1 %vm3199_vm0, %v3198_v1 }
 0x3b7   : > { %2946 = vmatprep.subr.bf16.mxu1 %v3198_v1 }
 0x3d2   : > { %v1499_v35 = vpop.xlane.xlu0 %1498 }
 0x3d3   : > { %3139 = vrcp.f32 %v1499_v35 }
 0x3d6   : > { %v1609_v39 = vpop.xlane.xlu0 %1608 }
 0x3d7   : > { %3141 = vrcp.f32 %v1609_v39 }
 0x3da   : > { %v1719_v40 = vpop.xlane.xlu1 %1718  ;;  %v1829_v41 = vpop.xlane.xlu0 %1828 }
 0x3db   : > { %3143 = vrcp.f32 %v1719_v40 }
 0x3dc   : > { %3145 = vrcp.f32 %v1829_v41 }
 0x3dd   : > { %v3140_v36 = vpop.eup %3139 }
 0x3de   : > { %v1501_v37 = vmul.f32 %v3140_v36, %v3124_v2  ;;  %v1724_v48 = vpop.permute.xlu1 %1723 }
 0x3df   : > { %v1729_v50 = vsel %vm1287_vm6, %v1724_v48, 0 }
 0x3e0   : > { %v1502_v38 = vpack.c.bf16 %v1501_v37, %v1501_v37 }
 0x3e1   : > { %v3142_v42 = vpop.eup %3141 }
 0x3e2   : > { %2937 = vmatmul.mubr.msk.bf16.vlgmr.msra.gmra.mrb[20].mxu1 %vm1269_vm4, %v1502_v38  ;;  %v1611_v44 = vmul.f32 %v3142_v42, %v3526_v6  ;;  %v1834_v52 = vpop.permute.xlu1 %1833 }
 0x3e3   : > { %2948 = vmatprep.mubr.msk.bf16.mxu1 %vm3199_vm0, %v3198_v1  ;;  %v1839_v55 = vsel %vm1176_vm5, %v1834_v52, 0  ;;  %v2778_v52 = vld [vmem:[%s3267_s14] ss:$0 sm:$0xff] }
 0x3e4   : > { %v1612_v47 = vpack.c.bf16 %v1611_v44, %v1611_v44 }
 0x3e5   : > { %v3144_v49 = vpop.eup %3143 }
 0x3e6   : > { %v1721_v51 = vmul.f32 %v3144_v49, %v3528_v3  ;;  %v3146_v54 = vpop.eup %3145  ;;  %v1944_v57 = vpop.permute.xlu1 %1943 }
 0x3e7   : > { %v1831_v56 = vmul.f32 %v3146_v54, %v3532_v9  ;;  %v1949_v60 = vsel %vm1287_vm6, %v1944_v57, 0 }
 0x3e8   : > { %v1722_v53 = vpack.c.bf16 %v1721_v51, %v1721_v51 }
 0x3e9   : > { %v1832_v58 = vpack.c.bf16 %v1831_v56, %v1831_v56 }
 0x3f2   : > { %v1939_v43 = vpop.xlane.xlu0 %1938 }
 0x3f3   : > { %3147 = vrcp.f32 %v1939_v43 }
 0x3f6   : > { %v1614_v45 = vpop.permute.xlu0 %1613 }
 0x3f7   : > { %v1619_v46 = vsel %vm1176_vm5, %v1614_v45, 0 }
 0x3f8   : > { %2947 = vmatpush3.bf16.msra.mxu1 %v1619_v46 }
 0x3f9   : > { %2958 = vmatprep.subr.bf16.mxu1 %v3198_v1 }
 0x3fb   : > { %2949 = vmatmul.mubr.msk.bf16.vlgmr.msra.gmra.mrb[24].mxu1 %vm1111_vm2, %v1612_v47 }
 0x3fc   : > { %2959 = vmatpush3.bf16.msra.mxu1 %v1729_v50  ;;  %2960 = vmatprep.mubr.msk.bf16.mxu1 %vm3199_vm0, %v3198_v1 }
 0x3fd   : > { %2970 = vmatprep.subr.bf16.mxu1 %v3198_v1  ;;  %v3148_v59 = vpop.eup %3147 }
 0x3fe   : > { %v1941_v61 = vmul.f32 %v3148_v59, %v3541_v17 }
 0x400   : > { %v1942_v62 = vpack.c.bf16 %v1941_v61, %v1941_v61 }
 0x403   : > { %2961 = vmatmul.mubr.msk.bf16.vlgmr.msra.gmra.mrb[28].mxu1 %vm1269_vm4, %v1722_v53 }
 0x404   : > { %2971 = vmatpush3.bf16.msra.mxu1 %v1839_v55  ;;  %2972 = vmatprep.mubr.msk.bf16.mxu1 %vm3199_vm0, %v3198_v1 }
 0x405   : > { %2982 = vmatprep.subr.bf16.mxu1 %v3198_v1 }
 0x40b   : > { %2973 = vmatmul.mubr.msk.bf16.vlgmr.msra.gmra.mrb[32].mxu1 %vm1111_vm2, %v1832_v58  ;;  %v2784_v58 = vld [vmem:[%s3277_s24] ss:$0 sm:$0xff] }
 0x40c   : > { %2983 = vmatpush3.bf16.msra.mxu1 %v1949_v60  ;;  %2984 = vmatprep.mubr.msk.bf16.mxu1 %vm3199_vm0, %v3198_v1 }
 0x40d   : > { %2996 = vmatprep.subr.bf16.mxu1 %v3198_v1 }
 0x413   : > { %2985 = vmatmul.mubr.msk.bf16.vlgmr.msra.gmra.mrb[36].mxu1 %vm1269_vm4, %v1942_v62 }
 0x414   : > { %3000 = vmatprep.mubr.msk.bf16.mxu1 %vm3199_vm0, %v3198_v1  ;;  %2997 = vmatpush3.bf16.msra.mxu1 %v3103_v28 }
 0x415   : > { %2998 = vmatprep.subr.bf16.mxu1 %v3198_v1 }
 0x418   : > { %2999 = vmatpush3.bf16.msra.mxu1 %v3104_v30 }
 0x419   : > { %3012 = vmatprep.subr.bf16.mxu1 %v3198_v1 }
 0x478   : > { %v3592_v63 = vpop.f32.mrb[8].mxu1 }
 0x479   : > { %v2902_v0 = vpop.f32.mrb[9].mxu1 }
 0x47a   : > { %v1217_v2 = vpop.f32.mrb[10].mxu1 }
 0x47b   : > { %v2903_v5 = vpop.f32.mrb[11].mxu1 }
 0x480   : > { %v1325_v6 = vpop.f32.mrb[12].mxu1 }
 0x481   : > { %v2914_v3 = vpop.f32.mrb[13].mxu1 }
 0x482   : > { %v1328_v8 = vpop.f32.mrb[14].mxu1 }
 0x483   : > { %v2915_v9 = vpop.f32.mrb[15].mxu1 }
 0x488   : > { %v1435_v10 = vpop.f32.mrb[16].mxu1 }
 0x489   : > { %v2926_v11 = vpop.f32.mrb[17].mxu1 }
 0x48a   : > { %v1438_v12 = vpop.f32.mrb[18].mxu1 }
 0x48b   : > { %v2927_v13 = vpop.f32.mrb[19].mxu1 }
 0x4b5   : > { %v1545_v15 = vpop.f32.mrb[20].mxu1 }
 0x4b6   : > { %2009 = vrot.lane.b32.xlu1 %v1545_v15, %s3211_s22  ;;  %v2938_v16 = vpop.f32.mrb[21].mxu1 }
 0x4b7   : > { %v1548_v17 = vpop.f32.mrb[22].mxu1 }
 0x4b8   : > { %v2939_v18 = vpop.f32.mrb[23].mxu1  ;;  %v3106_v17 = vld [vmem:[%s3302_s27 + $0x8] sm:$0xff]  }
 0x4ce   : > { %v1655_v19 = vpop.f32.mrb[24].mxu1 }
 0x4cf   : > { %v2950_v20 = vpop.f32.mrb[25].mxu1 }
 0x4d0   : > { %v1658_v22 = vpop.f32.mrb[26].mxu1 }
 0x4d1   : > { %v2951_v23 = vpop.f32.mrb[27].mxu1 }
 0x4d6   : > { %v1765_v25 = vpop.f32.mrb[28].mxu1 }
 0x4d7   : > { %2013 = vrot.lane.b32.xlu1 %v1765_v25, %s3212_s23  ;;  %v2962_v26 = vpop.f32.mrb[29].mxu1 }
 0x4d8   : > { %v1768_v14 = vpop.f32.mrb[30].mxu1  ;;  %v2782_v26 = vld [vmem:[%s3282_s30] ss:$0 sm:$0xff] }
 0x4d9   : > { %v2963_v21 = vpop.f32.mrb[31].mxu1 }
 0x4da   : > { %v2783_v21 = vld [vmem:[%s3698_s28] ss:$0 sm:$0xff]  ;;  %s3709_s28 = sld [smem:[#allocation9_spill]] }
 0x4db   : > { %1992 = vrot.lane.b32.xlu1 %v1435_v10, %s3211_s22  ;;  %s3706_s22 = sld [smem:[#allocation7_spill]] }
 0x4de   : > { %v1875_v29 = vpop.f32.mrb[32].mxu1 }
 0x4df   : > { %2000 = vrot.lane.b32.xlu1 %v1875_v29, %s3213_s26  ;;  %v2974_v31 = vpop.f32.mrb[33].mxu1  ;;  %v2788_v29 = vld [vmem:[%s3699_s1] ss:$0 sm:$0xff]  ;;  %s949_s1 = scalar_lea.vmem %s3362_s6, %s3389_s0 }
 0x4e0   : > { %v1878_v32 = vpop.f32.mrb[34].mxu1 }
 0x4e1   : > { %v2975_v33 = vpop.f32.mrb[35].mxu1  ;;  %v3107_v32 = vld [vmem:[%s3700_s2] sm:$0xff]  }
 0x4e6   : > { %v1985_v34 = vpop.f32.mrb[36].mxu1 }
 0x4e7   : > { %2017 = vrot.lane.b32.xlu0 %v1985_v34, %s3213_s26  ;;  %v2986_v35 = vpop.f32.mrb[37].mxu1  ;;  %s3708_s26 = sld [smem:[#allocation8_spill]] }
 0x4e8   : > { %v1988_v36 = vpop.f32.mrb[38].mxu1  ;;  %v2789_v35 = vld [vmem:[%s3701_s11] ss:$0 sm:$0xff]  ;;  %s953_s11 = scalar_lea.vmem %s3367_s4, %s3389_s0 }
 0x4e9   : > { %v2987_v37 = vpop.f32.mrb[39].mxu1  ;;  %v3108_v36 = vld [vmem:[%s3700_s2 + $0x8] sm:$0xff]  }
 0x4eb   : > { %1996 = vrot.lane.b32.xlu0 %v1655_v19, %s3212_s23  ;;  %s3707_s23 = sld [smem:[#allocation13_spill]] }
 0x528   : > { %v2010_v38 = vpop.permute.xlu1 %2009 }
 0x529   : > { %v2020_v40 = vsel %vm1111_vm2, %v1325_v6, %v2010_v38 }
 0x549   : > { %v2014_v39 = vpop.permute.xlu1 %2013 }
 0x54a   : > { %v2021_v42 = vsel %vm2004_vm7, %v2020_v40, %v2014_v39  ;;  %v3109_v39 = vld [vmem:[%s3702_s10] sm:$0xff]   ;;  %v3110_v40 = vld [vmem:[%s3702_s10 + $0x8] sm:$0xff]  }
 0x54d   : > { %v1993_v41 = vpop.permute.xlu1 %1992 }
 0x54e   : > { %v2003_v46 = vsel %vm1111_vm2, %v3592_v63, %v1993_v41  ;;  %v3111_v41 = vld [vmem:[%s3702_s10 + $0x10] sm:$0xff]  }
 0x551   : > { %v2001_v47 = vpop.permute.xlu1 %2000 }
 0x559   : > { %v2018_v43 = vpop.permute.xlu0 %2017 }
 0x55a   : > { %v2022_v44 = vsel %vm2006_vm8, %v2021_v42, %v2018_v43  ;;  %v3112_v42 = vld [vmem:[%s3703_s15] sm:$0xff]   ;;  %v3114_v43 = vld [vmem:[%s3703_s15 + $0x8] sm:$0xff]  }
 0x55b   : > { %v2027_v45 = vpack.c.bf16 %v2022_v44, %v2022_v44  ;;  %v3113_v44 = vld [vmem:[%s3702_s10 + $0x18] sm:$0xff]  }
 0x55d   : > { %2993 = vmatmul.mubr.msk.bf16.vlgmr.msra.gmra.mrb[32].mxu0 %vm983_vm1, %v2027_v45  ;;  %v1997_v48 = vpop.permute.xlu0 %1996  ;;  %v3115_v45 = vld [vmem:[%s3703_s15 + $0x10] sm:$0xff]  }
 0x55e   : > { %v2005_v49 = vsel %vm2004_vm7, %v2003_v46, %v1997_v48  ;;  %3008 = vmatprep.mubr.msk.bf16.mxu0 %vm3199_vm0, %v3198_v1  ;;  %v3116_v46 = vld [vmem:[%s3703_s15 + $0x18] sm:$0xff]   ;;  %v2790_v48 = vld [vmem:[%s3704_s16] ss:$0 sm:$0xff] }
 0x55f   : > { %v2007_v50 = vsel %vm2006_vm8, %v2005_v49, %v2001_v47 }
 0x560   : > { %v2125_v51 = vpack.c.bf16 %v2007_v50, %v2007_v50 }
 0x562   : > { %3001 = vmatmul.mubr.msk.bf16.vlgmr.msra.gmra.mrb[40].mxu1 %vm983_vm1, %v2125_v51 }
 0x563   : > { %3020 = vmatprep.mubr.msk.bf16.mxu1 %vm3199_vm0, %v3198_v1  ;;  %3013 = vmatpush3.bf16.msra.mxu1 %v3109_v39 }
 0x564   : > { %3014 = vmatprep.subr.bf16.mxu1 %v3198_v1 }
 0x567   : > { %3015 = vmatpush3.bf16.msra.mxu1 %v3110_v40 }
 0x568   : > { %3016 = vmatprep.subr.bf16.mxu1 %v3198_v1 }
 0x56b   : > { %3017 = vmatpush3.bf16.msra.mxu1 %v3111_v41 }
 0x56c   : > { %3018 = vmatprep.subr.bf16.mxu1 %v3198_v1 }
 0x56f   : > { %3019 = vmatpush3.bf16.msra.mxu1 %v3113_v44 }
 0x630   : > { %v2084_v53 = vpop.f32.mrb[32].mxu0 }
 0x631   : > { %v2085_v54 = vadd.f32 %v2778_v52, %v2084_v53  ;;  %v2994_v55 = vpop.f32.mrb[33].mxu0 }
 0x632   : > { %v2087_v56 = vpop.f32.mrb[34].mxu0  ;;  %v2802_v55 = vld [vmem:[%s3705_s18] ss:$0 sm:$0xff] }
 0x633   : > { %v2995_v57 = vpop.f32.mrb[35].mxu0  ;;  %v2090_v59 = vadd.f32 %v2085_v54, %v3395_v4 }
 0x635   : > { %v2182_v60 = vpop.f32.mrb[40].mxu1  ;;  %v2093_v61 = vsel %vm983_vm1, %v2090_v59, 0.0 }
 0x636   : > { %v2183_v62 = vadd.f32 %v2784_v58, %v2182_v60  ;;  %2094 = vadd.xlane.f32.xlu0 %v2093_v61  ;;  %v3002_v63 = vpop.f32.mrb[41].mxu1 }
 0x637   : > { %v2185_v0 = vpop.f32.mrb[42].mxu1 }
 0x638   : > { %v3003_v2 = vpop.f32.mrb[43].mxu1  ;;  %v2188_v5 = vadd.f32 %v2183_v62, %v3402_v7  ;;  %v3105_v7 = vld [vmem:[%s3302_s27] sm:$0xff]  }
 0x639   : > { %3005 = vmatpush3.bf16.msra.mxu0 %v3105_v7  ;;  %v2794_v7 = vld [vmem:[%s3706_s22] ss:$0 sm:$0xff] }
 0x63a   : > { %v2192_v6 = vsel %vm2191_vm9, %v2188_v5, 0.0  ;;  %3006 = vmatprep.subr.bf16.mxu0 %v3198_v1 }
 0x63b   : > { %2193 = vadd.xlane.f32.xlu1 %v2192_v6 }
 0x63d   : > { %3007 = vmatpush3.bf16.msra.mxu0 %v3106_v17 }
 0x63e   : > { %3024 = vmatprep.subr.bf16.mxu0 %v3198_v1 }
 0x6c3   : > { %v2095_v3 = vpop.xlane.xlu0 %2094 }
 0x6c4   : > { %v2097_v8 = vmul.f32 0.03125, %v2095_v3 }
 0x6c6   : > { %v2098_v9 = vsub.f32 %v2090_v59, %v2097_v8 }
 0x6c8   : > { %v2194_v4 = vpop.xlane.xlu1 %2193  ;;  %v2099_v10 = vmul.f32 %v2098_v9, %v2098_v9 }
 0x6c9   : > { %v2195_v11 = vmul.f32 0.03125, %v2194_v4 }
 0x6ca   : > { %v2100_v12 = vsel %vm983_vm1, %v2099_v10, 0.0 }
 0x6cb   : > { %v2196_v13 = vsub.f32 %v2188_v5, %v2195_v11  ;;  %2101 = vadd.xlane.f32.xlu0 %v2100_v12 }
 0x6cd   : > { %v2197_v15 = vmul.f32 %v2196_v13, %v2196_v13 }
 0x6cf   : > { %v2198_v16 = vsel %vm2191_vm9, %v2197_v15, 0.0 }
 0x6d0   : > { %2199 = vadd.xlane.f32.xlu0 %v2198_v16 }
 0x758   : > { %v2102_v18 = vpop.xlane.xlu0 %2101 }
 0x759   : > { %v2103_v19 = vmul.f32 0.03125, %v2102_v18 }
 0x75b   : > { %v2104_v20 = vadd.f32 1e-12, %v2103_v19 }
 0x75d   : > { %3149 = vrsqrt.f32 %v2104_v20  ;;  %v2200_v22 = vpop.xlane.xlu0 %2199 }
 0x75e   : > { %v2201_v23 = vmul.f32 0.03125, %v2200_v22 }
 0x760   : > { %v2202_v24 = vadd.f32 1e-12, %v2201_v23 }
 0x762   : > { %3151 = vrsqrt.f32 %v2202_v24 }
 0x767   : > { %v3150_v25 = vpop.eup %3149 }
 0x768   : > { %v2106_v14 = vmul.f32 %v3150_v25, %v2098_v9  ;;  %v2806_v25 = vld [vmem:[%s3707_s23] ss:$0 sm:$0xff] }
 0x76a   : > { %v2113_v27 = vmul.f32 %v2782_v26, %v2106_v14 }
 0x76c   : > { %v3152_v28 = vpop.eup %3151  ;;  %v3626_v30 = vadd.f32 %v2783_v21, %v2113_v27 }
 0x76d   : > { %v2204_v31 = vmul.f32 %v3152_v28, %v2196_v13 }
 0x76e   : > { %v2223_v33 = vpack.c.bf16 %v3626_v30, %v3626_v30 }
 0x76f   : > { %v2211_v34 = vmul.f32 %v2788_v29, %v2204_v31 }
 0x770   : > { %3009 = vmatmul.mubr.msk.bf16.vlgmr.msra.gmra.mrb[36].mxu0 %vm983_vm1, %v2223_v33 }
 0x771   : > { %3025 = vmatpush3.bf16.msra.mxu0 %v3107_v32  ;;  %3028 = vmatprep.mubr.msk.bf16.mxu0 %vm3199_vm0, %v3198_v1  ;;  %v3637_v37 = vadd.f32 %v2789_v35, %v2211_v34 }
 0x772   : > { %3026 = vmatprep.subr.bf16.mxu0 %v3198_v1 }
 0x773   : > { %v2414_v38 = vpack.c.bf16 %v3637_v37, %v3637_v37 }
 0x775   : > { %3027 = vmatpush3.bf16.msra.mxu0 %v3108_v36 }
 0x776   : > { %3032 = vmatprep.subr.bf16.mxu0 %v3198_v1 }
 0x778   : > { %3029 = vmatmul.mubr.msk.bf16.vlgmr.msra.gmra.mrb[40].mxu0 %vm983_vm1, %v2414_v38 }
 0x779   : > { %3040 = vmatprep.mubr.msk.bf16.mxu0 %vm3199_vm0, %v3198_v1  ;;  %3033 = vmatpush3.bf16.msra.mxu0 %v3112_v42 }
 0x77a   : > { %3034 = vmatprep.subr.bf16.mxu0 %v3198_v1 }
 0x77d   : > { %3035 = vmatpush3.bf16.msra.mxu0 %v3114_v43 }
 0x77e   : > { %3036 = vmatprep.subr.bf16.mxu0 %v3198_v1 }
 0x781   : > { %3037 = vmatpush3.bf16.msra.mxu0 %v3115_v45 }
 0x782   : > { %3038 = vmatprep.subr.bf16.mxu0 %v3198_v1 }
 0x785   : > { %3039 = vmatpush3.bf16.msra.mxu0 %v3116_v46 }
 0x843   : > { %v2280_v47 = vpop.f32.mrb[36].mxu0 }
 0x844   : > { %v2281_v49 = vadd.f32 %v2790_v48, %v2280_v47  ;;  %v3010_v50 = vpop.f32.mrb[37].mxu0  ;;  %v2800_v47 = vld [vmem:[%s3708_s26] ss:$0 sm:$0xff] }
 0x845   : > { %v2283_v51 = vpop.f32.mrb[38].mxu0  ;;  %v2801_v50 = vld [vmem:[%s3709_s28] ss:$0 sm:$0xff] }
 0x846   : > { %v2287_v52 = vmul.f32 0.044715, %v2281_v49  ;;  %v3011_v53 = vpop.f32.mrb[39].mxu0  ;;  %v2286_v8 = vmul.f32 0.5, %v2281_v49 }
 0x848   : > { %v2288_v54 = vmul.f32 %v2287_v52, %v2281_v49 }
 0x84a   : > { %v2289_v56 = vmul.f32 %v2288_v54, %v2281_v49  ;;  %v2812_v54 = vld [vmem:[%s3352_s12] ss:$0 sm:$0xff] }
 0x84b   : > { %v2471_v57 = vpop.f32.mrb[40].mxu0 }
 0x84c   : > { %v2290_v58 = vadd.f32 %v2289_v56, %v2281_v49  ;;  %v2472_v59 = vadd.f32 %v2802_v55, %v2471_v57  ;;  %v3030_v60 = vpop.f32.mrb[41].mxu0  ;;  %v2813_v56 = vld [vmem:[%s3357_s20] ss:$0 sm:$0xff] }
 0x84d   : > { %v2474_v61 = vpop.f32.mrb[42].mxu0 }
 0x84e   : > { %v2291_v62 = vmul.f32 0.7978846, %v2290_v58  ;;  %v2478_v63 = vmul.f32 0.044715, %v2472_v59  ;;  %v3031_v0 = vpop.f32.mrb[43].mxu0  ;;  %v2477_v12 = vmul.f32 0.5, %v2472_v59 }
 0x850   : > { %3153 = vtanh.f32 %v2291_v62  ;;  %v2479_v1 = vmul.f32 %v2478_v63, %v2472_v59 }
 0x852   : > { %v2480_v2 = vmul.f32 %v2479_v1, %v2472_v59 }
 0x854   : > { %v2481_v5 = vadd.f32 %v2480_v2, %v2472_v59 }
 0x856   : > { %v2482_v6 = vmul.f32 0.7978846, %v2481_v5 }
 0x858   : > { %3155 = vtanh.f32 %v2482_v6 }
 0x85a   : > { %v3154_v3 = vpop.eup %3153 }
 0x85b   : > { %v2293_v9 = vadd.f32 1.0, %v3154_v3 }
 0x85d   : > { %v2294_v4 = vmul.f32 %v2293_v9, %v2286_v8 }
 0x85f   : > { %v2303_v10 = vpack.c.bf16 %v2294_v4, %v2294_v4 }
 0x861   : > { %3021 = vmatmul.mubr.msk.bf16.vlgmr.msra.gmra.mrb[44].mxu1 %vm2335_vm10, %v2303_v10 }
 0x862   : > { %v3156_v11 = vpop.eup %3155 }
 0x863   : > { %v2484_v13 = vadd.f32 1.0, %v3156_v11 }
 0x865   : > { %v2485_v15 = vmul.f32 %v2484_v13, %v2477_v12 }
 0x867   : > { %v2494_v16 = vpack.c.bf16 %v2485_v15, %v2485_v15 }
 0x869   : > { %3041 = vmatmul.mubr.msk.bf16.vlgmr.msra.gmra.mrb[44].mxu0 %vm2335_vm10, %v2494_v16 }
 0x934   : > { %v2373_v17 = vpop.f32.mrb[44].mxu1 }
 0x935   : > { %v2374_v18 = vadd.f32 %v2794_v7, %v2373_v17  ;;  %v3022_v19 = vpop.f32.mrb[45].mxu1 }
 0x936   : > { %v2376_v20 = vpop.f32.mrb[46].mxu1 }
 0x937   : > { %v3023_v22 = vpop.f32.mrb[47].mxu1  ;;  %v2379_v23 = vadd.f32 %v2374_v18, %v3626_v30 }
 0x939   : > { %v2382_v24 = vsel %vm983_vm1, %v2379_v23, 0.0 }
 0x93a   : > { %2383 = vadd.xlane.f32.xlu1 %v2382_v24 }
 0x93c   : > { %v2563_v26 = vpop.f32.mrb[44].mxu0 }
 0x93d   : > { %v2564_v14 = vadd.f32 %v2806_v25, %v2563_v26  ;;  %v3042_v21 = vpop.f32.mrb[45].mxu0 }
 0x93e   : > { %v2566_v27 = vpop.f32.mrb[46].mxu0 }
 0x93f   : > { %v3043_v28 = vpop.f32.mrb[47].mxu0  ;;  %v2569_v29 = vadd.f32 %v2564_v14, %v3637_v37 }
 0x941   : > { %v2572_v31 = vsel %vm2191_vm9, %v2569_v29, 0.0 }
 0x942   : > { %2573 = vadd.xlane.f32.xlu0 %v2572_v31 }
 0x9c7   : > { %v2384_v32 = vpop.xlane.xlu1 %2383 }
 0x9c8   : > { %v2385_v33 = vmul.f32 0.03125, %v2384_v32 }
 0x9ca   : > { %v2386_v34 = vsub.f32 %v2379_v23, %v2385_v33 }
 0x9cc   : > { %v2387_v35 = vmul.f32 %v2386_v34, %v2386_v34 }
 0x9ce   : > { %v2388_v30 = vsel %vm983_vm1, %v2387_v35, 0.0 }
 0x9cf   : > { %v2574_v36 = vpop.xlane.xlu0 %2573  ;;  %2389 = vadd.xlane.f32.xlu1 %v2388_v30 }
 0x9d0   : > { %v2575_v38 = vmul.f32 0.03125, %v2574_v36 }
 0x9d2   : > { %v2576_v39 = vsub.f32 %v2569_v29, %v2575_v38 }
 0x9d4   : > { %v2577_v40 = vmul.f32 %v2576_v39, %v2576_v39 }
 0x9d6   : > { %v2578_v37 = vsel %vm2191_vm9, %v2577_v40, 0.0 }
 0x9d7   : > { %2579 = vadd.xlane.f32.xlu0 %v2578_v37 }
 0xa5c   : > { %v2390_v41 = vpop.xlane.xlu1 %2389 }
 0xa5d   : > { %v2391_v42 = vmul.f32 0.03125, %v2390_v41 }
 0xa5f   : > { %v2392_v43 = vadd.f32 1e-12, %v2391_v42 }
 0xa61   : > { %3157 = vrsqrt.f32 %v2392_v43 }
 0xa64   : > { %v2580_v44 = vpop.xlane.xlu0 %2579 }
 0xa65   : > { %v2581_v45 = vmul.f32 0.03125, %v2580_v44 }
 0xa67   : > { %v2582_v46 = vadd.f32 1e-12, %v2581_v45 }
 0xa69   : > { %3159 = vrsqrt.f32 %v2582_v46 }
 0xa6b   : > { %v3158_v48 = vpop.eup %3157 }
 0xa6c   : > { %v2394_v49 = vmul.f32 %v3158_v48, %v2386_v34 }
 0xa6e   : > { %v2401_v51 = vmul.f32 %v2800_v47, %v2394_v49 }
 0xa70   : > { %v2408_v52 = vadd.f32 %v2801_v50, %v2401_v51 }
 0xa72   : > { %2409 = vst.msk [vmem:[%s949_s1] sm:$0xff] %vm983_vm1, %v2408_v52 }
 0xa73   : > { %v3160_v53 = vpop.eup %3159 }
 0xa74   : > { %v2584_v55 = vmul.f32 %v3160_v53, %v2576_v39 }
 0xa76   : > { %v2591_v57 = vmul.f32 %v2812_v54, %v2584_v55 }
 0xa78   : > { %v2598_v58 = vadd.f32 %v2813_v56, %v2591_v57 }
 0xa7a   : > { %2599 = vst.msk [vmem:[%s953_s11] sm:$0x3f] %vm2191_vm9, %v2598_v58 }
 0xa7b PF: > { %s70_s7 = sadd.s32 1, %s3167_s7  }
 0xa7c   : > { %p67_p4 = scmp.ge.s32.totalorder %s70_s7, 4  }
 0xa7e   :  { %69 = sbr.rel (!%p67_p4) target bundleno = 46 (0x2e), region = 212 }

</bundles_post_ra>
